<compile_context>
chip_gen: v6e
topology: v6e:2x2x1
jax: 0.10.0
libtpu: 0.0.40
codegen_flags: <defaults>
</compile_context>

<pallas_src>
import jax
import jax.numpy as jnp
from jax.experimental import pallas as pl
from jax.experimental.pallas import tpu as pltpu


# Flat row strides / lengths used inside the kernel.
S1 = 32                       # conv1 layout: 28 rows x stride 32 (cols >= 28 are junk)
L1 = 28 * S1                  # 896
S2 = 16                       # pooled1 / conv2 layout: rows x stride 16
L2 = 10 * S2                  # 160
M1 = 2 * 13 * S1 + 2 * 13 + 1 # 859  (pool1 shifted-max slice length)
M2 = 2 * 4 * S2 + 2 * 4 + 1   # 137  (pool2 shifted-max slice length)
P1W = 256                     # pooled1 padded flat width (14 rows * stride 16, zero-padded)
P2W = 40                      # pooled2 padded flat width (5 rows * stride 8, zero-padded)


def lenet_kernel(x_ref, w1_ref, b1_ref, sel1_ref, w2_ref, b2_ref, sel2_ref,
                 fw1_ref, fb1_ref, fw2_ref, fb2_ref, fw3_ref, fb3_ref, o_ref):
    f32 = jnp.float32
    xf = x_ref[...]                                    # (3, 1152) flat padded image

    # ---- conv1 + bias + ReLU : (6, 896) lane-dense, row stride 32 ----------
    acc1 = jnp.zeros((6, L1), f32)
    for i in range(5):
        for j in range(5):
            off = S1 * i + j
            acc1 = acc1 + jnp.dot(w1_ref[5 * i + j], xf[:, off:off + L1],
                                  preferred_element_type=f32)
    h1 = jnp.maximum(acc1 + b1_ref[...], 0.0)

    # ---- maxpool 2x2/2 : max of 4 shifted slices, then 0/1-matmul downsample
    m1 = jnp.maximum(jnp.maximum(h1[:, 0:M1], h1[:, 1:M1 + 1]),
                     jnp.maximum(h1[:, S1:S1 + M1], h1[:, S1 + 1:S1 + 1 + M1]))
    p1 = jnp.dot(m1, sel1_ref[...], preferred_element_type=f32)    # (6, 256)

    # ---- conv2 + bias + ReLU : (16, 160) lane-dense, row stride 16 ---------
    acc2 = jnp.zeros((16, L2), f32)
    for i in range(5):
        for j in range(5):
            off = S2 * i + j
            acc2 = acc2 + jnp.dot(w2_ref[5 * i + j], p1[:, off:off + L2],
                                  preferred_element_type=f32)
    h2 = jnp.maximum(acc2 + b2_ref[...], 0.0)

    m2 = jnp.maximum(jnp.maximum(h2[:, 0:M2], h2[:, 1:M2 + 1]),
                     jnp.maximum(h2[:, S2:S2 + M2], h2[:, S2 + 1:S2 + 1 + M2]))
    p2 = jnp.dot(m2, sel2_ref[...], preferred_element_type=f32)    # (16, 40)

    # ---- fc1 -> relu -> fc2 -> relu -> fc3 (all 128-lane padded) -----------
    a1 = jnp.zeros((1, 128), f32)
    for c in range(16):        # contract over (channel, spatial) without reshapes
        a1 = a1 + jnp.dot(p2[c:c + 1, :], fw1_ref[c], preferred_element_type=f32)
    z1 = jnp.maximum(a1 + fb1_ref[...], 0.0)
    z2 = jnp.maximum(jnp.dot(z1, fw2_ref[...], preferred_element_type=f32)
                     + fb2_ref[...], 0.0)
    o_ref[...] = (jnp.dot(z2, fw3_ref[...], preferred_element_type=f32)
                  + fb3_ref[...])


def _full_spec(shape):
    nd = len(shape)
    return pl.BlockSpec(shape, lambda i, _nd=nd: (0,) * _nd)


def net_forward(x, p):
    # x: (1, 3, 32, 32) NCHW float32 (batch must be 1 — see header comment).
    xflat = x[0].reshape(3, 32 * 32)
    xflat = jnp.pad(xflat, ((0, 0), (0, 128)))         # (3, 1152): taps never read OOB

    args = (xflat, p["w1"], p["b1"], p["sel1"], p["w2"], p["b2"], p["sel2"],
            p["fw1"], p["fb1"], p["fw2"], p["fb2"], p["fw3"], p["fb3"])

    flops = 2 * (25 * 6 * 3 * L1 + 6 * M1 * P1W + 25 * 16 * 6 * L2
                 + 16 * M2 * P2W + 16 * 40 * 128 + 128 * 128 + 128 * 128)
    bytes_accessed = int(sum(a.size * a.dtype.itemsize for a in args) + 128 * 4)

    out = pl.pallas_call(
        lenet_kernel,
        grid=(1,),
        in_specs=[_full_spec(a.shape) for a in args],
        out_specs=pl.BlockSpec((1, 128), lambda i: (0, 0)),
        out_shape=jax.ShapeDtypeStruct((1, 128), jnp.float32),
        compiler_params=pltpu.CompilerParams(dimension_semantics=("arbitrary",)),
        cost_estimate=pl.CostEstimate(flops=flops, transcendentals=0,
                                      bytes_accessed=bytes_accessed),
    )(*args)
    return out[0, :10]                                  # (10,) — matches torch output


def init_params(key):
    ks = jax.random.split(key, 10)

    def u(k, shape, fan_in):
        bound = 1.0 / float(fan_in) ** 0.5
        return jax.random.uniform(k, shape, jnp.float32, -bound, bound)

    # PyTorch-native parameter shapes.
    conv1_w = u(ks[0], (6, 3, 5, 5), 3 * 5 * 5)
    conv1_b = u(ks[1], (6,), 3 * 5 * 5)
    conv2_w = u(ks[2], (16, 6, 5, 5), 6 * 5 * 5)
    conv2_b = u(ks[3], (16,), 6 * 5 * 5)
    fc1_w = u(ks[4], (120, 400), 400)
    fc1_b = u(ks[5], (120,), 400)
    fc2_w = u(ks[6], (84, 120), 120)
    fc2_b = u(ks[7], (84,), 120)
    fc3_w = u(ks[8], (10, 84), 84)
    fc3_b = u(ks[9], (10,), 84)

    p = {}
    # conv taps packed as w[tap = 5*i + j, c_out, c_in] (PyTorch (o,c,i,j) order).
    p["w1"] = jnp.transpose(conv1_w, (2, 3, 0, 1)).reshape(25, 6, 3)
    p["b1"] = conv1_b.reshape(6, 1)
    p["w2"] = jnp.transpose(conv2_w, (2, 3, 0, 1)).reshape(25, 16, 6)
    p["b2"] = conv2_b.reshape(16, 1)

    # pool1 selection: flat index 2a*32 + 2b of the 28x32 conv1 layout -> col 16a+b.
    n = jnp.arange(M1)[:, None]
    m = jnp.arange(P1W)[None, :]
    a, b = m // S2, m % S2
    p["sel1"] = ((n == 2 * S1 * a + 2 * b) & (a < 14) & (b < 14)).astype(jnp.float32)

    # pool2 selection: flat index 2a*16 + 2b of the 10x16 conv2 layout -> col 8a+b.
    n2 = jnp.arange(M2)[:, None]
    m2 = jnp.arange(P2W)[None, :]
    a2, b2 = m2 // 8, m2 % 8
    p["sel2"] = ((n2 == 2 * S2 * a2 + 2 * b2) & (a2 < 5) & (b2 < 5)).astype(jnp.float32)

    # fc1 packed per channel: fw1[c, 8a+b, k] = fc1_w[k, 25c + 5a + b], zero-padded
    # on the spatial (5->8) and output (120->128) axes.
    t = jnp.transpose(fc1_w.reshape(120, 16, 5, 5), (1, 2, 3, 0))   # (16,5,5,120)
    p["fw1"] = jnp.pad(t, ((0, 0), (0, 0), (0, 3), (0, 8))).reshape(16, 40, 128)
    p["fb1"] = jnp.pad(fc1_b, (0, 8)).reshape(1, 128)

    p["fw2"] = jnp.pad(fc2_w.T, ((0, 8), (0, 44)))       # (128, 128)
    p["fb2"] = jnp.pad(fc2_b, (0, 44)).reshape(1, 128)
    p["fw3"] = jnp.pad(fc3_w.T, ((0, 44), (0, 118)))     # (128, 128)
    p["fb3"] = jnp.pad(fc3_b, (0, 118)).reshape(1, 128)
    return p


if __name__ == "__main__":
    key = jax.random.PRNGKey(0)
    k_x, k_p = jax.random.split(key)
    x = jax.random.normal(k_x, (1, 3, 32, 32), dtype=jnp.float32)
    params = init_params(k_p)

    y = net_forward(x, params)
    y = jax.block_until_ready(y)
    assert y.shape == (10,) and y.dtype == jnp.float32
    print("KERNEL_OK")
</pallas_src>

<mosaic_0001>
module attributes {stable_mosaic.version = 11 : i64} {
  func.func @lenet_kernel(%arg0: i32, %arg1: memref<3x1152xf32, #tpu.memory_space<vmem>>, %arg2: memref<25x6x3xf32, #tpu.memory_space<vmem>>, %arg3: memref<6x1xf32, #tpu.memory_space<vmem>>, %arg4: memref<859x256xf32, #tpu.memory_space<vmem>>, %arg5: memref<25x16x6xf32, #tpu.memory_space<vmem>>, %arg6: memref<16x1xf32, #tpu.memory_space<vmem>>, %arg7: memref<137x40xf32, #tpu.memory_space<vmem>>, %arg8: memref<16x40x128xf32, #tpu.memory_space<vmem>>, %arg9: memref<1x128xf32, #tpu.memory_space<vmem>>, %arg10: memref<128x128xf32, #tpu.memory_space<vmem>>, %arg11: memref<1x128xf32, #tpu.memory_space<vmem>>, %arg12: memref<128x128xf32, #tpu.memory_space<vmem>>, %arg13: memref<1x128xf32, #tpu.memory_space<vmem>>, %arg14: memref<1x128xf32, #tpu.memory_space<vmem>>) attributes {dimension_semantics = [#tpu.dimension_semantics<arbitrary>], iteration_bounds = array<i64: 1>, scalar_prefetch = 0 : i64, scratch_operands = 0 : i64, tpu.core_type = #tpu.core_type<tc>, window_params = [{pipeline_mode = #tpu.pipeline_mode<synchronous>, transform_indices = @transform_0, window_bounds = array<i64: 3, 1152>}, {pipeline_mode = #tpu.pipeline_mode<synchronous>, transform_indices = @transform_1, window_bounds = array<i64: 25, 6, 3>}, {pipeline_mode = #tpu.pipeline_mode<synchronous>, transform_indices = @transform_2, window_bounds = array<i64: 6, 1>}, {pipeline_mode = #tpu.pipeline_mode<synchronous>, transform_indices = @transform_3, window_bounds = array<i64: 859, 256>}, {pipeline_mode = #tpu.pipeline_mode<synchronous>, transform_indices = @transform_4, window_bounds = array<i64: 25, 16, 6>}, {pipeline_mode = #tpu.pipeline_mode<synchronous>, transform_indices = @transform_5, window_bounds = array<i64: 16, 1>}, {pipeline_mode = #tpu.pipeline_mode<synchronous>, transform_indices = @transform_6, window_bounds = array<i64: 137, 40>}, {pipeline_mode = #tpu.pipeline_mode<synchronous>, transform_indices = @transform_7, window_bounds = array<i64: 16, 40, 128>}, {pipeline_mode = #tpu.pipeline_mode<synchronous>, transform_indices = @transform_8, window_bounds = array<i64: 1, 128>}, {pipeline_mode = #tpu.pipeline_mode<synchronous>, transform_indices = @transform_9, window_bounds = array<i64: 128, 128>}, {pipeline_mode = #tpu.pipeline_mode<synchronous>, transform_indices = @transform_10, window_bounds = array<i64: 1, 128>}, {pipeline_mode = #tpu.pipeline_mode<synchronous>, transform_indices = @transform_11, window_bounds = array<i64: 128, 128>}, {pipeline_mode = #tpu.pipeline_mode<synchronous>, transform_indices = @transform_12, window_bounds = array<i64: 1, 128>}, {pipeline_mode = #tpu.pipeline_mode<synchronous>, transform_indices = @transform_13, window_bounds = array<i64: 1, 128>}]} {
    %c0 = arith.constant 0 : index
    %c0_0 = arith.constant 0 : index
    %0 = vector.load %arg1[%c0, %c0_0] : memref<3x1152xf32, #tpu.memory_space<vmem>>, vector<3x1152xf32>
    %cst = arith.constant 0.000000e+00 : f32
    %1 = vector.broadcast %cst : f32 to vector<6x896xf32>
    %c0_1 = arith.constant 0 : index
    %c0_2 = arith.constant 0 : index
    %c0_3 = arith.constant 0 : index
    %2 = vector.load %arg2[%c0_1, %c0_2, %c0_3] : memref<25x6x3xf32, #tpu.memory_space<vmem>>, vector<1x6x3xf32>
    %3 = vector.shape_cast %2 : vector<1x6x3xf32> to vector<6x3xf32>
    %4 = vector.extract_strided_slice %0 {offsets = [0, 0], sizes = [3, 896], strides = [1, 1]} : vector<3x1152xf32> to vector<3x896xf32>
    %cst_4 = arith.constant dense<0.000000e+00> : vector<6x896xf32>
    %5 = tpu.matmul %3, %4, %cst_4 {dimension_numbers = #tpu.dot_dimension_numbers<[1], [0], [0], [1], [0, 0, 1, 1], [], []>} : vector<6x3xf32>, vector<3x896xf32>, vector<6x896xf32> -> vector<6x896xf32>
    %6 = arith.addf %1, %5 : vector<6x896xf32>
    %c1 = arith.constant 1 : index
    %c0_5 = arith.constant 0 : index
    %c0_6 = arith.constant 0 : index
    %7 = vector.load %arg2[%c1, %c0_5, %c0_6] : memref<25x6x3xf32, #tpu.memory_space<vmem>>, vector<1x6x3xf32>
    %8 = vector.shape_cast %7 : vector<1x6x3xf32> to vector<6x3xf32>
    %9 = vector.extract_strided_slice %0 {offsets = [0, 1], sizes = [3, 896], strides = [1, 1]} : vector<3x1152xf32> to vector<3x896xf32>
    %cst_7 = arith.constant dense<0.000000e+00> : vector<6x896xf32>
    %10 = tpu.matmul %8, %9, %cst_7 {dimension_numbers = #tpu.dot_dimension_numbers<[1], [0], [0], [1], [0, 0, 1, 1], [], []>} : vector<6x3xf32>, vector<3x896xf32>, vector<6x896xf32> -> vector<6x896xf32>
    %11 = arith.addf %6, %10 : vector<6x896xf32>
    %c2 = arith.constant 2 : index
    %c0_8 = arith.constant 0 : index
    %c0_9 = arith.constant 0 : index
    %12 = vector.load %arg2[%c2, %c0_8, %c0_9] : memref<25x6x3xf32, #tpu.memory_space<vmem>>, vector<1x6x3xf32>
    %13 = vector.shape_cast %12 : vector<1x6x3xf32> to vector<6x3xf32>
    %14 = vector.extract_strided_slice %0 {offsets = [0, 2], sizes = [3, 896], strides = [1, 1]} : vector<3x1152xf32> to vector<3x896xf32>
    %cst_10 = arith.constant dense<0.000000e+00> : vector<6x896xf32>
    %15 = tpu.matmul %13, %14, %cst_10 {dimension_numbers = #tpu.dot_dimension_numbers<[1], [0], [0], [1], [0, 0, 1, 1], [], []>} : vector<6x3xf32>, vector<3x896xf32>, vector<6x896xf32> -> vector<6x896xf32>
    %16 = arith.addf %11, %15 : vector<6x896xf32>
    %c3 = arith.constant 3 : index
    %c0_11 = arith.constant 0 : index
    %c0_12 = arith.constant 0 : index
    %17 = vector.load %arg2[%c3, %c0_11, %c0_12] : memref<25x6x3xf32, #tpu.memory_space<vmem>>, vector<1x6x3xf32>
    %18 = vector.shape_cast %17 : vector<1x6x3xf32> to vector<6x3xf32>
    %19 = vector.extract_strided_slice %0 {offsets = [0, 3], sizes = [3, 896], strides = [1, 1]} : vector<3x1152xf32> to vector<3x896xf32>
    %cst_13 = arith.constant dense<0.000000e+00> : vector<6x896xf32>
    %20 = tpu.matmul %18, %19, %cst_13 {dimension_numbers = #tpu.dot_dimension_numbers<[1], [0], [0], [1], [0, 0, 1, 1], [], []>} : vector<6x3xf32>, vector<3x896xf32>, vector<6x896xf32> -> vector<6x896xf32>
    %21 = arith.addf %16, %20 : vector<6x896xf32>
    %c4 = arith.constant 4 : index
    %c0_14 = arith.constant 0 : index
    %c0_15 = arith.constant 0 : index
    %22 = vector.load %arg2[%c4, %c0_14, %c0_15] : memref<25x6x3xf32, #tpu.memory_space<vmem>>, vector<1x6x3xf32>
    %23 = vector.shape_cast %22 : vector<1x6x3xf32> to vector<6x3xf32>
    %24 = vector.extract_strided_slice %0 {offsets = [0, 4], sizes = [3, 896], strides = [1, 1]} : vector<3x1152xf32> to vector<3x896xf32>
    %cst_16 = arith.constant dense<0.000000e+00> : vector<6x896xf32>
    %25 = tpu.matmul %23, %24, %cst_16 {dimension_numbers = #tpu.dot_dimension_numbers<[1], [0], [0], [1], [0, 0, 1, 1], [], []>} : vector<6x3xf32>, vector<3x896xf32>, vector<6x896xf32> -> vector<6x896xf32>
    %26 = arith.addf %21, %25 : vector<6x896xf32>
    %c5 = arith.constant 5 : index
    %c0_17 = arith.constant 0 : index
    %c0_18 = arith.constant 0 : index
    %27 = vector.load %arg2[%c5, %c0_17, %c0_18] : memref<25x6x3xf32, #tpu.memory_space<vmem>>, vector<1x6x3xf32>
    %28 = vector.shape_cast %27 : vector<1x6x3xf32> to vector<6x3xf32>
    %29 = vector.extract_strided_slice %0 {offsets = [0, 32], sizes = [3, 896], strides = [1, 1]} : vector<3x1152xf32> to vector<3x896xf32>
    %cst_19 = arith.constant dense<0.000000e+00> : vector<6x896xf32>
    %30 = tpu.matmul %28, %29, %cst_19 {dimension_numbers = #tpu.dot_dimension_numbers<[1], [0], [0], [1], [0, 0, 1, 1], [], []>} : vector<6x3xf32>, vector<3x896xf32>, vector<6x896xf32> -> vector<6x896xf32>
    %31 = arith.addf %26, %30 : vector<6x896xf32>
    %c6 = arith.constant 6 : index
    %c0_20 = arith.constant 0 : index
    %c0_21 = arith.constant 0 : index
    %32 = vector.load %arg2[%c6, %c0_20, %c0_21] : memref<25x6x3xf32, #tpu.memory_space<vmem>>, vector<1x6x3xf32>
    %33 = vector.shape_cast %32 : vector<1x6x3xf32> to vector<6x3xf32>
    %34 = vector.extract_strided_slice %0 {offsets = [0, 33], sizes = [3, 896], strides = [1, 1]} : vector<3x1152xf32> to vector<3x896xf32>
    %cst_22 = arith.constant dense<0.000000e+00> : vector<6x896xf32>
    %35 = tpu.matmul %33, %34, %cst_22 {dimension_numbers = #tpu.dot_dimension_numbers<[1], [0], [0], [1], [0, 0, 1, 1], [], []>} : vector<6x3xf32>, vector<3x896xf32>, vector<6x896xf32> -> vector<6x896xf32>
    %36 = arith.addf %31, %35 : vector<6x896xf32>
    %c7 = arith.constant 7 : index
    %c0_23 = arith.constant 0 : index
    %c0_24 = arith.constant 0 : index
    %37 = vector.load %arg2[%c7, %c0_23, %c0_24] : memref<25x6x3xf32, #tpu.memory_space<vmem>>, vector<1x6x3xf32>
    %38 = vector.shape_cast %37 : vector<1x6x3xf32> to vector<6x3xf32>
    %39 = vector.extract_strided_slice %0 {offsets = [0, 34], sizes = [3, 896], strides = [1, 1]} : vector<3x1152xf32> to vector<3x896xf32>
    %cst_25 = arith.constant dense<0.000000e+00> : vector<6x896xf32>
    %40 = tpu.matmul %38, %39, %cst_25 {dimension_numbers = #tpu.dot_dimension_numbers<[1], [0], [0], [1], [0, 0, 1, 1], [], []>} : vector<6x3xf32>, vector<3x896xf32>, vector<6x896xf32> -> vector<6x896xf32>
    %41 = arith.addf %36, %40 : vector<6x896xf32>
    %c8 = arith.constant 8 : index
    %c0_26 = arith.constant 0 : index
    %c0_27 = arith.constant 0 : index
    %42 = vector.load %arg2[%c8, %c0_26, %c0_27] : memref<25x6x3xf32, #tpu.memory_space<vmem>>, vector<1x6x3xf32>
    %43 = vector.shape_cast %42 : vector<1x6x3xf32> to vector<6x3xf32>
    %44 = vector.extract_strided_slice %0 {offsets = [0, 35], sizes = [3, 896], strides = [1, 1]} : vector<3x1152xf32> to vector<3x896xf32>
    %cst_28 = arith.constant dense<0.000000e+00> : vector<6x896xf32>
    %45 = tpu.matmul %43, %44, %cst_28 {dimension_numbers = #tpu.dot_dimension_numbers<[1], [0], [0], [1], [0, 0, 1, 1], [], []>} : vector<6x3xf32>, vector<3x896xf32>, vector<6x896xf32> -> vector<6x896xf32>
    %46 = arith.addf %41, %45 : vector<6x896xf32>
    %c9 = arith.constant 9 : index
    %c0_29 = arith.constant 0 : index
    %c0_30 = arith.constant 0 : index
    %47 = vector.load %arg2[%c9, %c0_29, %c0_30] : memref<25x6x3xf32, #tpu.memory_space<vmem>>, vector<1x6x3xf32>
    %48 = vector.shape_cast %47 : vector<1x6x3xf32> to vector<6x3xf32>
    %49 = vector.extract_strided_slice %0 {offsets = [0, 36], sizes = [3, 896], strides = [1, 1]} : vector<3x1152xf32> to vector<3x896xf32>
    %cst_31 = arith.constant dense<0.000000e+00> : vector<6x896xf32>
    %50 = tpu.matmul %48, %49, %cst_31 {dimension_numbers = #tpu.dot_dimension_numbers<[1], [0], [0], [1], [0, 0, 1, 1], [], []>} : vector<6x3xf32>, vector<3x896xf32>, vector<6x896xf32> -> vector<6x896xf32>
    %51 = arith.addf %46, %50 : vector<6x896xf32>
    %c10 = arith.constant 10 : index
    %c0_32 = arith.constant 0 : index
    %c0_33 = arith.constant 0 : index
    %52 = vector.load %arg2[%c10, %c0_32, %c0_33] : memref<25x6x3xf32, #tpu.memory_space<vmem>>, vector<1x6x3xf32>
    %53 = vector.shape_cast %52 : vector<1x6x3xf32> to vector<6x3xf32>
    %54 = vector.extract_strided_slice %0 {offsets = [0, 64], sizes = [3, 896], strides = [1, 1]} : vector<3x1152xf32> to vector<3x896xf32>
    %cst_34 = arith.constant dense<0.000000e+00> : vector<6x896xf32>
    %55 = tpu.matmul %53, %54, %cst_34 {dimension_numbers = #tpu.dot_dimension_numbers<[1], [0], [0], [1], [0, 0, 1, 1], [], []>} : vector<6x3xf32>, vector<3x896xf32>, vector<6x896xf32> -> vector<6x896xf32>
    %56 = arith.addf %51, %55 : vector<6x896xf32>
    %c11 = arith.constant 11 : index
    %c0_35 = arith.constant 0 : index
    %c0_36 = arith.constant 0 : index
    %57 = vector.load %arg2[%c11, %c0_35, %c0_36] : memref<25x6x3xf32, #tpu.memory_space<vmem>>, vector<1x6x3xf32>
    %58 = vector.shape_cast %57 : vector<1x6x3xf32> to vector<6x3xf32>
    %59 = vector.extract_strided_slice %0 {offsets = [0, 65], sizes = [3, 896], strides = [1, 1]} : vector<3x1152xf32> to vector<3x896xf32>
    %cst_37 = arith.constant dense<0.000000e+00> : vector<6x896xf32>
    %60 = tpu.matmul %58, %59, %cst_37 {dimension_numbers = #tpu.dot_dimension_numbers<[1], [0], [0], [1], [0, 0, 1, 1], [], []>} : vector<6x3xf32>, vector<3x896xf32>, vector<6x896xf32> -> vector<6x896xf32>
    %61 = arith.addf %56, %60 : vector<6x896xf32>
    %c12 = arith.constant 12 : index
    %c0_38 = arith.constant 0 : index
    %c0_39 = arith.constant 0 : index
    %62 = vector.load %arg2[%c12, %c0_38, %c0_39] : memref<25x6x3xf32, #tpu.memory_space<vmem>>, vector<1x6x3xf32>
    %63 = vector.shape_cast %62 : vector<1x6x3xf32> to vector<6x3xf32>
    %64 = vector.extract_strided_slice %0 {offsets = [0, 66], sizes = [3, 896], strides = [1, 1]} : vector<3x1152xf32> to vector<3x896xf32>
    %cst_40 = arith.constant dense<0.000000e+00> : vector<6x896xf32>
    %65 = tpu.matmul %63, %64, %cst_40 {dimension_numbers = #tpu.dot_dimension_numbers<[1], [0], [0], [1], [0, 0, 1, 1], [], []>} : vector<6x3xf32>, vector<3x896xf32>, vector<6x896xf32> -> vector<6x896xf32>
    %66 = arith.addf %61, %65 : vector<6x896xf32>
    %c13 = arith.constant 13 : index
    %c0_41 = arith.constant 0 : index
    %c0_42 = arith.constant 0 : index
    %67 = vector.load %arg2[%c13, %c0_41, %c0_42] : memref<25x6x3xf32, #tpu.memory_space<vmem>>, vector<1x6x3xf32>
    %68 = vector.shape_cast %67 : vector<1x6x3xf32> to vector<6x3xf32>
    %69 = vector.extract_strided_slice %0 {offsets = [0, 67], sizes = [3, 896], strides = [1, 1]} : vector<3x1152xf32> to vector<3x896xf32>
    %cst_43 = arith.constant dense<0.000000e+00> : vector<6x896xf32>
    %70 = tpu.matmul %68, %69, %cst_43 {dimension_numbers = #tpu.dot_dimension_numbers<[1], [0], [0], [1], [0, 0, 1, 1], [], []>} : vector<6x3xf32>, vector<3x896xf32>, vector<6x896xf32> -> vector<6x896xf32>
    %71 = arith.addf %66, %70 : vector<6x896xf32>
    %c14 = arith.constant 14 : index
    %c0_44 = arith.constant 0 : index
    %c0_45 = arith.constant 0 : index
    %72 = vector.load %arg2[%c14, %c0_44, %c0_45] : memref<25x6x3xf32, #tpu.memory_space<vmem>>, vector<1x6x3xf32>
    %73 = vector.shape_cast %72 : vector<1x6x3xf32> to vector<6x3xf32>
    %74 = vector.extract_strided_slice %0 {offsets = [0, 68], sizes = [3, 896], strides = [1, 1]} : vector<3x1152xf32> to vector<3x896xf32>
    %cst_46 = arith.constant dense<0.000000e+00> : vector<6x896xf32>
    %75 = tpu.matmul %73, %74, %cst_46 {dimension_numbers = #tpu.dot_dimension_numbers<[1], [0], [0], [1], [0, 0, 1, 1], [], []>} : vector<6x3xf32>, vector<3x896xf32>, vector<6x896xf32> -> vector<6x896xf32>
    %76 = arith.addf %71, %75 : vector<6x896xf32>
    %c15 = arith.constant 15 : index
    %c0_47 = arith.constant 0 : index
    %c0_48 = arith.constant 0 : index
    %77 = vector.load %arg2[%c15, %c0_47, %c0_48] : memref<25x6x3xf32, #tpu.memory_space<vmem>>, vector<1x6x3xf32>
    %78 = vector.shape_cast %77 : vector<1x6x3xf32> to vector<6x3xf32>
    %79 = vector.extract_strided_slice %0 {offsets = [0, 96], sizes = [3, 896], strides = [1, 1]} : vector<3x1152xf32> to vector<3x896xf32>
    %cst_49 = arith.constant dense<0.000000e+00> : vector<6x896xf32>
    %80 = tpu.matmul %78, %79, %cst_49 {dimension_numbers = #tpu.dot_dimension_numbers<[1], [0], [0], [1], [0, 0, 1, 1], [], []>} : vector<6x3xf32>, vector<3x896xf32>, vector<6x896xf32> -> vector<6x896xf32>
    %81 = arith.addf %76, %80 : vector<6x896xf32>
    %c16 = arith.constant 16 : index
    %c0_50 = arith.constant 0 : index
    %c0_51 = arith.constant 0 : index
    %82 = vector.load %arg2[%c16, %c0_50, %c0_51] : memref<25x6x3xf32, #tpu.memory_space<vmem>>, vector<1x6x3xf32>
    %83 = vector.shape_cast %82 : vector<1x6x3xf32> to vector<6x3xf32>
    %84 = vector.extract_strided_slice %0 {offsets = [0, 97], sizes = [3, 896], strides = [1, 1]} : vector<3x1152xf32> to vector<3x896xf32>
    %cst_52 = arith.constant dense<0.000000e+00> : vector<6x896xf32>
    %85 = tpu.matmul %83, %84, %cst_52 {dimension_numbers = #tpu.dot_dimension_numbers<[1], [0], [0], [1], [0, 0, 1, 1], [], []>} : vector<6x3xf32>, vector<3x896xf32>, vector<6x896xf32> -> vector<6x896xf32>
    %86 = arith.addf %81, %85 : vector<6x896xf32>
    %c17 = arith.constant 17 : index
    %c0_53 = arith.constant 0 : index
    %c0_54 = arith.constant 0 : index
    %87 = vector.load %arg2[%c17, %c0_53, %c0_54] : memref<25x6x3xf32, #tpu.memory_space<vmem>>, vector<1x6x3xf32>
    %88 = vector.shape_cast %87 : vector<1x6x3xf32> to vector<6x3xf32>
    %89 = vector.extract_strided_slice %0 {offsets = [0, 98], sizes = [3, 896], strides = [1, 1]} : vector<3x1152xf32> to vector<3x896xf32>
    %cst_55 = arith.constant dense<0.000000e+00> : vector<6x896xf32>
    %90 = tpu.matmul %88, %89, %cst_55 {dimension_numbers = #tpu.dot_dimension_numbers<[1], [0], [0], [1], [0, 0, 1, 1], [], []>} : vector<6x3xf32>, vector<3x896xf32>, vector<6x896xf32> -> vector<6x896xf32>
    %91 = arith.addf %86, %90 : vector<6x896xf32>
    %c18 = arith.constant 18 : index
    %c0_56 = arith.constant 0 : index
    %c0_57 = arith.constant 0 : index
    %92 = vector.load %arg2[%c18, %c0_56, %c0_57] : memref<25x6x3xf32, #tpu.memory_space<vmem>>, vector<1x6x3xf32>
    %93 = vector.shape_cast %92 : vector<1x6x3xf32> to vector<6x3xf32>
    %94 = vector.extract_strided_slice %0 {offsets = [0, 99], sizes = [3, 896], strides = [1, 1]} : vector<3x1152xf32> to vector<3x896xf32>
    %cst_58 = arith.constant dense<0.000000e+00> : vector<6x896xf32>
    %95 = tpu.matmul %93, %94, %cst_58 {dimension_numbers = #tpu.dot_dimension_numbers<[1], [0], [0], [1], [0, 0, 1, 1], [], []>} : vector<6x3xf32>, vector<3x896xf32>, vector<6x896xf32> -> vector<6x896xf32>
    %96 = arith.addf %91, %95 : vector<6x896xf32>
    %c19 = arith.constant 19 : index
    %c0_59 = arith.constant 0 : index
    %c0_60 = arith.constant 0 : index
    %97 = vector.load %arg2[%c19, %c0_59, %c0_60] : memref<25x6x3xf32, #tpu.memory_space<vmem>>, vector<1x6x3xf32>
    %98 = vector.shape_cast %97 : vector<1x6x3xf32> to vector<6x3xf32>
    %99 = vector.extract_strided_slice %0 {offsets = [0, 100], sizes = [3, 896], strides = [1, 1]} : vector<3x1152xf32> to vector<3x896xf32>
    %cst_61 = arith.constant dense<0.000000e+00> : vector<6x896xf32>
    %100 = tpu.matmul %98, %99, %cst_61 {dimension_numbers = #tpu.dot_dimension_numbers<[1], [0], [0], [1], [0, 0, 1, 1], [], []>} : vector<6x3xf32>, vector<3x896xf32>, vector<6x896xf32> -> vector<6x896xf32>
    %101 = arith.addf %96, %100 : vector<6x896xf32>
    %c20 = arith.constant 20 : index
    %c0_62 = arith.constant 0 : index
    %c0_63 = arith.constant 0 : index
    %102 = vector.load %arg2[%c20, %c0_62, %c0_63] : memref<25x6x3xf32, #tpu.memory_space<vmem>>, vector<1x6x3xf32>
    %103 = vector.shape_cast %102 : vector<1x6x3xf32> to vector<6x3xf32>
    %104 = vector.extract_strided_slice %0 {offsets = [0, 128], sizes = [3, 896], strides = [1, 1]} : vector<3x1152xf32> to vector<3x896xf32>
    %cst_64 = arith.constant dense<0.000000e+00> : vector<6x896xf32>
    %105 = tpu.matmul %103, %104, %cst_64 {dimension_numbers = #tpu.dot_dimension_numbers<[1], [0], [0], [1], [0, 0, 1, 1], [], []>} : vector<6x3xf32>, vector<3x896xf32>, vector<6x896xf32> -> vector<6x896xf32>
    %106 = arith.addf %101, %105 : vector<6x896xf32>
    %c21 = arith.constant 21 : index
    %c0_65 = arith.constant 0 : index
    %c0_66 = arith.constant 0 : index
    %107 = vector.load %arg2[%c21, %c0_65, %c0_66] : memref<25x6x3xf32, #tpu.memory_space<vmem>>, vector<1x6x3xf32>
    %108 = vector.shape_cast %107 : vector<1x6x3xf32> to vector<6x3xf32>
    %109 = vector.extract_strided_slice %0 {offsets = [0, 129], sizes = [3, 896], strides = [1, 1]} : vector<3x1152xf32> to vector<3x896xf32>
    %cst_67 = arith.constant dense<0.000000e+00> : vector<6x896xf32>
    %110 = tpu.matmul %108, %109, %cst_67 {dimension_numbers = #tpu.dot_dimension_numbers<[1], [0], [0], [1], [0, 0, 1, 1], [], []>} : vector<6x3xf32>, vector<3x896xf32>, vector<6x896xf32> -> vector<6x896xf32>
    %111 = arith.addf %106, %110 : vector<6x896xf32>
    %c22 = arith.constant 22 : index
    %c0_68 = arith.constant 0 : index
    %c0_69 = arith.constant 0 : index
    %112 = vector.load %arg2[%c22, %c0_68, %c0_69] : memref<25x6x3xf32, #tpu.memory_space<vmem>>, vector<1x6x3xf32>
    %113 = vector.shape_cast %112 : vector<1x6x3xf32> to vector<6x3xf32>
    %114 = vector.extract_strided_slice %0 {offsets = [0, 130], sizes = [3, 896], strides = [1, 1]} : vector<3x1152xf32> to vector<3x896xf32>
    %cst_70 = arith.constant dense<0.000000e+00> : vector<6x896xf32>
    %115 = tpu.matmul %113, %114, %cst_70 {dimension_numbers = #tpu.dot_dimension_numbers<[1], [0], [0], [1], [0, 0, 1, 1], [], []>} : vector<6x3xf32>, vector<3x896xf32>, vector<6x896xf32> -> vector<6x896xf32>
    %116 = arith.addf %111, %115 : vector<6x896xf32>
    %c23 = arith.constant 23 : index
    %c0_71 = arith.constant 0 : index
    %c0_72 = arith.constant 0 : index
    %117 = vector.load %arg2[%c23, %c0_71, %c0_72] : memref<25x6x3xf32, #tpu.memory_space<vmem>>, vector<1x6x3xf32>
    %118 = vector.shape_cast %117 : vector<1x6x3xf32> to vector<6x3xf32>
    %119 = vector.extract_strided_slice %0 {offsets = [0, 131], sizes = [3, 896], strides = [1, 1]} : vector<3x1152xf32> to vector<3x896xf32>
    %cst_73 = arith.constant dense<0.000000e+00> : vector<6x896xf32>
    %120 = tpu.matmul %118, %119, %cst_73 {dimension_numbers = #tpu.dot_dimension_numbers<[1], [0], [0], [1], [0, 0, 1, 1], [], []>} : vector<6x3xf32>, vector<3x896xf32>, vector<6x896xf32> -> vector<6x896xf32>
    %121 = arith.addf %116, %120 : vector<6x896xf32>
    %c24 = arith.constant 24 : index
    %c0_74 = arith.constant 0 : index
    %c0_75 = arith.constant 0 : index
    %122 = vector.load %arg2[%c24, %c0_74, %c0_75] : memref<25x6x3xf32, #tpu.memory_space<vmem>>, vector<1x6x3xf32>
    %123 = vector.shape_cast %122 : vector<1x6x3xf32> to vector<6x3xf32>
    %124 = vector.extract_strided_slice %0 {offsets = [0, 132], sizes = [3, 896], strides = [1, 1]} : vector<3x1152xf32> to vector<3x896xf32>
    %cst_76 = arith.constant dense<0.000000e+00> : vector<6x896xf32>
    %125 = tpu.matmul %123, %124, %cst_76 {dimension_numbers = #tpu.dot_dimension_numbers<[1], [0], [0], [1], [0, 0, 1, 1], [], []>} : vector<6x3xf32>, vector<3x896xf32>, vector<6x896xf32> -> vector<6x896xf32>
    %126 = arith.addf %121, %125 : vector<6x896xf32>
    %c0_77 = arith.constant 0 : index
    %c0_78 = arith.constant 0 : index
    %127 = vector.load %arg3[%c0_77, %c0_78] : memref<6x1xf32, #tpu.memory_space<vmem>>, vector<6x1xf32>
    %128 = vector.broadcast %127 : vector<6x1xf32> to vector<6x896xf32>
    %129 = arith.addf %126, %128 : vector<6x896xf32>
    %cst_79 = arith.constant 0.000000e+00 : f32
    %130 = vector.broadcast %cst_79 : f32 to vector<6x896xf32>
    %131 = arith.maximumf %129, %130 : vector<6x896xf32>
    %132 = vector.extract_strided_slice %131 {offsets = [0, 0], sizes = [6, 859], strides = [1, 1]} : vector<6x896xf32> to vector<6x859xf32>
    %133 = vector.extract_strided_slice %131 {offsets = [0, 1], sizes = [6, 859], strides = [1, 1]} : vector<6x896xf32> to vector<6x859xf32>
    %134 = arith.maximumf %132, %133 : vector<6x859xf32>
    %135 = vector.extract_strided_slice %131 {offsets = [0, 32], sizes = [6, 859], strides = [1, 1]} : vector<6x896xf32> to vector<6x859xf32>
    %136 = vector.extract_strided_slice %131 {offsets = [0, 33], sizes = [6, 859], strides = [1, 1]} : vector<6x896xf32> to vector<6x859xf32>
    %137 = arith.maximumf %135, %136 : vector<6x859xf32>
    %138 = arith.maximumf %134, %137 : vector<6x859xf32>
    %c0_80 = arith.constant 0 : index
    %c0_81 = arith.constant 0 : index
    %139 = vector.load %arg4[%c0_80, %c0_81] : memref<859x256xf32, #tpu.memory_space<vmem>>, vector<859x256xf32>
    %cst_82 = arith.constant dense<0.000000e+00> : vector<6x256xf32>
    %140 = tpu.matmul %138, %139, %cst_82 {dimension_numbers = #tpu.dot_dimension_numbers<[1], [0], [0], [1], [0, 0, 1, 1], [], []>} : vector<6x859xf32>, vector<859x256xf32>, vector<6x256xf32> -> vector<6x256xf32>
    %cst_83 = arith.constant 0.000000e+00 : f32
    %141 = vector.broadcast %cst_83 : f32 to vector<16x160xf32>
    %c0_84 = arith.constant 0 : index
    %c0_85 = arith.constant 0 : index
    %c0_86 = arith.constant 0 : index
    %142 = vector.load %arg5[%c0_84, %c0_85, %c0_86] : memref<25x16x6xf32, #tpu.memory_space<vmem>>, vector<1x16x6xf32>
    %143 = vector.shape_cast %142 : vector<1x16x6xf32> to vector<16x6xf32>
    %144 = vector.extract_strided_slice %140 {offsets = [0, 0], sizes = [6, 160], strides = [1, 1]} : vector<6x256xf32> to vector<6x160xf32>
    %cst_87 = arith.constant dense<0.000000e+00> : vector<16x160xf32>
    %145 = tpu.matmul %143, %144, %cst_87 {dimension_numbers = #tpu.dot_dimension_numbers<[1], [0], [0], [1], [0, 0, 1, 1], [], []>} : vector<16x6xf32>, vector<6x160xf32>, vector<16x160xf32> -> vector<16x160xf32>
    %146 = arith.addf %141, %145 : vector<16x160xf32>
    %c1_88 = arith.constant 1 : index
    %c0_89 = arith.constant 0 : index
    %c0_90 = arith.constant 0 : index
    %147 = vector.load %arg5[%c1_88, %c0_89, %c0_90] : memref<25x16x6xf32, #tpu.memory_space<vmem>>, vector<1x16x6xf32>
    %148 = vector.shape_cast %147 : vector<1x16x6xf32> to vector<16x6xf32>
    %149 = vector.extract_strided_slice %140 {offsets = [0, 1], sizes = [6, 160], strides = [1, 1]} : vector<6x256xf32> to vector<6x160xf32>
    %cst_91 = arith.constant dense<0.000000e+00> : vector<16x160xf32>
    %150 = tpu.matmul %148, %149, %cst_91 {dimension_numbers = #tpu.dot_dimension_numbers<[1], [0], [0], [1], [0, 0, 1, 1], [], []>} : vector<16x6xf32>, vector<6x160xf32>, vector<16x160xf32> -> vector<16x160xf32>
    %151 = arith.addf %146, %150 : vector<16x160xf32>
    %c2_92 = arith.constant 2 : index
    %c0_93 = arith.constant 0 : index
    %c0_94 = arith.constant 0 : index
    %152 = vector.load %arg5[%c2_92, %c0_93, %c0_94] : memref<25x16x6xf32, #tpu.memory_space<vmem>>, vector<1x16x6xf32>
    %153 = vector.shape_cast %152 : vector<1x16x6xf32> to vector<16x6xf32>
    %154 = vector.extract_strided_slice %140 {offsets = [0, 2], sizes = [6, 160], strides = [1, 1]} : vector<6x256xf32> to vector<6x160xf32>
    %cst_95 = arith.constant dense<0.000000e+00> : vector<16x160xf32>
    %155 = tpu.matmul %153, %154, %cst_95 {dimension_numbers = #tpu.dot_dimension_numbers<[1], [0], [0], [1], [0, 0, 1, 1], [], []>} : vector<16x6xf32>, vector<6x160xf32>, vector<16x160xf32> -> vector<16x160xf32>
    %156 = arith.addf %151, %155 : vector<16x160xf32>
    %c3_96 = arith.constant 3 : index
    %c0_97 = arith.constant 0 : index
    %c0_98 = arith.constant 0 : index
    %157 = vector.load %arg5[%c3_96, %c0_97, %c0_98] : memref<25x16x6xf32, #tpu.memory_space<vmem>>, vector<1x16x6xf32>
    %158 = vector.shape_cast %157 : vector<1x16x6xf32> to vector<16x6xf32>
    %159 = vector.extract_strided_slice %140 {offsets = [0, 3], sizes = [6, 160], strides = [1, 1]} : vector<6x256xf32> to vector<6x160xf32>
    %cst_99 = arith.constant dense<0.000000e+00> : vector<16x160xf32>
    %160 = tpu.matmul %158, %159, %cst_99 {dimension_numbers = #tpu.dot_dimension_numbers<[1], [0], [0], [1], [0, 0, 1, 1], [], []>} : vector<16x6xf32>, vector<6x160xf32>, vector<16x160xf32> -> vector<16x160xf32>
    %161 = arith.addf %156, %160 : vector<16x160xf32>
    %c4_100 = arith.constant 4 : index
    %c0_101 = arith.constant 0 : index
    %c0_102 = arith.constant 0 : index
    %162 = vector.load %arg5[%c4_100, %c0_101, %c0_102] : memref<25x16x6xf32, #tpu.memory_space<vmem>>, vector<1x16x6xf32>
    %163 = vector.shape_cast %162 : vector<1x16x6xf32> to vector<16x6xf32>
    %164 = vector.extract_strided_slice %140 {offsets = [0, 4], sizes = [6, 160], strides = [1, 1]} : vector<6x256xf32> to vector<6x160xf32>
    %cst_103 = arith.constant dense<0.000000e+00> : vector<16x160xf32>
    %165 = tpu.matmul %163, %164, %cst_103 {dimension_numbers = #tpu.dot_dimension_numbers<[1], [0], [0], [1], [0, 0, 1, 1], [], []>} : vector<16x6xf32>, vector<6x160xf32>, vector<16x160xf32> -> vector<16x160xf32>
    %166 = arith.addf %161, %165 : vector<16x160xf32>
    %c5_104 = arith.constant 5 : index
    %c0_105 = arith.constant 0 : index
    %c0_106 = arith.constant 0 : index
    %167 = vector.load %arg5[%c5_104, %c0_105, %c0_106] : memref<25x16x6xf32, #tpu.memory_space<vmem>>, vector<1x16x6xf32>
    %168 = vector.shape_cast %167 : vector<1x16x6xf32> to vector<16x6xf32>
    %169 = vector.extract_strided_slice %140 {offsets = [0, 16], sizes = [6, 160], strides = [1, 1]} : vector<6x256xf32> to vector<6x160xf32>
    %cst_107 = arith.constant dense<0.000000e+00> : vector<16x160xf32>
    %170 = tpu.matmul %168, %169, %cst_107 {dimension_numbers = #tpu.dot_dimension_numbers<[1], [0], [0], [1], [0, 0, 1, 1], [], []>} : vector<16x6xf32>, vector<6x160xf32>, vector<16x160xf32> -> vector<16x160xf32>
    %171 = arith.addf %166, %170 : vector<16x160xf32>
    %c6_108 = arith.constant 6 : index
    %c0_109 = arith.constant 0 : index
    %c0_110 = arith.constant 0 : index
    %172 = vector.load %arg5[%c6_108, %c0_109, %c0_110] : memref<25x16x6xf32, #tpu.memory_space<vmem>>, vector<1x16x6xf32>
    %173 = vector.shape_cast %172 : vector<1x16x6xf32> to vector<16x6xf32>
    %174 = vector.extract_strided_slice %140 {offsets = [0, 17], sizes = [6, 160], strides = [1, 1]} : vector<6x256xf32> to vector<6x160xf32>
    %cst_111 = arith.constant dense<0.000000e+00> : vector<16x160xf32>
    %175 = tpu.matmul %173, %174, %cst_111 {dimension_numbers = #tpu.dot_dimension_numbers<[1], [0], [0], [1], [0, 0, 1, 1], [], []>} : vector<16x6xf32>, vector<6x160xf32>, vector<16x160xf32> -> vector<16x160xf32>
    %176 = arith.addf %171, %175 : vector<16x160xf32>
    %c7_112 = arith.constant 7 : index
    %c0_113 = arith.constant 0 : index
    %c0_114 = arith.constant 0 : index
    %177 = vector.load %arg5[%c7_112, %c0_113, %c0_114] : memref<25x16x6xf32, #tpu.memory_space<vmem>>, vector<1x16x6xf32>
    %178 = vector.shape_cast %177 : vector<1x16x6xf32> to vector<16x6xf32>
    %179 = vector.extract_strided_slice %140 {offsets = [0, 18], sizes = [6, 160], strides = [1, 1]} : vector<6x256xf32> to vector<6x160xf32>
    %cst_115 = arith.constant dense<0.000000e+00> : vector<16x160xf32>
    %180 = tpu.matmul %178, %179, %cst_115 {dimension_numbers = #tpu.dot_dimension_numbers<[1], [0], [0], [1], [0, 0, 1, 1], [], []>} : vector<16x6xf32>, vector<6x160xf32>, vector<16x160xf32> -> vector<16x160xf32>
    %181 = arith.addf %176, %180 : vector<16x160xf32>
    %c8_116 = arith.constant 8 : index
    %c0_117 = arith.constant 0 : index
    %c0_118 = arith.constant 0 : index
    %182 = vector.load %arg5[%c8_116, %c0_117, %c0_118] : memref<25x16x6xf32, #tpu.memory_space<vmem>>, vector<1x16x6xf32>
    %183 = vector.shape_cast %182 : vector<1x16x6xf32> to vector<16x6xf32>
    %184 = vector.extract_strided_slice %140 {offsets = [0, 19], sizes = [6, 160], strides = [1, 1]} : vector<6x256xf32> to vector<6x160xf32>
    %cst_119 = arith.constant dense<0.000000e+00> : vector<16x160xf32>
    %185 = tpu.matmul %183, %184, %cst_119 {dimension_numbers = #tpu.dot_dimension_numbers<[1], [0], [0], [1], [0, 0, 1, 1], [], []>} : vector<16x6xf32>, vector<6x160xf32>, vector<16x160xf32> -> vector<16x160xf32>
    %186 = arith.addf %181, %185 : vector<16x160xf32>
    %c9_120 = arith.constant 9 : index
    %c0_121 = arith.constant 0 : index
    %c0_122 = arith.constant 0 : index
    %187 = vector.load %arg5[%c9_120, %c0_121, %c0_122] : memref<25x16x6xf32, #tpu.memory_space<vmem>>, vector<1x16x6xf32>
    %188 = vector.shape_cast %187 : vector<1x16x6xf32> to vector<16x6xf32>
    %189 = vector.extract_strided_slice %140 {offsets = [0, 20], sizes = [6, 160], strides = [1, 1]} : vector<6x256xf32> to vector<6x160xf32>
    %cst_123 = arith.constant dense<0.000000e+00> : vector<16x160xf32>
    %190 = tpu.matmul %188, %189, %cst_123 {dimension_numbers = #tpu.dot_dimension_numbers<[1], [0], [0], [1], [0, 0, 1, 1], [], []>} : vector<16x6xf32>, vector<6x160xf32>, vector<16x160xf32> -> vector<16x160xf32>
    %191 = arith.addf %186, %190 : vector<16x160xf32>
    %c10_124 = arith.constant 10 : index
    %c0_125 = arith.constant 0 : index
    %c0_126 = arith.constant 0 : index
    %192 = vector.load %arg5[%c10_124, %c0_125, %c0_126] : memref<25x16x6xf32, #tpu.memory_space<vmem>>, vector<1x16x6xf32>
    %193 = vector.shape_cast %192 : vector<1x16x6xf32> to vector<16x6xf32>
    %194 = vector.extract_strided_slice %140 {offsets = [0, 32], sizes = [6, 160], strides = [1, 1]} : vector<6x256xf32> to vector<6x160xf32>
    %cst_127 = arith.constant dense<0.000000e+00> : vector<16x160xf32>
    %195 = tpu.matmul %193, %194, %cst_127 {dimension_numbers = #tpu.dot_dimension_numbers<[1], [0], [0], [1], [0, 0, 1, 1], [], []>} : vector<16x6xf32>, vector<6x160xf32>, vector<16x160xf32> -> vector<16x160xf32>
    %196 = arith.addf %191, %195 : vector<16x160xf32>
    %c11_128 = arith.constant 11 : index
    %c0_129 = arith.constant 0 : index
    %c0_130 = arith.constant 0 : index
    %197 = vector.load %arg5[%c11_128, %c0_129, %c0_130] : memref<25x16x6xf32, #tpu.memory_space<vmem>>, vector<1x16x6xf32>
    %198 = vector.shape_cast %197 : vector<1x16x6xf32> to vector<16x6xf32>
    %199 = vector.extract_strided_slice %140 {offsets = [0, 33], sizes = [6, 160], strides = [1, 1]} : vector<6x256xf32> to vector<6x160xf32>
    %cst_131 = arith.constant dense<0.000000e+00> : vector<16x160xf32>
    %200 = tpu.matmul %198, %199, %cst_131 {dimension_numbers = #tpu.dot_dimension_numbers<[1], [0], [0], [1], [0, 0, 1, 1], [], []>} : vector<16x6xf32>, vector<6x160xf32>, vector<16x160xf32> -> vector<16x160xf32>
    %201 = arith.addf %196, %200 : vector<16x160xf32>
    %c12_132 = arith.constant 12 : index
    %c0_133 = arith.constant 0 : index
    %c0_134 = arith.constant 0 : index
    %202 = vector.load %arg5[%c12_132, %c0_133, %c0_134] : memref<25x16x6xf32, #tpu.memory_space<vmem>>, vector<1x16x6xf32>
    %203 = vector.shape_cast %202 : vector<1x16x6xf32> to vector<16x6xf32>
    %204 = vector.extract_strided_slice %140 {offsets = [0, 34], sizes = [6, 160], strides = [1, 1]} : vector<6x256xf32> to vector<6x160xf32>
    %cst_135 = arith.constant dense<0.000000e+00> : vector<16x160xf32>
    %205 = tpu.matmul %203, %204, %cst_135 {dimension_numbers = #tpu.dot_dimension_numbers<[1], [0], [0], [1], [0, 0, 1, 1], [], []>} : vector<16x6xf32>, vector<6x160xf32>, vector<16x160xf32> -> vector<16x160xf32>
    %206 = arith.addf %201, %205 : vector<16x160xf32>
    %c13_136 = arith.constant 13 : index
    %c0_137 = arith.constant 0 : index
    %c0_138 = arith.constant 0 : index
    %207 = vector.load %arg5[%c13_136, %c0_137, %c0_138] : memref<25x16x6xf32, #tpu.memory_space<vmem>>, vector<1x16x6xf32>
    %208 = vector.shape_cast %207 : vector<1x16x6xf32> to vector<16x6xf32>
    %209 = vector.extract_strided_slice %140 {offsets = [0, 35], sizes = [6, 160], strides = [1, 1]} : vector<6x256xf32> to vector<6x160xf32>
    %cst_139 = arith.constant dense<0.000000e+00> : vector<16x160xf32>
    %210 = tpu.matmul %208, %209, %cst_139 {dimension_numbers = #tpu.dot_dimension_numbers<[1], [0], [0], [1], [0, 0, 1, 1], [], []>} : vector<16x6xf32>, vector<6x160xf32>, vector<16x160xf32> -> vector<16x160xf32>
    %211 = arith.addf %206, %210 : vector<16x160xf32>
    %c14_140 = arith.constant 14 : index
    %c0_141 = arith.constant 0 : index
    %c0_142 = arith.constant 0 : index
    %212 = vector.load %arg5[%c14_140, %c0_141, %c0_142] : memref<25x16x6xf32, #tpu.memory_space<vmem>>, vector<1x16x6xf32>
    %213 = vector.shape_cast %212 : vector<1x16x6xf32> to vector<16x6xf32>
    %214 = vector.extract_strided_slice %140 {offsets = [0, 36], sizes = [6, 160], strides = [1, 1]} : vector<6x256xf32> to vector<6x160xf32>
    %cst_143 = arith.constant dense<0.000000e+00> : vector<16x160xf32>
    %215 = tpu.matmul %213, %214, %cst_143 {dimension_numbers = #tpu.dot_dimension_numbers<[1], [0], [0], [1], [0, 0, 1, 1], [], []>} : vector<16x6xf32>, vector<6x160xf32>, vector<16x160xf32> -> vector<16x160xf32>
    %216 = arith.addf %211, %215 : vector<16x160xf32>
    %c15_144 = arith.constant 15 : index
    %c0_145 = arith.constant 0 : index
    %c0_146 = arith.constant 0 : index
    %217 = vector.load %arg5[%c15_144, %c0_145, %c0_146] : memref<25x16x6xf32, #tpu.memory_space<vmem>>, vector<1x16x6xf32>
    %218 = vector.shape_cast %217 : vector<1x16x6xf32> to vector<16x6xf32>
    %219 = vector.extract_strided_slice %140 {offsets = [0, 48], sizes = [6, 160], strides = [1, 1]} : vector<6x256xf32> to vector<6x160xf32>
    %cst_147 = arith.constant dense<0.000000e+00> : vector<16x160xf32>
    %220 = tpu.matmul %218, %219, %cst_147 {dimension_numbers = #tpu.dot_dimension_numbers<[1], [0], [0], [1], [0, 0, 1, 1], [], []>} : vector<16x6xf32>, vector<6x160xf32>, vector<16x160xf32> -> vector<16x160xf32>
    %221 = arith.addf %216, %220 : vector<16x160xf32>
    %c16_148 = arith.constant 16 : index
    %c0_149 = arith.constant 0 : index
    %c0_150 = arith.constant 0 : index
    %222 = vector.load %arg5[%c16_148, %c0_149, %c0_150] : memref<25x16x6xf32, #tpu.memory_space<vmem>>, vector<1x16x6xf32>
    %223 = vector.shape_cast %222 : vector<1x16x6xf32> to vector<16x6xf32>
    %224 = vector.extract_strided_slice %140 {offsets = [0, 49], sizes = [6, 160], strides = [1, 1]} : vector<6x256xf32> to vector<6x160xf32>
    %cst_151 = arith.constant dense<0.000000e+00> : vector<16x160xf32>
    %225 = tpu.matmul %223, %224, %cst_151 {dimension_numbers = #tpu.dot_dimension_numbers<[1], [0], [0], [1], [0, 0, 1, 1], [], []>} : vector<16x6xf32>, vector<6x160xf32>, vector<16x160xf32> -> vector<16x160xf32>
    %226 = arith.addf %221, %225 : vector<16x160xf32>
    %c17_152 = arith.constant 17 : index
    %c0_153 = arith.constant 0 : index
    %c0_154 = arith.constant 0 : index
    %227 = vector.load %arg5[%c17_152, %c0_153, %c0_154] : memref<25x16x6xf32, #tpu.memory_space<vmem>>, vector<1x16x6xf32>
    %228 = vector.shape_cast %227 : vector<1x16x6xf32> to vector<16x6xf32>
    %229 = vector.extract_strided_slice %140 {offsets = [0, 50], sizes = [6, 160], strides = [1, 1]} : vector<6x256xf32> to vector<6x160xf32>
    %cst_155 = arith.constant dense<0.000000e+00> : vector<16x160xf32>
    %230 = tpu.matmul %228, %229, %cst_155 {dimension_numbers = #tpu.dot_dimension_numbers<[1], [0], [0], [1], [0, 0, 1, 1], [], []>} : vector<16x6xf32>, vector<6x160xf32>, vector<16x160xf32> -> vector<16x160xf32>
    %231 = arith.addf %226, %230 : vector<16x160xf32>
    %c18_156 = arith.constant 18 : index
    %c0_157 = arith.constant 0 : index
    %c0_158 = arith.constant 0 : index
    %232 = vector.load %arg5[%c18_156, %c0_157, %c0_158] : memref<25x16x6xf32, #tpu.memory_space<vmem>>, vector<1x16x6xf32>
    %233 = vector.shape_cast %232 : vector<1x16x6xf32> to vector<16x6xf32>
    %234 = vector.extract_strided_slice %140 {offsets = [0, 51], sizes = [6, 160], strides = [1, 1]} : vector<6x256xf32> to vector<6x160xf32>
    %cst_159 = arith.constant dense<0.000000e+00> : vector<16x160xf32>
    %235 = tpu.matmul %233, %234, %cst_159 {dimension_numbers = #tpu.dot_dimension_numbers<[1], [0], [0], [1], [0, 0, 1, 1], [], []>} : vector<16x6xf32>, vector<6x160xf32>, vector<16x160xf32> -> vector<16x160xf32>
    %236 = arith.addf %231, %235 : vector<16x160xf32>
    %c19_160 = arith.constant 19 : index
    %c0_161 = arith.constant 0 : index
    %c0_162 = arith.constant 0 : index
    %237 = vector.load %arg5[%c19_160, %c0_161, %c0_162] : memref<25x16x6xf32, #tpu.memory_space<vmem>>, vector<1x16x6xf32>
    %238 = vector.shape_cast %237 : vector<1x16x6xf32> to vector<16x6xf32>
    %239 = vector.extract_strided_slice %140 {offsets = [0, 52], sizes = [6, 160], strides = [1, 1]} : vector<6x256xf32> to vector<6x160xf32>
    %cst_163 = arith.constant dense<0.000000e+00> : vector<16x160xf32>
    %240 = tpu.matmul %238, %239, %cst_163 {dimension_numbers = #tpu.dot_dimension_numbers<[1], [0], [0], [1], [0, 0, 1, 1], [], []>} : vector<16x6xf32>, vector<6x160xf32>, vector<16x160xf32> -> vector<16x160xf32>
    %241 = arith.addf %236, %240 : vector<16x160xf32>
    %c20_164 = arith.constant 20 : index
    %c0_165 = arith.constant 0 : index
    %c0_166 = arith.constant 0 : index
    %242 = vector.load %arg5[%c20_164, %c0_165, %c0_166] : memref<25x16x6xf32, #tpu.memory_space<vmem>>, vector<1x16x6xf32>
    %243 = vector.shape_cast %242 : vector<1x16x6xf32> to vector<16x6xf32>
    %244 = vector.extract_strided_slice %140 {offsets = [0, 64], sizes = [6, 160], strides = [1, 1]} : vector<6x256xf32> to vector<6x160xf32>
    %cst_167 = arith.constant dense<0.000000e+00> : vector<16x160xf32>
    %245 = tpu.matmul %243, %244, %cst_167 {dimension_numbers = #tpu.dot_dimension_numbers<[1], [0], [0], [1], [0, 0, 1, 1], [], []>} : vector<16x6xf32>, vector<6x160xf32>, vector<16x160xf32> -> vector<16x160xf32>
    %246 = arith.addf %241, %245 : vector<16x160xf32>
    %c21_168 = arith.constant 21 : index
    %c0_169 = arith.constant 0 : index
    %c0_170 = arith.constant 0 : index
    %247 = vector.load %arg5[%c21_168, %c0_169, %c0_170] : memref<25x16x6xf32, #tpu.memory_space<vmem>>, vector<1x16x6xf32>
    %248 = vector.shape_cast %247 : vector<1x16x6xf32> to vector<16x6xf32>
    %249 = vector.extract_strided_slice %140 {offsets = [0, 65], sizes = [6, 160], strides = [1, 1]} : vector<6x256xf32> to vector<6x160xf32>
    %cst_171 = arith.constant dense<0.000000e+00> : vector<16x160xf32>
    %250 = tpu.matmul %248, %249, %cst_171 {dimension_numbers = #tpu.dot_dimension_numbers<[1], [0], [0], [1], [0, 0, 1, 1], [], []>} : vector<16x6xf32>, vector<6x160xf32>, vector<16x160xf32> -> vector<16x160xf32>
    %251 = arith.addf %246, %250 : vector<16x160xf32>
    %c22_172 = arith.constant 22 : index
    %c0_173 = arith.constant 0 : index
    %c0_174 = arith.constant 0 : index
    %252 = vector.load %arg5[%c22_172, %c0_173, %c0_174] : memref<25x16x6xf32, #tpu.memory_space<vmem>>, vector<1x16x6xf32>
    %253 = vector.shape_cast %252 : vector<1x16x6xf32> to vector<16x6xf32>
    %254 = vector.extract_strided_slice %140 {offsets = [0, 66], sizes = [6, 160], strides = [1, 1]} : vector<6x256xf32> to vector<6x160xf32>
    %cst_175 = arith.constant dense<0.000000e+00> : vector<16x160xf32>
    %255 = tpu.matmul %253, %254, %cst_175 {dimension_numbers = #tpu.dot_dimension_numbers<[1], [0], [0], [1], [0, 0, 1, 1], [], []>} : vector<16x6xf32>, vector<6x160xf32>, vector<16x160xf32> -> vector<16x160xf32>
    %256 = arith.addf %251, %255 : vector<16x160xf32>
    %c23_176 = arith.constant 23 : index
    %c0_177 = arith.constant 0 : index
    %c0_178 = arith.constant 0 : index
    %257 = vector.load %arg5[%c23_176, %c0_177, %c0_178] : memref<25x16x6xf32, #tpu.memory_space<vmem>>, vector<1x16x6xf32>
    %258 = vector.shape_cast %257 : vector<1x16x6xf32> to vector<16x6xf32>
    %259 = vector.extract_strided_slice %140 {offsets = [0, 67], sizes = [6, 160], strides = [1, 1]} : vector<6x256xf32> to vector<6x160xf32>
    %cst_179 = arith.constant dense<0.000000e+00> : vector<16x160xf32>
    %260 = tpu.matmul %258, %259, %cst_179 {dimension_numbers = #tpu.dot_dimension_numbers<[1], [0], [0], [1], [0, 0, 1, 1], [], []>} : vector<16x6xf32>, vector<6x160xf32>, vector<16x160xf32> -> vector<16x160xf32>
    %261 = arith.addf %256, %260 : vector<16x160xf32>
    %c24_180 = arith.constant 24 : index
    %c0_181 = arith.constant 0 : index
    %c0_182 = arith.constant 0 : index
    %262 = vector.load %arg5[%c24_180, %c0_181, %c0_182] : memref<25x16x6xf32, #tpu.memory_space<vmem>>, vector<1x16x6xf32>
    %263 = vector.shape_cast %262 : vector<1x16x6xf32> to vector<16x6xf32>
    %264 = vector.extract_strided_slice %140 {offsets = [0, 68], sizes = [6, 160], strides = [1, 1]} : vector<6x256xf32> to vector<6x160xf32>
    %cst_183 = arith.constant dense<0.000000e+00> : vector<16x160xf32>
    %265 = tpu.matmul %263, %264, %cst_183 {dimension_numbers = #tpu.dot_dimension_numbers<[1], [0], [0], [1], [0, 0, 1, 1], [], []>} : vector<16x6xf32>, vector<6x160xf32>, vector<16x160xf32> -> vector<16x160xf32>
    %266 = arith.addf %261, %265 : vector<16x160xf32>
    %c0_184 = arith.constant 0 : index
    %c0_185 = arith.constant 0 : index
    %267 = vector.load %arg6[%c0_184, %c0_185] : memref<16x1xf32, #tpu.memory_space<vmem>>, vector<16x1xf32>
    %268 = vector.broadcast %267 : vector<16x1xf32> to vector<16x160xf32>
    %269 = arith.addf %266, %268 : vector<16x160xf32>
    %cst_186 = arith.constant 0.000000e+00 : f32
    %270 = vector.broadcast %cst_186 : f32 to vector<16x160xf32>
    %271 = arith.maximumf %269, %270 : vector<16x160xf32>
    %272 = vector.extract_strided_slice %271 {offsets = [0, 0], sizes = [16, 137], strides = [1, 1]} : vector<16x160xf32> to vector<16x137xf32>
    %273 = vector.extract_strided_slice %271 {offsets = [0, 1], sizes = [16, 137], strides = [1, 1]} : vector<16x160xf32> to vector<16x137xf32>
    %274 = arith.maximumf %272, %273 : vector<16x137xf32>
    %275 = vector.extract_strided_slice %271 {offsets = [0, 16], sizes = [16, 137], strides = [1, 1]} : vector<16x160xf32> to vector<16x137xf32>
    %276 = vector.extract_strided_slice %271 {offsets = [0, 17], sizes = [16, 137], strides = [1, 1]} : vector<16x160xf32> to vector<16x137xf32>
    %277 = arith.maximumf %275, %276 : vector<16x137xf32>
    %278 = arith.maximumf %274, %277 : vector<16x137xf32>
    %c0_187 = arith.constant 0 : index
    %c0_188 = arith.constant 0 : index
    %279 = vector.load %arg7[%c0_187, %c0_188] : memref<137x40xf32, #tpu.memory_space<vmem>>, vector<137x40xf32>
    %cst_189 = arith.constant dense<0.000000e+00> : vector<16x40xf32>
    %280 = tpu.matmul %278, %279, %cst_189 {dimension_numbers = #tpu.dot_dimension_numbers<[1], [0], [0], [1], [0, 0, 1, 1], [], []>} : vector<16x137xf32>, vector<137x40xf32>, vector<16x40xf32> -> vector<16x40xf32>
    %cst_190 = arith.constant 0.000000e+00 : f32
    %281 = vector.broadcast %cst_190 : f32 to vector<1x128xf32>
    %282 = vector.extract_strided_slice %280 {offsets = [0, 0], sizes = [1, 40], strides = [1, 1]} : vector<16x40xf32> to vector<1x40xf32>
    %c0_191 = arith.constant 0 : index
    %c0_192 = arith.constant 0 : index
    %c0_193 = arith.constant 0 : index
    %283 = vector.load %arg8[%c0_191, %c0_192, %c0_193] : memref<16x40x128xf32, #tpu.memory_space<vmem>>, vector<1x40x128xf32>
    %284 = vector.shape_cast %283 : vector<1x40x128xf32> to vector<40x128xf32>
    %cst_194 = arith.constant dense<0.000000e+00> : vector<1x128xf32>
    %285 = tpu.matmul %282, %284, %cst_194 {dimension_numbers = #tpu.dot_dimension_numbers<[1], [0], [0], [1], [0, 0, 1, 1], [], []>} : vector<1x40xf32>, vector<40x128xf32>, vector<1x128xf32> -> vector<1x128xf32>
    %286 = arith.addf %281, %285 : vector<1x128xf32>
    %287 = vector.extract_strided_slice %280 {offsets = [1, 0], sizes = [1, 40], strides = [1, 1]} : vector<16x40xf32> to vector<1x40xf32>
    %c1_195 = arith.constant 1 : index
    %c0_196 = arith.constant 0 : index
    %c0_197 = arith.constant 0 : index
    %288 = vector.load %arg8[%c1_195, %c0_196, %c0_197] : memref<16x40x128xf32, #tpu.memory_space<vmem>>, vector<1x40x128xf32>
    %289 = vector.shape_cast %288 : vector<1x40x128xf32> to vector<40x128xf32>
    %cst_198 = arith.constant dense<0.000000e+00> : vector<1x128xf32>
    %290 = tpu.matmul %287, %289, %cst_198 {dimension_numbers = #tpu.dot_dimension_numbers<[1], [0], [0], [1], [0, 0, 1, 1], [], []>} : vector<1x40xf32>, vector<40x128xf32>, vector<1x128xf32> -> vector<1x128xf32>
    %291 = arith.addf %286, %290 : vector<1x128xf32>
    %292 = vector.extract_strided_slice %280 {offsets = [2, 0], sizes = [1, 40], strides = [1, 1]} : vector<16x40xf32> to vector<1x40xf32>
    %c2_199 = arith.constant 2 : index
    %c0_200 = arith.constant 0 : index
    %c0_201 = arith.constant 0 : index
    %293 = vector.load %arg8[%c2_199, %c0_200, %c0_201] : memref<16x40x128xf32, #tpu.memory_space<vmem>>, vector<1x40x128xf32>
    %294 = vector.shape_cast %293 : vector<1x40x128xf32> to vector<40x128xf32>
    %cst_202 = arith.constant dense<0.000000e+00> : vector<1x128xf32>
    %295 = tpu.matmul %292, %294, %cst_202 {dimension_numbers = #tpu.dot_dimension_numbers<[1], [0], [0], [1], [0, 0, 1, 1], [], []>} : vector<1x40xf32>, vector<40x128xf32>, vector<1x128xf32> -> vector<1x128xf32>
    %296 = arith.addf %291, %295 : vector<1x128xf32>
    %297 = vector.extract_strided_slice %280 {offsets = [3, 0], sizes = [1, 40], strides = [1, 1]} : vector<16x40xf32> to vector<1x40xf32>
    %c3_203 = arith.constant 3 : index
    %c0_204 = arith.constant 0 : index
    %c0_205 = arith.constant 0 : index
    %298 = vector.load %arg8[%c3_203, %c0_204, %c0_205] : memref<16x40x128xf32, #tpu.memory_space<vmem>>, vector<1x40x128xf32>
    %299 = vector.shape_cast %298 : vector<1x40x128xf32> to vector<40x128xf32>
    %cst_206 = arith.constant dense<0.000000e+00> : vector<1x128xf32>
    %300 = tpu.matmul %297, %299, %cst_206 {dimension_numbers = #tpu.dot_dimension_numbers<[1], [0], [0], [1], [0, 0, 1, 1], [], []>} : vector<1x40xf32>, vector<40x128xf32>, vector<1x128xf32> -> vector<1x128xf32>
    %301 = arith.addf %296, %300 : vector<1x128xf32>
    %302 = vector.extract_strided_slice %280 {offsets = [4, 0], sizes = [1, 40], strides = [1, 1]} : vector<16x40xf32> to vector<1x40xf32>
    %c4_207 = arith.constant 4 : index
    %c0_208 = arith.constant 0 : index
    %c0_209 = arith.constant 0 : index
    %303 = vector.load %arg8[%c4_207, %c0_208, %c0_209] : memref<16x40x128xf32, #tpu.memory_space<vmem>>, vector<1x40x128xf32>
    %304 = vector.shape_cast %303 : vector<1x40x128xf32> to vector<40x128xf32>
    %cst_210 = arith.constant dense<0.000000e+00> : vector<1x128xf32>
    %305 = tpu.matmul %302, %304, %cst_210 {dimension_numbers = #tpu.dot_dimension_numbers<[1], [0], [0], [1], [0, 0, 1, 1], [], []>} : vector<1x40xf32>, vector<40x128xf32>, vector<1x128xf32> -> vector<1x128xf32>
    %306 = arith.addf %301, %305 : vector<1x128xf32>
    %307 = vector.extract_strided_slice %280 {offsets = [5, 0], sizes = [1, 40], strides = [1, 1]} : vector<16x40xf32> to vector<1x40xf32>
    %c5_211 = arith.constant 5 : index
    %c0_212 = arith.constant 0 : index
    %c0_213 = arith.constant 0 : index
    %308 = vector.load %arg8[%c5_211, %c0_212, %c0_213] : memref<16x40x128xf32, #tpu.memory_space<vmem>>, vector<1x40x128xf32>
    %309 = vector.shape_cast %308 : vector<1x40x128xf32> to vector<40x128xf32>
    %cst_214 = arith.constant dense<0.000000e+00> : vector<1x128xf32>
    %310 = tpu.matmul %307, %309, %cst_214 {dimension_numbers = #tpu.dot_dimension_numbers<[1], [0], [0], [1], [0, 0, 1, 1], [], []>} : vector<1x40xf32>, vector<40x128xf32>, vector<1x128xf32> -> vector<1x128xf32>
    %311 = arith.addf %306, %310 : vector<1x128xf32>
    %312 = vector.extract_strided_slice %280 {offsets = [6, 0], sizes = [1, 40], strides = [1, 1]} : vector<16x40xf32> to vector<1x40xf32>
    %c6_215 = arith.constant 6 : index
    %c0_216 = arith.constant 0 : index
    %c0_217 = arith.constant 0 : index
    %313 = vector.load %arg8[%c6_215, %c0_216, %c0_217] : memref<16x40x128xf32, #tpu.memory_space<vmem>>, vector<1x40x128xf32>
    %314 = vector.shape_cast %313 : vector<1x40x128xf32> to vector<40x128xf32>
    %cst_218 = arith.constant dense<0.000000e+00> : vector<1x128xf32>
    %315 = tpu.matmul %312, %314, %cst_218 {dimension_numbers = #tpu.dot_dimension_numbers<[1], [0], [0], [1], [0, 0, 1, 1], [], []>} : vector<1x40xf32>, vector<40x128xf32>, vector<1x128xf32> -> vector<1x128xf32>
    %316 = arith.addf %311, %315 : vector<1x128xf32>
    %317 = vector.extract_strided_slice %280 {offsets = [7, 0], sizes = [1, 40], strides = [1, 1]} : vector<16x40xf32> to vector<1x40xf32>
    %c7_219 = arith.constant 7 : index
    %c0_220 = arith.constant 0 : index
    %c0_221 = arith.constant 0 : index
    %318 = vector.load %arg8[%c7_219, %c0_220, %c0_221] : memref<16x40x128xf32, #tpu.memory_space<vmem>>, vector<1x40x128xf32>
    %319 = vector.shape_cast %318 : vector<1x40x128xf32> to vector<40x128xf32>
    %cst_222 = arith.constant dense<0.000000e+00> : vector<1x128xf32>
    %320 = tpu.matmul %317, %319, %cst_222 {dimension_numbers = #tpu.dot_dimension_numbers<[1], [0], [0], [1], [0, 0, 1, 1], [], []>} : vector<1x40xf32>, vector<40x128xf32>, vector<1x128xf32> -> vector<1x128xf32>
    %321 = arith.addf %316, %320 : vector<1x128xf32>
    %322 = vector.extract_strided_slice %280 {offsets = [8, 0], sizes = [1, 40], strides = [1, 1]} : vector<16x40xf32> to vector<1x40xf32>
    %c8_223 = arith.constant 8 : index
    %c0_224 = arith.constant 0 : index
    %c0_225 = arith.constant 0 : index
    %323 = vector.load %arg8[%c8_223, %c0_224, %c0_225] : memref<16x40x128xf32, #tpu.memory_space<vmem>>, vector<1x40x128xf32>
    %324 = vector.shape_cast %323 : vector<1x40x128xf32> to vector<40x128xf32>
    %cst_226 = arith.constant dense<0.000000e+00> : vector<1x128xf32>
    %325 = tpu.matmul %322, %324, %cst_226 {dimension_numbers = #tpu.dot_dimension_numbers<[1], [0], [0], [1], [0, 0, 1, 1], [], []>} : vector<1x40xf32>, vector<40x128xf32>, vector<1x128xf32> -> vector<1x128xf32>
    %326 = arith.addf %321, %325 : vector<1x128xf32>
    %327 = vector.extract_strided_slice %280 {offsets = [9, 0], sizes = [1, 40], strides = [1, 1]} : vector<16x40xf32> to vector<1x40xf32>
    %c9_227 = arith.constant 9 : index
    %c0_228 = arith.constant 0 : index
    %c0_229 = arith.constant 0 : index
    %328 = vector.load %arg8[%c9_227, %c0_228, %c0_229] : memref<16x40x128xf32, #tpu.memory_space<vmem>>, vector<1x40x128xf32>
    %329 = vector.shape_cast %328 : vector<1x40x128xf32> to vector<40x128xf32>
    %cst_230 = arith.constant dense<0.000000e+00> : vector<1x128xf32>
    %330 = tpu.matmul %327, %329, %cst_230 {dimension_numbers = #tpu.dot_dimension_numbers<[1], [0], [0], [1], [0, 0, 1, 1], [], []>} : vector<1x40xf32>, vector<40x128xf32>, vector<1x128xf32> -> vector<1x128xf32>
    %331 = arith.addf %326, %330 : vector<1x128xf32>
    %332 = vector.extract_strided_slice %280 {offsets = [10, 0], sizes = [1, 40], strides = [1, 1]} : vector<16x40xf32> to vector<1x40xf32>
    %c10_231 = arith.constant 10 : index
    %c0_232 = arith.constant 0 : index
    %c0_233 = arith.constant 0 : index
    %333 = vector.load %arg8[%c10_231, %c0_232, %c0_233] : memref<16x40x128xf32, #tpu.memory_space<vmem>>, vector<1x40x128xf32>
    %334 = vector.shape_cast %333 : vector<1x40x128xf32> to vector<40x128xf32>
    %cst_234 = arith.constant dense<0.000000e+00> : vector<1x128xf32>
    %335 = tpu.matmul %332, %334, %cst_234 {dimension_numbers = #tpu.dot_dimension_numbers<[1], [0], [0], [1], [0, 0, 1, 1], [], []>} : vector<1x40xf32>, vector<40x128xf32>, vector<1x128xf32> -> vector<1x128xf32>
    %336 = arith.addf %331, %335 : vector<1x128xf32>
    %337 = vector.extract_strided_slice %280 {offsets = [11, 0], sizes = [1, 40], strides = [1, 1]} : vector<16x40xf32> to vector<1x40xf32>
    %c11_235 = arith.constant 11 : index
    %c0_236 = arith.constant 0 : index
    %c0_237 = arith.constant 0 : index
    %338 = vector.load %arg8[%c11_235, %c0_236, %c0_237] : memref<16x40x128xf32, #tpu.memory_space<vmem>>, vector<1x40x128xf32>
    %339 = vector.shape_cast %338 : vector<1x40x128xf32> to vector<40x128xf32>
    %cst_238 = arith.constant dense<0.000000e+00> : vector<1x128xf32>
    %340 = tpu.matmul %337, %339, %cst_238 {dimension_numbers = #tpu.dot_dimension_numbers<[1], [0], [0], [1], [0, 0, 1, 1], [], []>} : vector<1x40xf32>, vector<40x128xf32>, vector<1x128xf32> -> vector<1x128xf32>
    %341 = arith.addf %336, %340 : vector<1x128xf32>
    %342 = vector.extract_strided_slice %280 {offsets = [12, 0], sizes = [1, 40], strides = [1, 1]} : vector<16x40xf32> to vector<1x40xf32>
    %c12_239 = arith.constant 12 : index
    %c0_240 = arith.constant 0 : index
    %c0_241 = arith.constant 0 : index
    %343 = vector.load %arg8[%c12_239, %c0_240, %c0_241] : memref<16x40x128xf32, #tpu.memory_space<vmem>>, vector<1x40x128xf32>
    %344 = vector.shape_cast %343 : vector<1x40x128xf32> to vector<40x128xf32>
    %cst_242 = arith.constant dense<0.000000e+00> : vector<1x128xf32>
    %345 = tpu.matmul %342, %344, %cst_242 {dimension_numbers = #tpu.dot_dimension_numbers<[1], [0], [0], [1], [0, 0, 1, 1], [], []>} : vector<1x40xf32>, vector<40x128xf32>, vector<1x128xf32> -> vector<1x128xf32>
    %346 = arith.addf %341, %345 : vector<1x128xf32>
    %347 = vector.extract_strided_slice %280 {offsets = [13, 0], sizes = [1, 40], strides = [1, 1]} : vector<16x40xf32> to vector<1x40xf32>
    %c13_243 = arith.constant 13 : index
    %c0_244 = arith.constant 0 : index
    %c0_245 = arith.constant 0 : index
    %348 = vector.load %arg8[%c13_243, %c0_244, %c0_245] : memref<16x40x128xf32, #tpu.memory_space<vmem>>, vector<1x40x128xf32>
    %349 = vector.shape_cast %348 : vector<1x40x128xf32> to vector<40x128xf32>
    %cst_246 = arith.constant dense<0.000000e+00> : vector<1x128xf32>
    %350 = tpu.matmul %347, %349, %cst_246 {dimension_numbers = #tpu.dot_dimension_numbers<[1], [0], [0], [1], [0, 0, 1, 1], [], []>} : vector<1x40xf32>, vector<40x128xf32>, vector<1x128xf32> -> vector<1x128xf32>
    %351 = arith.addf %346, %350 : vector<1x128xf32>
    %352 = vector.extract_strided_slice %280 {offsets = [14, 0], sizes = [1, 40], strides = [1, 1]} : vector<16x40xf32> to vector<1x40xf32>
    %c14_247 = arith.constant 14 : index
    %c0_248 = arith.constant 0 : index
    %c0_249 = arith.constant 0 : index
    %353 = vector.load %arg8[%c14_247, %c0_248, %c0_249] : memref<16x40x128xf32, #tpu.memory_space<vmem>>, vector<1x40x128xf32>
    %354 = vector.shape_cast %353 : vector<1x40x128xf32> to vector<40x128xf32>
    %cst_250 = arith.constant dense<0.000000e+00> : vector<1x128xf32>
    %355 = tpu.matmul %352, %354, %cst_250 {dimension_numbers = #tpu.dot_dimension_numbers<[1], [0], [0], [1], [0, 0, 1, 1], [], []>} : vector<1x40xf32>, vector<40x128xf32>, vector<1x128xf32> -> vector<1x128xf32>
    %356 = arith.addf %351, %355 : vector<1x128xf32>
    %357 = vector.extract_strided_slice %280 {offsets = [15, 0], sizes = [1, 40], strides = [1, 1]} : vector<16x40xf32> to vector<1x40xf32>
    %c15_251 = arith.constant 15 : index
    %c0_252 = arith.constant 0 : index
    %c0_253 = arith.constant 0 : index
    %358 = vector.load %arg8[%c15_251, %c0_252, %c0_253] : memref<16x40x128xf32, #tpu.memory_space<vmem>>, vector<1x40x128xf32>
    %359 = vector.shape_cast %358 : vector<1x40x128xf32> to vector<40x128xf32>
    %cst_254 = arith.constant dense<0.000000e+00> : vector<1x128xf32>
    %360 = tpu.matmul %357, %359, %cst_254 {dimension_numbers = #tpu.dot_dimension_numbers<[1], [0], [0], [1], [0, 0, 1, 1], [], []>} : vector<1x40xf32>, vector<40x128xf32>, vector<1x128xf32> -> vector<1x128xf32>
    %361 = arith.addf %356, %360 : vector<1x128xf32>
    %c0_255 = arith.constant 0 : index
    %c0_256 = arith.constant 0 : index
    %362 = vector.load %arg9[%c0_255, %c0_256] : memref<1x128xf32, #tpu.memory_space<vmem>>, vector<1x128xf32>
    %363 = arith.addf %361, %362 : vector<1x128xf32>
    %cst_257 = arith.constant 0.000000e+00 : f32
    %364 = vector.broadcast %cst_257 : f32 to vector<1x128xf32>
    %365 = arith.maximumf %363, %364 : vector<1x128xf32>
    %c0_258 = arith.constant 0 : index
    %c0_259 = arith.constant 0 : index
    %366 = vector.load %arg10[%c0_258, %c0_259] : memref<128x128xf32, #tpu.memory_space<vmem>>, vector<128x128xf32>
    %cst_260 = arith.constant dense<0.000000e+00> : vector<1x128xf32>
    %367 = tpu.matmul %365, %366, %cst_260 {dimension_numbers = #tpu.dot_dimension_numbers<[1], [0], [0], [1], [0, 0, 1, 1], [], []>} : vector<1x128xf32>, vector<128x128xf32>, vector<1x128xf32> -> vector<1x128xf32>
    %c0_261 = arith.constant 0 : index
    %c0_262 = arith.constant 0 : index
    %368 = vector.load %arg11[%c0_261, %c0_262] : memref<1x128xf32, #tpu.memory_space<vmem>>, vector<1x128xf32>
    %369 = arith.addf %367, %368 : vector<1x128xf32>
    %cst_263 = arith.constant 0.000000e+00 : f32
    %370 = vector.broadcast %cst_263 : f32 to vector<1x128xf32>
    %371 = arith.maximumf %369, %370 : vector<1x128xf32>
    %c0_264 = arith.constant 0 : index
    %c0_265 = arith.constant 0 : index
    %372 = vector.load %arg12[%c0_264, %c0_265] : memref<128x128xf32, #tpu.memory_space<vmem>>, vector<128x128xf32>
    %cst_266 = arith.constant dense<0.000000e+00> : vector<1x128xf32>
    %373 = tpu.matmul %371, %372, %cst_266 {dimension_numbers = #tpu.dot_dimension_numbers<[1], [0], [0], [1], [0, 0, 1, 1], [], []>} : vector<1x128xf32>, vector<128x128xf32>, vector<1x128xf32> -> vector<1x128xf32>
    %c0_267 = arith.constant 0 : index
    %c0_268 = arith.constant 0 : index
    %374 = vector.load %arg13[%c0_267, %c0_268] : memref<1x128xf32, #tpu.memory_space<vmem>>, vector<1x128xf32>
    %375 = arith.addf %373, %374 : vector<1x128xf32>
    %c0_269 = arith.constant 0 : index
    %c0_270 = arith.constant 0 : index
    %376 = vector.load %arg14[%c0_269, %c0_270] : memref<1x128xf32, #tpu.memory_space<vmem>>, vector<1x128xf32>
    tpu.vector_store %arg14[%c0_269, %c0_270], %375 {strides = array<i32>} : memref<1x128xf32, #tpu.memory_space<vmem>>, vector<1x128xf32>,
    return
  }
  func.func @transform_0(%arg0: i32) -> (i32, i32) {
    %c0_i32 = arith.constant 0 : i32
    %c0_i32_0 = arith.constant 0 : i32
    %c0_i32_1 = arith.constant 0 : i32
    return %c0_i32, %c0_i32_0 : i32, i32
  }
  func.func @transform_1(%arg0: i32) -> (i32, i32, i32) {
    %c0_i32 = arith.constant 0 : i32
    %c0_i32_0 = arith.constant 0 : i32
    %c0_i32_1 = arith.constant 0 : i32
    %c0_i32_2 = arith.constant 0 : i32
    return %c0_i32, %c0_i32_0, %c0_i32_1 : i32, i32, i32
  }
  func.func @transform_2(%arg0: i32) -> (i32, i32) {
    %c0_i32 = arith.constant 0 : i32
    %c0_i32_0 = arith.constant 0 : i32
    %c0_i32_1 = arith.constant 0 : i32
    return %c0_i32, %c0_i32_0 : i32, i32
  }
  func.func @transform_3(%arg0: i32) -> (i32, i32) {
    %c0_i32 = arith.constant 0 : i32
    %c0_i32_0 = arith.constant 0 : i32
    %c0_i32_1 = arith.constant 0 : i32
    return %c0_i32, %c0_i32_0 : i32, i32
  }
  func.func @transform_4(%arg0: i32) -> (i32, i32, i32) {
    %c0_i32 = arith.constant 0 : i32
    %c0_i32_0 = arith.constant 0 : i32
    %c0_i32_1 = arith.constant 0 : i32
    %c0_i32_2 = arith.constant 0 : i32
    return %c0_i32, %c0_i32_0, %c0_i32_1 : i32, i32, i32
  }
  func.func @transform_5(%arg0: i32) -> (i32, i32) {
    %c0_i32 = arith.constant 0 : i32
    %c0_i32_0 = arith.constant 0 : i32
    %c0_i32_1 = arith.constant 0 : i32
    return %c0_i32, %c0_i32_0 : i32, i32
  }
  func.func @transform_6(%arg0: i32) -> (i32, i32) {
    %c0_i32 = arith.constant 0 : i32
    %c0_i32_0 = arith.constant 0 : i32
    %c0_i32_1 = arith.constant 0 : i32
    return %c0_i32, %c0_i32_0 : i32, i32
  }
  func.func @transform_7(%arg0: i32) -> (i32, i32, i32) {
    %c0_i32 = arith.constant 0 : i32
    %c0_i32_0 = arith.constant 0 : i32
    %c0_i32_1 = arith.constant 0 : i32
    %c0_i32_2 = arith.constant 0 : i32
    return %c0_i32, %c0_i32_0, %c0_i32_1 : i32, i32, i32
  }
  func.func @transform_8(%arg0: i32) -> (i32, i32) {
    %c0_i32 = arith.constant 0 : i32
    %c0_i32_0 = arith.constant 0 : i32
    %c0_i32_1 = arith.constant 0 : i32
    return %c0_i32, %c0_i32_0 : i32, i32
  }
  func.func @transform_9(%arg0: i32) -> (i32, i32) {
    %c0_i32 = arith.constant 0 : i32
    %c0_i32_0 = arith.constant 0 : i32
    %c0_i32_1 = arith.constant 0 : i32
    return %c0_i32, %c0_i32_0 : i32, i32
  }
  func.func @transform_10(%arg0: i32) -> (i32, i32) {
    %c0_i32 = arith.constant 0 : i32
    %c0_i32_0 = arith.constant 0 : i32
    %c0_i32_1 = arith.constant 0 : i32
    return %c0_i32, %c0_i32_0 : i32, i32
  }
  func.func @transform_11(%arg0: i32) -> (i32, i32) {
    %c0_i32 = arith.constant 0 : i32
    %c0_i32_0 = arith.constant 0 : i32
    %c0_i32_1 = arith.constant 0 : i32
    return %c0_i32, %c0_i32_0 : i32, i32
  }
  func.func @transform_12(%arg0: i32) -> (i32, i32) {
    %c0_i32 = arith.constant 0 : i32
    %c0_i32_0 = arith.constant 0 : i32
    %c0_i32_1 = arith.constant 0 : i32
    return %c0_i32, %c0_i32_0 : i32, i32
  }
  func.func @transform_13(%arg0: i32) -> (i32, i32) {
    %c0_i32 = arith.constant 0 : i32
    %c0_i32_0 = arith.constant 0 : i32
    %c0_i32_1 = arith.constant 0 : i32
    return %c0_i32, %c0_i32_0 : i32, i32
  }
}

</mosaic_0001>

<bundles_post_ra>
// kernel: tpu_custom_call.1
= control target key start
LH: loop header
LB: loop body
LE: loop exit
PB: predicated region body
PF: predicated region fallthrough
CT: control target
= control target key end

     0   :  { %18 = vsyncpa [#allocation3], 0  ;;  %s16837_s0 = inlined_call_operand.vmem [shape: f32[3,1152], index: 0, kind: input, shape index: {}]   ;;  %s16838_s1 = inlined_call_operand.vmem [shape: f32[25,6,3], index: 1, kind: input, shape index: {}]   ;;  %s16839_s2 = inlined_call_operand.vmem [shape: f32[6,1], index: 2, kind: input, shape index: {}]   ;;  %s16840_s3 = inlined_call_operand.hbm [shape: f32[859,256], index: 3, kind: input, shape index: {}]   ;;  %s16841_s4 = inlined_call_operand.vmem [shape: f32[25,16,6], index: 4, kind: input, shape index: {}]   ;;  %s16842_s5 = inlined_call_operand.vmem [shape: f32[16,1], index: 5, kind: input, shape index: {}]   ;;  %s16843_s6 = inlined_call_operand.vmem [shape: f32[137,40], index: 6, kind: input, shape index: {}]   ;;  %s16844_s7 = inlined_call_operand.vmem [shape: f32[16,40,128], index: 7, kind: input, shape index: {}]   ;;  %s16845_s8 = inlined_call_operand.vmem [shape: f32[1,128], index: 8, kind: input, shape index: {}]   ;;  %s16846_s9 = inlined_call_operand.vmem [shape: f32[128,128], index: 9, kind: input, shape index: {}]   ;;  %s16847_s10 = inlined_call_operand.vmem [shape: f32[1,128], index: 10, kind: input, shape index: {}]   ;;  %s16848_s11 = inlined_call_operand.vmem [shape: f32[128,128], index: 11, kind: input, shape index: {}]   ;;  %s16849_s12 = inlined_call_operand.vmem [shape: f32[1,128], index: 12, kind: input, shape index: {}]   ;;  %s16850_s13 = inlined_call_operand.hbm [shape: f32[1,128], index: 13, kind: output, shape index: {}]  }
   0x1   :  { %19 = vsyncpa [#allocation4], 0  ;;  %s14162_s25 = smov [#allocation2]  }
   0x2   :  { %s31_s26 = sshll.u32 %s14162_s25, 4  ;;  %s32_s26 = int_to_ptr.vmem [resolvable:$true] %s31_s26 }
   0x3   :  { %s14126_s27 = scalar_lea.vmem %s32_s26, 27648  ;;  %p14131_p1 = scmp.lt.s32.totalorder %s32_s26, %s32_s26 }
   0x4   :  { %p14127_p0 = scmp.ne.s32.totalorder %s32_s26, %s14126_s27  ;;  %p14132_p2 = scmp.lt.s32.totalorder %s14126_s27, %s14126_s27 }
   0x6   :  { %p14133_p3 = por %p14132_p2, %p14131_p1 }
   0x8   :  { %p14134_p4 = pnand %p14133_p3, %p14127_p0 }
   0xa   :  { %14137 = shalt.err (!%p14134_p4)
}
   0xb   :  { %s14163_s28 = smov 256   ;;  %s14164_s29 = smov 16  }
   0xc   :  { %37 = dma.hbm_to_vmem [thread:$0]  %s16840_s3, 27648, %s32_s26, [#allocation3], %s14163_s28, %s14163_s28, %s14164_s29  }
   0xd   :  { %14158 = dma.done.wait [#allocation3], 27648  }
   0xe   :  { %14159 = vsyncadd [#allocation3], 4294939648  ;;  %v16856_v0 = vmov 0.0   ;;  %v14276_v1 = vld [vmem:[%s16837_s0 + $0x10] sm:$0x77]  ;;  %s14166_s19 = smov 127  }
   0xf   :  { %253 = vmatprep.mubr.f32.mxu1 %v16856_v0  ;;  %182 = vmatprep.mubr.f32.mxu0 %v16856_v0  ;;  %v14281_v2 = vld [vmem:[%s16837_s0 + $0x8] sm:$0x77]  ;;  %v14294_v4 = vld [vmem:[%s16837_s0] sm:$0x77]  ;;  %v14302_v5 = vcombine.high %v14276_v1, %v14276_v1  ;;  %v14311_v7 = vld [vmem:[%s16837_s0 + $0x18] sm:$0x77] }
  0x10   :  { %83 = vrot.lane.b32.xlu1 %v14276_v1, %s14166_s19  ;;  %79 = vrot.lane.b32.xlu0 %v14281_v2, %s14166_s19  ;;  %v14289_v3 = vcombine.high %v14281_v2, %v14281_v2  ;;  %v14306_v6 = vcombine.high %v14294_v4, %v14294_v4  ;;  %v14319_v8 = vcombine.high %v14311_v7, %v14311_v7  ;;  %s14167_s23 = smov 126   ;;  %s14168_s24 = smov 125   ;;  %vm91_vm0 = vcmask 1039360   ;;  %v12920_v15 = vld [vmem:[%s16838_s1 + $0x8] sm:$0x3f] }
  0x11   :  { %s14169_s25 = smov 124   ;;  %s14170_s26 = smov 96   ;;  %vm103_vm1 = vcmask 1042432   ;;  %vm99_vm2 = vcmask 23552   ;;  %vm14174_vm3 = vmmov 0   ;;  %vm719_vm4 = vcmask 1031168  }
  0x12   :  { %s14171_s27 = smov 95   ;;  %s14172_s28 = smov 94   ;;  %v64_v27 = vld [vmem:[%s16838_s1] sm:$0x3f]  ;;  %v12943_v38 = vld [vmem:[%s16838_s1 + $0x10] sm:$0x3f] }
  0x13   :  { %s14173_s29 = smov 93   ;;  %s14175_s15 = smov 92   ;;  %vm1052_vm5 = vcmask 1022976   ;;  %v12955_v51 = vld [vmem:[%s16838_s1 + $0x18] sm:$0x3f]  ;;  %vm1385_vm6 = vcmask 1014784  }
  0x14   :  { %81 = vrot.lane.b32.xlu1 %v14289_v3, %s14166_s19  ;;  %75 = vrot.lane.b32.xlu0 %v14294_v4, %s14166_s19  ;;  %s14176_s20 = smov 64   ;;  %s14177_s30 = smov 63   ;;  %vm1718_vm7 = vcmask 785408   ;;  %vm2051_vm8 = vcmask 777216   ;;  %vm2384_vm9 = vcmask 769024   ;;  %vm2717_vm10 = vcmask 760832  }
  0x15   :  { %s14178_s17 = smov 62   ;;  %s14179_s21 = smov 61   ;;  %vm3050_vm11 = vcmask 752640   ;;  %vm16854_vm12 = vcmask 523264   ;;  %vm3716_vm13 = vcmask 515072   ;;  %vm16853_vm14 = vcmask 506880  }
  0x16   :  { %s16851_s16 = smov 60   ;;  %s14181_s22 = smov 32   ;;  %vm4382_vm15 = vcmask 498688  }
  0x17   :  { %s14182_s3 = smov 31   ;;  %s14183_s18 = smov 30  }
  0x18   :  { %85 = vrot.lane.b32.xlu1 %v14302_v5, %s14166_s19  ;;  %77 = vrot.lane.b32.xlu0 %v14306_v6, %s14166_s19  ;;  %s14184_s14 = smov 29  }
  0x1c   :  { %89 = vrot.lane.b32.xlu1 %v14319_v8, %s14166_s19  ;;  %87 = vrot.lane.b32.xlu0 %v14311_v7, %s14166_s19 }
  0x20   :  { %707 = vrot.lane.b32.xlu1 %v14281_v2, %s14167_s23  ;;  %705 = vrot.lane.b32.xlu0 %v14306_v6, %s14167_s23 }
  0x24   :  { %711 = vrot.lane.b32.xlu1 %v14276_v1, %s14167_s23  ;;  %709 = vrot.lane.b32.xlu0 %v14289_v3, %s14167_s23 }
  0x28   :  { %713 = vrot.lane.b32.xlu1 %v14302_v5, %s14167_s23  ;;  %703 = vrot.lane.b32.xlu0 %v14294_v4, %s14167_s23 }
  0x2c   :  { %717 = vrot.lane.b32.xlu1 %v14319_v8, %s14167_s23  ;;  %715 = vrot.lane.b32.xlu0 %v14311_v7, %s14167_s23 }
  0x30   :  { %1040 = vrot.lane.b32.xlu1 %v14281_v2, %s14168_s24  ;;  %1038 = vrot.lane.b32.xlu0 %v14306_v6, %s14168_s24 }
  0x34   :  { %1044 = vrot.lane.b32.xlu1 %v14276_v1, %s14168_s24  ;;  %1042 = vrot.lane.b32.xlu0 %v14289_v3, %s14168_s24 }
  0x38   :  { %1046 = vrot.lane.b32.xlu1 %v14302_v5, %s14168_s24  ;;  %1036 = vrot.lane.b32.xlu0 %v14294_v4, %s14168_s24 }
  0x3c   :  { %1050 = vrot.lane.b32.xlu1 %v14319_v8, %s14168_s24  ;;  %1048 = vrot.lane.b32.xlu0 %v14311_v7, %s14168_s24 }
  0x40   :  { %1373 = vrot.lane.b32.xlu1 %v14281_v2, %s14169_s25  ;;  %1371 = vrot.lane.b32.xlu0 %v14306_v6, %s14169_s25 }
  0x44   :  { %1377 = vrot.lane.b32.xlu1 %v14276_v1, %s14169_s25  ;;  %1375 = vrot.lane.b32.xlu0 %v14289_v3, %s14169_s25 }
  0x48   :  { %1379 = vrot.lane.b32.xlu1 %v14302_v5, %s14169_s25  ;;  %1369 = vrot.lane.b32.xlu0 %v14294_v4, %s14169_s25 }
  0x4c   :  { %1383 = vrot.lane.b32.xlu1 %v14319_v8, %s14169_s25  ;;  %1381 = vrot.lane.b32.xlu0 %v14311_v7, %s14169_s25 }
  0x50   :  { %1706 = vrot.lane.b32.xlu1 %v14281_v2, %s14170_s26  ;;  %1704 = vrot.lane.b32.xlu0 %v14306_v6, %s14170_s26 }
  0x54   :  { %1710 = vrot.lane.b32.xlu1 %v14276_v1, %s14170_s26  ;;  %1708 = vrot.lane.b32.xlu0 %v14289_v3, %s14170_s26 }
  0x58   :  { %1712 = vrot.lane.b32.xlu1 %v14302_v5, %s14170_s26  ;;  %1702 = vrot.lane.b32.xlu0 %v14294_v4, %s14170_s26 }
  0x5c   :  { %1716 = vrot.lane.b32.xlu1 %v14319_v8, %s14170_s26  ;;  %1714 = vrot.lane.b32.xlu0 %v14311_v7, %s14170_s26 }
  0x60   :  { %2039 = vrot.lane.b32.xlu1 %v14281_v2, %s14171_s27  ;;  %2037 = vrot.lane.b32.xlu0 %v14306_v6, %s14171_s27 }
  0x64   :  { %2043 = vrot.lane.b32.xlu1 %v14276_v1, %s14171_s27  ;;  %2041 = vrot.lane.b32.xlu0 %v14289_v3, %s14171_s27 }
  0x68   :  { %2045 = vrot.lane.b32.xlu1 %v14302_v5, %s14171_s27  ;;  %2035 = vrot.lane.b32.xlu0 %v14294_v4, %s14171_s27 }
  0x6c   :  { %2049 = vrot.lane.b32.xlu1 %v14319_v8, %s14171_s27  ;;  %2047 = vrot.lane.b32.xlu0 %v14311_v7, %s14171_s27 }
  0x70   :  { %2372 = vrot.lane.b32.xlu1 %v14281_v2, %s14172_s28  ;;  %2370 = vrot.lane.b32.xlu0 %v14306_v6, %s14172_s28 }
  0x74   :  { %2376 = vrot.lane.b32.xlu1 %v14276_v1, %s14172_s28  ;;  %2374 = vrot.lane.b32.xlu0 %v14289_v3, %s14172_s28 }
  0x78   :  { %2378 = vrot.lane.b32.xlu1 %v14302_v5, %s14172_s28  ;;  %2368 = vrot.lane.b32.xlu0 %v14294_v4, %s14172_s28 }
  0x7c   :  { %2382 = vrot.lane.b32.xlu1 %v14319_v8, %s14172_s28  ;;  %2380 = vrot.lane.b32.xlu0 %v14311_v7, %s14172_s28 }
  0x80   :  { %2705 = vrot.lane.b32.xlu1 %v14281_v2, %s14173_s29  ;;  %2703 = vrot.lane.b32.xlu0 %v14306_v6, %s14173_s29 }
  0x82   :  { %v84_v9 = vpop.permute.xlu1 %83  ;;  %v80_v10 = vpop.permute.xlu0 %79 }
  0x84   :  { %2709 = vrot.lane.b32.xlu1 %v14276_v1, %s14173_s29  ;;  %2707 = vrot.lane.b32.xlu0 %v14289_v3, %s14173_s29 }
  0x86   :  { %v82_v11 = vpop.permute.xlu1 %81  ;;  %v76_v12 = vpop.permute.xlu0 %75 }
  0x87   :  { %v14430_v13 = vsel %vm91_vm0, %v82_v11, %v84_v9  ;;  %v14433_v14 = vsel %vm91_vm0, %v80_v10, %v82_v11 }
  0x88   :  { %2711 = vrot.lane.b32.xlu1 %v14302_v5, %s14173_s29  ;;  %12924 = vmatprep.subr.msk.mxu1 %vm103_vm1, %v14430_v13 }
  0x89   :  { %2701 = vrot.lane.b32.xlu0 %v14294_v4, %s14173_s29  ;;  %12925 = vmatpush1.msk.msra.mxu1 %vm103_vm1, %v14433_v14 }
  0x8a   :  { %v86_v16 = vpop.permute.xlu1 %85  ;;  %v78_v17 = vpop.permute.xlu0 %77  ;;  %12926 = vmatmul.mubr.msk.f32.vlgmr.msra.gmra.mxu1 %vm99_vm2, %v12920_v15  ;;  %13644 = vmatprep.subr.mxu1 %v16856_v0 }
  0x8b   :  { %v14449_v18 = vsel %vm91_vm0, %v78_v17, %v80_v10  ;;  %v92_v19 = vsel %vm91_vm0, %v76_v12, %v78_v17  ;;  %13646 = vmatprep.mubr.msk.f32.mxu1 %vm14174_vm3, %v16856_v0  ;;  %v14477_v24 = vsel %vm91_vm0, %v84_v9, %v86_v16  ;;  %v12967_v10 = vld [vmem:[%s16838_s1 + $0x20] sm:$0x3f] }
  0x8c   :  { %2715 = vrot.lane.b32.xlu1 %v14319_v8, %s14173_s29  ;;  %12921 = vmatprep.subr.msk.mxu0 %vm103_vm1, %v14449_v18 }
  0x8d   :  { %2713 = vrot.lane.b32.xlu0 %v14311_v7, %s14173_s29  ;;  %12922 = vmatpush1.msk.msra.mxu0 %vm103_vm1, %v92_v19 }
  0x8e   :  { %v14461_v20 = vpop.permute.xlu1 %89  ;;  %12923 = vmatmul.mubr.msk.f32.vlgmr.msra.gmra.mxu0 %vm99_vm2, %v12920_v15  ;;  %v88_v21 = vpop.permute.xlu0 %87 }
  0x8f   :  { %v14466_v22 = vsel %vm91_vm0, %v88_v21, %v14461_v20  ;;  %v14469_v23 = vsel %vm91_vm0, %v86_v16, %v88_v21  ;;  %324 = vmatprep.mubr.f32.mxu0 %v16856_v0 }
  0x90   :  { %3038 = vrot.lane.b32.xlu1 %v14281_v2, %s14175_s15  ;;  %12927 = vmatprep.subr.msk.mxu0 %vm103_vm1, %v14469_v23 }
  0x91   :  { %3036 = vrot.lane.b32.xlu0 %v14306_v6, %s14175_s15  ;;  %13645 = vmatpush3.msk.msra.mxu1 %vm103_vm1, %v14466_v22 }
  0x92   :  { %12928 = vmatpush1.msk.msra.mxu0 %vm103_vm1, %v14477_v24  ;;  %13647 = vmatmul.mubr.msk.f32.vlgmr.msra.gmra.mxu1 %vm99_vm2, %v12920_v15  ;;  %v708_v25 = vpop.permute.xlu1 %707  ;;  %v706_v26 = vpop.permute.xlu0 %705 }
  0x93   :  { %12929 = vmatmul.mubr.msk.f32.vlgmr.msra.gmra.mxu0 %vm99_vm2, %v12920_v15  ;;  %12932 = vmatprep.subr.msk.mxu0 %vm103_vm1, %v14306_v6  ;;  %v14512_v30 = vsel %vm719_vm4, %v706_v26, %v708_v25 }
  0x94   :  { %12935 = vmatprep.subr.msk.mxu1 %vm103_vm1, %v14289_v3  ;;  %3042 = vrot.lane.b32.xlu1 %v14276_v1, %s14175_s15 }
  0x95   :  { %3040 = vrot.lane.b32.xlu0 %v14289_v3, %s14175_s15  ;;  %12933 = vmatpush1.msk.msra.mxu0 %vm103_vm1, %v14294_v4 }
  0x96   :  { %12936 = vmatpush1.msk.msra.mxu1 %vm103_vm1, %v14281_v2  ;;  %553 = vmatprep.mubr.f32.mxu1 %v16856_v0  ;;  %v712_v28 = vpop.permute.xlu1 %711  ;;  %v710_v29 = vpop.permute.xlu0 %709 }
  0x97   :  { %482 = vmatprep.mubr.f32.mxu0 %v16856_v0  ;;  %12937 = vmatmul.mubr.msk.f32.vlgmr.msra.gmra.mxu1 %vm99_vm2, %v64_v27  ;;  %v14515_v31 = vsel %vm719_vm4, %v710_v29, %v712_v28  ;;  %v14522_v34 = vsel %vm719_vm4, %v708_v25, %v710_v29 }
  0x98   :  { %12938 = vmatprep.subr.msk.mxu0 %vm103_vm1, %v14302_v5  ;;  %12934 = vmatmul.mubr.msk.f32.vlgmr.msra.gmra.mxu0 %vm99_vm2, %v64_v27 }
  0x99   :  { %12939 = vmatpush1.msk.msra.mxu0 %vm103_vm1, %v14276_v1  ;;  %13649 = vmatprep.subr.mxu1 %v16856_v0 }
  0x9a   :  { %13650 = vmatpush3.msk.msra.mxu1 %vm103_vm1, %v14311_v7  ;;  %12944 = vmatprep.subr.msk.mxu0 %vm103_vm1, %v14512_v30  ;;  %v714_v32 = vpop.permute.xlu1 %713  ;;  %v704_v33 = vpop.permute.xlu0 %703 }
  0x9b   :  { %3044 = vrot.lane.b32.xlu1 %v14302_v5, %s14175_s15  ;;  %3034 = vrot.lane.b32.xlu0 %v14294_v4, %s14175_s15  ;;  %v720_v35 = vsel %vm719_vm4, %v704_v33, %v706_v26  ;;  %v14569_v44 = vsel %vm719_vm4, %v712_v28, %v714_v32 }
  0x9c   :  { %13651 = vmatprep.mubr.msk.f32.mxu1 %vm14174_vm3, %v16856_v0  ;;  %12947 = vmatprep.subr.msk.mxu1 %vm103_vm1, %v14515_v31 }
  0x9d   :  { %13652 = vmatmul.mubr.msk.f32.vlgmr.msra.gmra.mxu1 %vm99_vm2, %v64_v27  ;;  %624 = vmatprep.mubr.f32.mxu0 %v16856_v0 }
  0x9e   :  { %12948 = vmatpush1.msk.msra.mxu1 %vm103_vm1, %v14522_v34  ;;  %12940 = vmatmul.mubr.msk.f32.vlgmr.msra.gmra.mxu0 %vm99_vm2, %v64_v27  ;;  %v14538_v36 = vpop.permute.xlu1 %717  ;;  %v716_v37 = vpop.permute.xlu0 %715 }
  0x9f   :  { %3048 = vrot.lane.b32.xlu1 %v14319_v8, %s14175_s15  ;;  %3046 = vrot.lane.b32.xlu0 %v14311_v7, %s14175_s15  ;;  %v14548_v39 = vsel %vm719_vm4, %v714_v32, %v716_v37  ;;  %v14554_v40 = vsel %vm719_vm4, %v716_v37, %v14538_v36  ;;  %v12979_v37 = vld [vmem:[%s16838_s1 + $0x28] sm:$0x3f] }
  0xa0   :  { %12945 = vmatpush1.msk.msra.mxu0 %vm103_vm1, %v720_v35  ;;  %879 = vmatprep.mubr.f32.mxu1 %v16856_v0 }
  0xa1   :  { %13654 = vmatprep.subr.mxu1 %v16856_v0  ;;  %808 = vmatprep.mubr.f32.mxu0 %v16856_v0 }
  0xa2   :  { %12949 = vmatmul.mubr.msk.f32.vlgmr.msra.gmra.mxu1 %vm99_vm2, %v12943_v38  ;;  %12950 = vmatprep.subr.msk.mxu0 %vm103_vm1, %v14548_v39  ;;  %v1041_v41 = vpop.permute.xlu1 %1040  ;;  %v1039_v42 = vpop.permute.xlu0 %1038 }
  0xa3   :  { %3371 = vrot.lane.b32.xlu1 %v14281_v2, %s14176_s20  ;;  %3369 = vrot.lane.b32.xlu0 %v14306_v6, %s14176_s20  ;;  %v14566_v43 = vsel %vm1052_vm5, %v1039_v42, %v1041_v41 }
  0xa4   :  { %13655 = vmatpush3.msk.msra.mxu1 %vm103_vm1, %v14554_v40  ;;  %12946 = vmatmul.mubr.msk.f32.vlgmr.msra.gmra.mxu0 %vm99_vm2, %v12943_v38 }
  0xa5   :  { %12951 = vmatpush1.msk.msra.mxu0 %vm103_vm1, %v14569_v44  ;;  %13656 = vmatprep.mubr.msk.f32.mxu1 %vm14174_vm3, %v16856_v0 }
  0xa6   :  { %12956 = vmatprep.subr.msk.mxu0 %vm103_vm1, %v14566_v43  ;;  %v1045_v45 = vpop.permute.xlu1 %1044  ;;  %v1043_v46 = vpop.permute.xlu0 %1042  ;;  %13657 = vmatmul.mubr.msk.f32.vlgmr.msra.gmra.mxu1 %vm99_vm2, %v12943_v38 }
  0xa7   :  { %3375 = vrot.lane.b32.xlu1 %v14276_v1, %s14176_s20  ;;  %3373 = vrot.lane.b32.xlu0 %v14289_v3, %s14176_s20  ;;  %v14586_v47 = vsel %vm1052_vm5, %v1041_v41, %v1043_v46  ;;  %v14589_v48 = vsel %vm1052_vm5, %v1043_v46, %v1045_v45 }
  0xa8   :  { %12959 = vmatprep.subr.msk.mxu1 %vm103_vm1, %v14589_v48  ;;  %950 = vmatprep.mubr.f32.mxu0 %v16856_v0 }
  0xa9   :  { %12960 = vmatpush1.msk.msra.mxu1 %vm103_vm1, %v14586_v47  ;;  %12952 = vmatmul.mubr.msk.f32.vlgmr.msra.gmra.mxu0 %vm99_vm2, %v12943_v38 }
  0xaa   :  { %v1047_v49 = vpop.permute.xlu1 %1046  ;;  %v1037_v50 = vpop.permute.xlu0 %1036  ;;  %1212 = vmatprep.mubr.f32.mxu1 %v16856_v0  ;;  %13659 = vmatprep.subr.mxu1 %v16856_v0 }
  0xab   :  { %3377 = vrot.lane.b32.xlu1 %v14302_v5, %s14176_s20  ;;  %3367 = vrot.lane.b32.xlu0 %v14294_v4, %s14176_s20  ;;  %v1053_v52 = vsel %vm1052_vm5, %v1037_v50, %v1039_v42  ;;  %v14628_v57 = vsel %vm1052_vm5, %v1045_v45, %v1047_v49 }
  0xac   :  { %12957 = vmatpush1.msk.msra.mxu0 %vm103_vm1, %v1053_v52  ;;  %1141 = vmatprep.mubr.f32.mxu0 %v16856_v0 }
  0xad   :  { %12961 = vmatmul.mubr.msk.f32.vlgmr.msra.gmra.mxu1 %vm99_vm2, %v12955_v51  ;;  %12958 = vmatmul.mubr.msk.f32.vlgmr.msra.gmra.mxu0 %vm99_vm2, %v12955_v51 }
  0xae   :  { %v14611_v53 = vpop.permute.xlu1 %1050  ;;  %v1049_v54 = vpop.permute.xlu0 %1048  ;;  %13661 = vmatprep.mubr.msk.f32.mxu1 %vm14174_vm3, %v16856_v0  ;;  %1283 = vmatprep.mubr.f32.mxu0 %v16856_v0 }
  0xaf   :  { %3381 = vrot.lane.b32.xlu1 %v14319_v8, %s14176_s20  ;;  %3379 = vrot.lane.b32.xlu0 %v14311_v7, %s14176_s20  ;;  %v14622_v55 = vsel %vm1052_vm5, %v1049_v54, %v14611_v53  ;;  %v14625_v56 = vsel %vm1052_vm5, %v1047_v49, %v1049_v54 }
  0xb0   :  { %12962 = vmatprep.subr.msk.mxu0 %vm103_vm1, %v14625_v56  ;;  %13660 = vmatpush3.msk.msra.mxu1 %vm103_vm1, %v14622_v55 }
  0xb1   :  { %12963 = vmatpush1.msk.msra.mxu0 %vm103_vm1, %v14628_v57  ;;  %13662 = vmatmul.mubr.msk.f32.vlgmr.msra.gmra.mxu1 %vm99_vm2, %v12955_v51 }
  0xb2   :  { %v1374_v58 = vpop.permute.xlu1 %1373  ;;  %v1372_v59 = vpop.permute.xlu0 %1371  ;;  %12964 = vmatmul.mubr.msk.f32.vlgmr.msra.gmra.mxu0 %vm99_vm2, %v12955_v51  ;;  %1545 = vmatprep.mubr.f32.mxu1 %v16856_v0 }
  0xb3   :  { %3704 = vrot.lane.b32.xlu1 %v14281_v2, %s14177_s30  ;;  %3702 = vrot.lane.b32.xlu0 %v14306_v6, %s14177_s30  ;;  %v14644_v60 = vsel %vm1385_vm6, %v1372_v59, %v1374_v58 }
  0xb4   :  { %12968 = vmatprep.subr.msk.mxu0 %vm103_vm1, %v14644_v60  ;;  %1474 = vmatprep.mubr.f32.mxu0 %v16856_v0 }
  0xb6   :  { %v1378_v61 = vpop.permute.xlu1 %1377  ;;  %v1376_v62 = vpop.permute.xlu0 %1375 }
  0xb7   :  { %3708 = vrot.lane.b32.xlu1 %v14276_v1, %s14177_s30  ;;  %3706 = vrot.lane.b32.xlu0 %v14289_v3, %s14177_s30  ;;  %v14654_v63 = vsel %vm1385_vm6, %v1374_v58, %v1376_v62  ;;  %v14657_v9 = vsel %vm1385_vm6, %v1376_v62, %v1378_v61 }
  0xb8   :  { %12971 = vmatprep.subr.msk.mxu1 %vm103_vm1, %v14657_v9 }
  0xb9   :  { %12972 = vmatpush1.msk.msra.mxu1 %vm103_vm1, %v14654_v63 }
  0xba   :  { %v1380_v11 = vpop.permute.xlu1 %1379  ;;  %v1370_v12 = vpop.permute.xlu0 %1369  ;;  %13664 = vmatprep.subr.mxu1 %v16856_v0  ;;  %12973 = vmatmul.mubr.msk.f32.vlgmr.msra.gmra.mxu1 %vm99_vm2, %v12967_v10 }
  0xbb   :  { %3710 = vrot.lane.b32.xlu1 %v14302_v5, %s14177_s30  ;;  %3700 = vrot.lane.b32.xlu0 %v14294_v4, %s14177_s30  ;;  %v1386_v15 = vsel %vm1385_vm6, %v1370_v12, %v1372_v59  ;;  %v14692_v25 = vsel %vm1385_vm6, %v1378_v61, %v1380_v11 }
  0xbc   :  { %12969 = vmatpush1.msk.msra.mxu0 %vm103_vm1, %v1386_v15  ;;  %13666 = vmatprep.mubr.msk.f32.mxu1 %vm14174_vm3, %v16856_v0 }
  0xbd   :  { %12970 = vmatmul.mubr.msk.f32.vlgmr.msra.gmra.mxu0 %vm99_vm2, %v12967_v10 }
  0xbe   :  { %v14677_v16 = vpop.permute.xlu1 %1383  ;;  %v1382_v17 = vpop.permute.xlu0 %1381  ;;  %1616 = vmatprep.mubr.f32.mxu0 %v16856_v0 }
  0xbf   :  { %3714 = vrot.lane.b32.xlu1 %v14319_v8, %s14177_s30  ;;  %3712 = vrot.lane.b32.xlu0 %v14311_v7, %s14177_s30  ;;  %v14686_v19 = vsel %vm1385_vm6, %v1382_v17, %v14677_v16  ;;  %v14689_v21 = vsel %vm1385_vm6, %v1380_v11, %v1382_v17  ;;  %v12991_v11 = vld [vmem:[%s16838_s1 + $0x30] sm:$0x3f] }
  0xc0   :  { %12974 = vmatprep.subr.msk.mxu0 %vm103_vm1, %v14689_v21  ;;  %13665 = vmatpush3.msk.msra.mxu1 %vm103_vm1, %v14686_v19 }
  0xc1   :  { %12975 = vmatpush1.msk.msra.mxu0 %vm103_vm1, %v14692_v25  ;;  %13667 = vmatmul.mubr.msk.f32.vlgmr.msra.gmra.mxu1 %vm99_vm2, %v12967_v10 }
  0xc2   :  { %v1707_v26 = vpop.permute.xlu1 %1706  ;;  %v1705_v27 = vpop.permute.xlu0 %1704  ;;  %12976 = vmatmul.mubr.msk.f32.vlgmr.msra.gmra.mxu0 %vm99_vm2, %v12967_v10  ;;  %1878 = vmatprep.mubr.f32.mxu1 %v16856_v0 }
  0xc3   :  { %4037 = vrot.lane.b32.xlu1 %v14281_v2, %s14178_s17  ;;  %4035 = vrot.lane.b32.xlu0 %v14306_v6, %s14178_s17  ;;  %v1720_v28 = vsel %vm1718_vm7, %v1705_v27, %v1707_v26 }
  0xc4   :  { %12980 = vmatprep.subr.msk.mxu0 %vm103_vm1, %v1720_v28  ;;  %1807 = vmatprep.mubr.f32.mxu0 %v16856_v0 }
  0xc6   :  { %v1711_v29 = vpop.permute.xlu1 %1710  ;;  %v1709_v32 = vpop.permute.xlu0 %1708 }
  0xc7   :  { %4041 = vrot.lane.b32.xlu1 %v14276_v1, %s14178_s17  ;;  %4039 = vrot.lane.b32.xlu0 %v14289_v3, %s14178_s17  ;;  %v1721_v33 = vsel %vm1718_vm7, %v1707_v26, %v1709_v32  ;;  %v1722_v35 = vsel %vm1718_vm7, %v1709_v32, %v1711_v29 }
  0xc8   :  { %12983 = vmatprep.subr.msk.mxu1 %vm103_vm1, %v1722_v35 }
  0xc9   :  { %12984 = vmatpush1.msk.msra.mxu1 %vm103_vm1, %v1721_v33 }
  0xca   :  { %v1713_v38 = vpop.permute.xlu1 %1712  ;;  %v1703_v41 = vpop.permute.xlu0 %1702  ;;  %13669 = vmatprep.subr.mxu1 %v16856_v0  ;;  %12985 = vmatmul.mubr.msk.f32.vlgmr.msra.gmra.mxu1 %vm99_vm2, %v12979_v37 }
  0xcb   :  { %4043 = vrot.lane.b32.xlu1 %v14302_v5, %s14178_s17  ;;  %4033 = vrot.lane.b32.xlu0 %v14294_v4, %s14178_s17  ;;  %v1719_v42 = vsel %vm1718_vm7, %v1703_v41, %v1705_v27  ;;  %v1723_v51 = vsel %vm1718_vm7, %v1711_v29, %v1713_v38 }
  0xcc   :  { %12981 = vmatpush1.msk.msra.mxu0 %vm103_vm1, %v1719_v42  ;;  %13671 = vmatprep.mubr.msk.f32.mxu1 %vm14174_vm3, %v16856_v0 }
  0xcd   :  { %12982 = vmatmul.mubr.msk.f32.vlgmr.msra.gmra.mxu0 %vm99_vm2, %v12979_v37 }
  0xce   :  { %v1717_v45 = vpop.permute.xlu1 %1716  ;;  %v1715_v46 = vpop.permute.xlu0 %1714  ;;  %1949 = vmatprep.mubr.f32.mxu0 %v16856_v0 }
  0xcf   :  { %4047 = vrot.lane.b32.xlu1 %v14319_v8, %s14178_s17  ;;  %4045 = vrot.lane.b32.xlu0 %v14311_v7, %s14178_s17  ;;  %v1725_v49 = vsel %vm1718_vm7, %v1715_v46, %v1717_v45  ;;  %v1724_v50 = vsel %vm1718_vm7, %v1713_v38, %v1715_v46  ;;  %v13003_v46 = vld [vmem:[%s16838_s1 + $0x38] sm:$0x3f] }
  0xd0   :  { %12986 = vmatprep.subr.msk.mxu0 %vm103_vm1, %v1724_v50  ;;  %13670 = vmatpush3.msk.msra.mxu1 %vm103_vm1, %v1725_v49 }
  0xd1   :  { %12987 = vmatpush1.msk.msra.mxu0 %vm103_vm1, %v1723_v51  ;;  %13672 = vmatmul.mubr.msk.f32.vlgmr.msra.gmra.mxu1 %vm99_vm2, %v12979_v37 }
  0xd2   :  { %v2040_v52 = vpop.permute.xlu1 %2039  ;;  %v2038_v54 = vpop.permute.xlu0 %2037  ;;  %12988 = vmatmul.mubr.msk.f32.vlgmr.msra.gmra.mxu0 %vm99_vm2, %v12979_v37  ;;  %2211 = vmatprep.mubr.f32.mxu1 %v16856_v0 }
  0xd3   :  { %4370 = vrot.lane.b32.xlu1 %v14281_v2, %s14179_s21  ;;  %4368 = vrot.lane.b32.xlu0 %v14306_v6, %s14179_s21  ;;  %v2053_v58 = vsel %vm2051_vm8, %v2038_v54, %v2040_v52 }
  0xd4   :  { %12992 = vmatprep.subr.msk.mxu0 %vm103_vm1, %v2053_v58  ;;  %2140 = vmatprep.mubr.f32.mxu0 %v16856_v0 }
  0xd6   :  { %v2044_v59 = vpop.permute.xlu1 %2043  ;;  %v2042_v61 = vpop.permute.xlu0 %2041 }
  0xd7   :  { %4374 = vrot.lane.b32.xlu1 %v14276_v1, %s14179_s21  ;;  %4372 = vrot.lane.b32.xlu0 %v14289_v3, %s14179_s21  ;;  %v2054_v62 = vsel %vm2051_vm8, %v2040_v52, %v2042_v61  ;;  %v2055_v10 = vsel %vm2051_vm8, %v2042_v61, %v2044_v59 }
  0xd8   :  { %12995 = vmatprep.subr.msk.mxu1 %vm103_vm1, %v2055_v10 }
  0xd9   :  { %12996 = vmatpush1.msk.msra.mxu1 %vm103_vm1, %v2054_v62 }
  0xda   :  { %v2046_v12 = vpop.permute.xlu1 %2045  ;;  %v2036_v15 = vpop.permute.xlu0 %2035  ;;  %13674 = vmatprep.subr.mxu1 %v16856_v0  ;;  %12997 = vmatmul.mubr.msk.f32.vlgmr.msra.gmra.mxu1 %vm99_vm2, %v12991_v11 }
  0xdb   :  { %4376 = vrot.lane.b32.xlu1 %v14302_v5, %s14179_s21  ;;  %4366 = vrot.lane.b32.xlu0 %v14294_v4, %s14179_s21  ;;  %v2052_v17 = vsel %vm2051_vm8, %v2036_v15, %v2038_v54  ;;  %v2056_v32 = vsel %vm2051_vm8, %v2044_v59, %v2046_v12 }
  0xdc   :  { %12993 = vmatpush1.msk.msra.mxu0 %vm103_vm1, %v2052_v17  ;;  %13676 = vmatprep.mubr.msk.f32.mxu1 %vm14174_vm3, %v16856_v0 }
  0xdd   :  { %12994 = vmatmul.mubr.msk.f32.vlgmr.msra.gmra.mxu0 %vm99_vm2, %v12991_v11 }
  0xde   :  { %v2050_v26 = vpop.permute.xlu1 %2049  ;;  %v2048_v27 = vpop.permute.xlu0 %2047  ;;  %2282 = vmatprep.mubr.f32.mxu0 %v16856_v0 }
  0xdf   :  { %4380 = vrot.lane.b32.xlu1 %v14319_v8, %s14179_s21  ;;  %4378 = vrot.lane.b32.xlu0 %v14311_v7, %s14179_s21  ;;  %v2058_v28 = vsel %vm2051_vm8, %v2048_v27, %v2050_v26  ;;  %v2057_v29 = vsel %vm2051_vm8, %v2046_v12, %v2048_v27  ;;  %v13015_v27 = vld [vmem:[%s16838_s1 + $0x40] sm:$0x3f] }
  0xe0   :  { %12998 = vmatprep.subr.msk.mxu0 %vm103_vm1, %v2057_v29  ;;  %13675 = vmatpush3.msk.msra.mxu1 %vm103_vm1, %v2058_v28 }
  0xe1   :  { %12999 = vmatpush1.msk.msra.mxu0 %vm103_vm1, %v2056_v32  ;;  %13677 = vmatmul.mubr.msk.f32.vlgmr.msra.gmra.mxu1 %vm99_vm2, %v12991_v11 }
  0xe2   :  { %v2373_v33 = vpop.permute.xlu1 %2372  ;;  %v2371_v35 = vpop.permute.xlu0 %2370  ;;  %13000 = vmatmul.mubr.msk.f32.vlgmr.msra.gmra.mxu0 %vm99_vm2, %v12991_v11  ;;  %2544 = vmatprep.mubr.f32.mxu1 %v16856_v0 }
  0xe3   :  { %4703 = vrot.lane.b32.xlu1 %v14281_v2, %s16851_s16  ;;  %4701 = vrot.lane.b32.xlu0 %v14306_v6, %s16851_s16  ;;  %v2386_v37 = vsel %vm2384_vm9, %v2371_v35, %v2373_v33 }
  0xe4   :  { %13004 = vmatprep.subr.msk.mxu0 %vm103_vm1, %v2386_v37  ;;  %2473 = vmatprep.mubr.f32.mxu0 %v16856_v0 }
  0xe6   :  { %v2377_v38 = vpop.permute.xlu1 %2376  ;;  %v2375_v41 = vpop.permute.xlu0 %2374 }
  0xe7   :  { %4707 = vrot.lane.b32.xlu1 %v14276_v1, %s16851_s16  ;;  %4705 = vrot.lane.b32.xlu0 %v14289_v3, %s16851_s16  ;;  %v2387_v42 = vsel %vm2384_vm9, %v2373_v33, %v2375_v41  ;;  %v2388_v45 = vsel %vm2384_vm9, %v2375_v41, %v2377_v38 }
  0xe8   :  { %13007 = vmatprep.subr.msk.mxu1 %vm103_vm1, %v2388_v45 }
  0xe9   :  { %13008 = vmatpush1.msk.msra.mxu1 %vm103_vm1, %v2387_v42 }
  0xea   :  { %v2379_v49 = vpop.permute.xlu1 %2378  ;;  %v2369_v50 = vpop.permute.xlu0 %2368  ;;  %13679 = vmatprep.subr.mxu1 %v16856_v0  ;;  %13009 = vmatmul.mubr.msk.f32.vlgmr.msra.gmra.mxu1 %vm99_vm2, %v13003_v46 }
  0xeb   :  { %4709 = vrot.lane.b32.xlu1 %v14302_v5, %s16851_s16  ;;  %4699 = vrot.lane.b32.xlu0 %v14294_v4, %s16851_s16  ;;  %v2385_v51 = vsel %vm2384_vm9, %v2369_v50, %v2371_v35  ;;  %v2389_v61 = vsel %vm2384_vm9, %v2377_v38, %v2379_v49 }
  0xec   :  { %13005 = vmatpush1.msk.msra.mxu0 %vm103_vm1, %v2385_v51  ;;  %13681 = vmatprep.mubr.msk.f32.mxu1 %vm14174_vm3, %v16856_v0 }
  0xed   :  { %13006 = vmatmul.mubr.msk.f32.vlgmr.msra.gmra.mxu0 %vm99_vm2, %v13003_v46 }
  0xee   :  { %v2383_v52 = vpop.permute.xlu1 %2382  ;;  %v2381_v54 = vpop.permute.xlu0 %2380  ;;  %2615 = vmatprep.mubr.f32.mxu0 %v16856_v0 }
  0xef   :  { %4713 = vrot.lane.b32.xlu1 %v14319_v8, %s16851_s16  ;;  %4711 = vrot.lane.b32.xlu0 %v14311_v7, %s16851_s16  ;;  %v2391_v58 = vsel %vm2384_vm9, %v2381_v54, %v2383_v52  ;;  %v2390_v59 = vsel %vm2384_vm9, %v2379_v49, %v2381_v54  ;;  %v13027_v54 = vld [vmem:[%s16838_s1 + $0x48] sm:$0x3f] }
  0xf0   :  { %13010 = vmatprep.subr.msk.mxu0 %vm103_vm1, %v2390_v59  ;;  %13680 = vmatpush3.msk.msra.mxu1 %vm103_vm1, %v2391_v58 }
  0xf1   :  { %13011 = vmatpush1.msk.msra.mxu0 %vm103_vm1, %v2389_v61  ;;  %13682 = vmatmul.mubr.msk.f32.vlgmr.msra.gmra.mxu1 %vm99_vm2, %v13003_v46 }
  0xf2   :  { %v2706_v62 = vpop.permute.xlu1 %2705  ;;  %v2704_v10 = vpop.permute.xlu0 %2703  ;;  %13012 = vmatmul.mubr.msk.f32.vlgmr.msra.gmra.mxu0 %vm99_vm2, %v13003_v46  ;;  %2877 = vmatprep.mubr.f32.mxu1 %v16856_v0 }
  0xf3   :  { %5036 = vrot.lane.b32.xlu1 %v14281_v2, %s14181_s22  ;;  %5034 = vrot.lane.b32.xlu0 %v14306_v6, %s14181_s22  ;;  %v2719_v11 = vsel %vm2717_vm10, %v2704_v10, %v2706_v62 }
  0xf4   :  { %13016 = vmatprep.subr.msk.mxu0 %vm103_vm1, %v2719_v11  ;;  %2806 = vmatprep.mubr.f32.mxu0 %v16856_v0 }
  0xf6   :  { %v2710_v12 = vpop.permute.xlu1 %2709  ;;  %v2708_v15 = vpop.permute.xlu0 %2707 }
  0xf7   :  { %5040 = vrot.lane.b32.xlu1 %v14276_v1, %s14181_s22  ;;  %5038 = vrot.lane.b32.xlu0 %v14289_v3, %s14181_s22  ;;  %v2720_v17 = vsel %vm2717_vm10, %v2706_v62, %v2708_v15  ;;  %v2721_v26 = vsel %vm2717_vm10, %v2708_v15, %v2710_v12 }
  0xf8   :  { %13019 = vmatprep.subr.msk.mxu1 %vm103_vm1, %v2721_v26 }
  0xf9   :  { %13020 = vmatpush1.msk.msra.mxu1 %vm103_vm1, %v2720_v17 }
  0xfa   :  { %v2712_v28 = vpop.permute.xlu1 %2711  ;;  %13684 = vmatprep.subr.mxu1 %v16856_v0  ;;  %13021 = vmatmul.mubr.msk.f32.vlgmr.msra.gmra.mxu1 %vm99_vm2, %v13015_v27 }
  0xfb   :  { %5042 = vrot.lane.b32.xlu1 %v14302_v5, %s14181_s22  ;;  %5032 = vrot.lane.b32.xlu0 %v14294_v4, %s14181_s22  ;;  %v2702_v29 = vpop.permute.xlu0 %2701  ;;  %v2722_v41 = vsel %vm2717_vm10, %v2710_v12, %v2712_v28 }
  0xfc   :  { %v2718_v32 = vsel %vm2717_vm10, %v2702_v29, %v2704_v10  ;;  %13686 = vmatprep.mubr.msk.f32.mxu1 %vm14174_vm3, %v16856_v0 }
  0xfd   :  { %13017 = vmatpush1.msk.msra.mxu0 %vm103_vm1, %v2718_v32 }
  0xfe   :  { %v2716_v33 = vpop.permute.xlu1 %2715  ;;  %13018 = vmatmul.mubr.msk.f32.vlgmr.msra.gmra.mxu0 %vm99_vm2, %v13015_v27 }
  0xff   :  { %5046 = vrot.lane.b32.xlu1 %v14319_v8, %s14181_s22  ;;  %5044 = vrot.lane.b32.xlu0 %v14311_v7, %s14181_s22  ;;  %v2714_v35 = vpop.permute.xlu0 %2713  ;;  %s14197_s22 = smov [#allocation5]  }
 0x100   :  { %v2724_v37 = vsel %vm2717_vm10, %v2714_v35, %v2716_v33  ;;  %v2723_v38 = vsel %vm2717_vm10, %v2712_v28, %v2714_v35  ;;  %2948 = vmatprep.mubr.f32.mxu0 %v16856_v0 }
 0x101   :  { %13022 = vmatprep.subr.msk.mxu0 %vm103_vm1, %v2723_v38  ;;  %13685 = vmatpush3.msk.msra.mxu1 %vm103_vm1, %v2724_v37 }
 0x102   :  { %13023 = vmatpush1.msk.msra.mxu0 %vm103_vm1, %v2722_v41  ;;  %v3039_v42 = vpop.permute.xlu1 %3038  ;;  %13687 = vmatmul.mubr.msk.f32.vlgmr.msra.gmra.mxu1 %vm99_vm2, %v13015_v27 }
 0x103   :  { %5369 = vrot.lane.b32.xlu1 %v14281_v2, %s14182_s3  ;;  %5367 = vrot.lane.b32.xlu0 %v14306_v6, %s14182_s3  ;;  %v3037_v45 = vpop.permute.xlu0 %3036 }
 0x104   :  { %v3052_v46 = vsel %vm3050_vm11, %v3037_v45, %v3039_v42  ;;  %13024 = vmatmul.mubr.msk.f32.vlgmr.msra.gmra.mxu0 %vm99_vm2, %v13015_v27  ;;  %3210 = vmatprep.mubr.f32.mxu1 %v16856_v0 }
 0x105   :  { %13028 = vmatprep.subr.msk.mxu0 %vm103_vm1, %v3052_v46  ;;  %3139 = vmatprep.mubr.f32.mxu0 %v16856_v0 }
 0x106   :  { %v3043_v49 = vpop.permute.xlu1 %3042 }
 0x107   :  { %5373 = vrot.lane.b32.xlu1 %v14276_v1, %s14182_s3  ;;  %5371 = vrot.lane.b32.xlu0 %v14289_v3, %s14182_s3  ;;  %v3041_v50 = vpop.permute.xlu0 %3040 }
 0x108   :  { %v3053_v51 = vsel %vm3050_vm11, %v3039_v42, %v3041_v50  ;;  %v3054_v52 = vsel %vm3050_vm11, %v3041_v50, %v3043_v49 }
 0x109   :  { %13031 = vmatprep.subr.msk.mxu1 %vm103_vm1, %v3054_v52 }
 0x10a   :  { %13032 = vmatpush1.msk.msra.mxu1 %vm103_vm1, %v3053_v51 }
 0x10b   :  { %5375 = vrot.lane.b32.xlu1 %v14302_v5, %s14182_s3  ;;  %5365 = vrot.lane.b32.xlu0 %v14294_v4, %s14182_s3 }
 0x10c   :  { %13689 = vmatprep.subr.mxu1 %v16856_v0  ;;  %13033 = vmatmul.mubr.msk.f32.vlgmr.msra.gmra.mxu1 %vm99_vm2, %v13027_v54 }
 0x10d   :  { %v3045_v58 = vpop.permute.xlu1 %3044  ;;  %v3035_v59 = vpop.permute.xlu0 %3034  ;;  %13691 = vmatprep.mubr.msk.f32.mxu1 %vm14174_vm3, %v16856_v0 }
 0x10e   :  { %v3051_v61 = vsel %vm3050_vm11, %v3035_v59, %v3037_v45  ;;  %v3055_v15 = vsel %vm3050_vm11, %v3043_v49, %v3045_v58  ;;  %v14115_v59 = vld [vmem:[%s16837_s0] sm:$0x77] }
 0x10f   :  { %5379 = vrot.lane.b32.xlu1 %v14319_v8, %s14182_s3  ;;  %5377 = vrot.lane.b32.xlu0 %v14311_v7, %s14182_s3 }
 0x110   :  { %13029 = vmatpush1.msk.msra.mxu0 %vm103_vm1, %v3051_v61  ;;  %v13051_v61 = vld [vmem:[%s16838_s1 + $0x58] sm:$0x3f] }
 0x111   :  { %v3049_v62 = vpop.permute.xlu1 %3048  ;;  %v3047_v10 = vpop.permute.xlu0 %3046  ;;  %13030 = vmatmul.mubr.msk.f32.vlgmr.msra.gmra.mxu0 %vm99_vm2, %v13027_v54 }
 0x112   :  { %v3057_v11 = vsel %vm3050_vm11, %v3047_v10, %v3049_v62  ;;  %v3056_v12 = vsel %vm3050_vm11, %v3045_v58, %v3047_v10  ;;  %3281 = vmatprep.mubr.f32.mxu0 %v16856_v0 }
 0x113   :  { %5702 = vrot.lane.b32.xlu1 %v14281_v2, %s14183_s18  ;;  %5700 = vrot.lane.b32.xlu0 %v14306_v6, %s14183_s18 }
 0x114   :  { %13034 = vmatprep.subr.msk.mxu0 %vm103_vm1, %v3056_v12  ;;  %13690 = vmatpush3.msk.msra.mxu1 %vm103_vm1, %v3057_v11  ;;  %v14982_v12 = vld [vmem:[%s16837_s0 + $0x18] sm:$0x77] }
 0x115   :  { %13035 = vmatpush1.msk.msra.mxu0 %vm103_vm1, %v3055_v15  ;;  %v3372_v17 = vpop.permute.xlu1 %3371  ;;  %v3370_v26 = vpop.permute.xlu0 %3369  ;;  %13692 = vmatmul.mubr.msk.f32.vlgmr.msra.gmra.mxu1 %vm99_vm2, %v13027_v54 }
 0x116   :  { %v3385_v27 = vsel %vm16854_vm12, %v3370_v26, %v3372_v17  ;;  %13036 = vmatmul.mubr.msk.f32.vlgmr.msra.gmra.mxu0 %vm99_vm2, %v13027_v54  ;;  %3543 = vmatprep.mubr.f32.mxu1 %v16856_v0 }
 0x117   :  { %5706 = vrot.lane.b32.xlu1 %v14276_v1, %s14183_s18  ;;  %5704 = vrot.lane.b32.xlu0 %v14289_v3, %s14183_s18  ;;  %v13039_v1 = vld [vmem:[%s16838_s1 + $0x50] sm:$0x3f] }
 0x118   :  { %13040 = vmatprep.subr.msk.mxu0 %vm103_vm1, %v3385_v27  ;;  %3472 = vmatprep.mubr.f32.mxu0 %v16856_v0 }
 0x119   :  { %v3376_v28 = vpop.permute.xlu1 %3375  ;;  %v3374_v29 = vpop.permute.xlu0 %3373 }
 0x11a   :  { %v3386_v32 = vsel %vm16854_vm12, %v3372_v17, %v3374_v29  ;;  %v3387_v33 = vsel %vm16854_vm12, %v3374_v29, %v3376_v28 }
 0x11b   :  { %5708 = vrot.lane.b32.xlu1 %v14302_v5, %s14183_s18  ;;  %5698 = vrot.lane.b32.xlu0 %v14294_v4, %s14183_s18 }
 0x11c   :  { %13043 = vmatprep.subr.msk.mxu1 %vm103_vm1, %v3387_v33 }
 0x11d   :  { %13044 = vmatpush1.msk.msra.mxu1 %vm103_vm1, %v3386_v32  ;;  %v3378_v35 = vpop.permute.xlu1 %3377  ;;  %v3368_v37 = vpop.permute.xlu0 %3367 }
 0x11e   :  { %v3384_v38 = vsel %vm16854_vm12, %v3368_v37, %v3370_v26  ;;  %13694 = vmatprep.subr.mxu1 %v16856_v0  ;;  %13045 = vmatmul.mubr.msk.f32.vlgmr.msra.gmra.mxu1 %vm99_vm2, %v13039_v1 }
 0x11f   :  { %5712 = vrot.lane.b32.xlu1 %v14319_v8, %s14183_s18  ;;  %5710 = vrot.lane.b32.xlu0 %v14311_v7, %s14183_s18  ;;  %v3388_v7 = vsel %vm16854_vm12, %v3376_v28, %v3378_v35  ;;  %v14996_v28 = vld [vmem:[%s16837_s0 + $0x8] sm:$0x77] }
 0x120   :  { %13041 = vmatpush1.msk.msra.mxu0 %vm103_vm1, %v3384_v38  ;;  %13696 = vmatprep.mubr.msk.f32.mxu1 %vm14174_vm3, %v16856_v0 }
 0x121   :  { %v3382_v4 = vpop.permute.xlu1 %3381  ;;  %v3380_v41 = vpop.permute.xlu0 %3379  ;;  %13042 = vmatmul.mubr.msk.f32.vlgmr.msra.gmra.mxu0 %vm99_vm2, %v13039_v1 }
 0x122   :  { %v3390_v42 = vsel %vm16854_vm12, %v3380_v41, %v3382_v4  ;;  %v3389_v45 = vsel %vm16854_vm12, %v3378_v35, %v3380_v41  ;;  %3614 = vmatprep.mubr.f32.mxu0 %v16856_v0  ;;  %v13063_v41 = vld [vmem:[%s16838_s1 + $0x60] sm:$0x3f]  ;;  %vm5048_vm12 = vcmask 261120  }
 0x123   :  { %6035 = vrot.lane.b32.xlu1 %v14281_v2, %s14184_s14  ;;  %6033 = vrot.lane.b32.xlu0 %v14306_v6, %s14184_s14  ;;  %v14953_v2 = vld [vmem:[%s16837_s0 + $0x10] sm:$0x77] }
 0x124   :  { %13046 = vmatprep.subr.msk.mxu0 %vm103_vm1, %v3389_v45  ;;  %13695 = vmatpush3.msk.msra.mxu1 %vm103_vm1, %v3390_v42 }
 0x125   :  { %13047 = vmatpush1.msk.msra.mxu0 %vm103_vm1, %v3388_v7  ;;  %v3705_v46 = vpop.permute.xlu1 %3704  ;;  %v3703_v49 = vpop.permute.xlu0 %3702  ;;  %13697 = vmatmul.mubr.msk.f32.vlgmr.msra.gmra.mxu1 %vm99_vm2, %v13039_v1 }
 0x126   :  { %v3718_v50 = vsel %vm3716_vm13, %v3703_v49, %v3705_v46  ;;  %13048 = vmatmul.mubr.msk.f32.vlgmr.msra.gmra.mxu0 %vm99_vm2, %v13039_v1  ;;  %3876 = vmatprep.mubr.f32.mxu1 %v16856_v0 }
 0x127   :  { %6039 = vrot.lane.b32.xlu1 %v14953_v2, %s14184_s14  ;;  %6037 = vrot.lane.b32.xlu0 %v14289_v3, %s14184_s14 }
 0x128   :  { %13052 = vmatprep.subr.msk.mxu0 %vm103_vm1, %v3718_v50  ;;  %3805 = vmatprep.mubr.f32.mxu0 %v16856_v0 }
 0x129   :  { %v3709_v51 = vpop.permute.xlu1 %3708  ;;  %v3707_v52 = vpop.permute.xlu0 %3706 }
 0x12a   :  { %v3719_v54 = vsel %vm3716_vm13, %v3705_v46, %v3707_v52  ;;  %v3720_v58 = vsel %vm3716_vm13, %v3707_v52, %v3709_v51  ;;  %v63_v46 = vld [vmem:[%s16837_s0 + $0x20] sm:$0x7]  ;;  %s14189_s0 = smov 110  }
 0x12b   :  { %6041 = vrot.lane.b32.xlu1 %v14302_v5, %s14184_s14  ;;  %6031 = vrot.lane.b32.xlu0 %v14115_v59, %s14184_s14 }
 0x12c   :  { %13055 = vmatprep.subr.msk.mxu1 %vm103_vm1, %v3720_v58 }
 0x12d   :  { %13056 = vmatpush1.msk.msra.mxu1 %vm103_vm1, %v3719_v54  ;;  %v3711_v62 = vpop.permute.xlu1 %3710  ;;  %v3701_v10 = vpop.permute.xlu0 %3700 }
 0x12e   :  { %13057 = vmatmul.mubr.msk.f32.vlgmr.msra.gmra.mxu1 %vm99_vm2, %v13051_v61  ;;  %v3717_v11 = vsel %vm3716_vm13, %v3701_v10, %v3703_v49  ;;  %13699 = vmatprep.subr.mxu1 %v16856_v0  ;;  %v3721_v29 = vsel %vm3716_vm13, %v3709_v51, %v3711_v62 }
 0x12f   :  { %6045 = vrot.lane.b32.xlu1 %v14319_v8, %s14184_s14  ;;  %6043 = vrot.lane.b32.xlu0 %v14982_v12, %s14184_s14  ;;  %s14185_s14 = smov 28  }
 0x130   :  { %13053 = vmatpush1.msk.msra.mxu0 %vm103_vm1, %v3717_v11  ;;  %13701 = vmatprep.mubr.msk.f32.mxu1 %vm14174_vm3, %v16856_v0 }
 0x131   :  { %13054 = vmatmul.mubr.msk.f32.vlgmr.msra.gmra.mxu0 %vm99_vm2, %v13051_v61  ;;  %v3715_v15 = vpop.permute.xlu1 %3714  ;;  %v3713_v17 = vpop.permute.xlu0 %3712 }
 0x132   :  { %v3723_v26 = vsel %vm3716_vm13, %v3713_v17, %v3715_v15  ;;  %v3722_v27 = vsel %vm3716_vm13, %v3711_v62, %v3713_v17  ;;  %3947 = vmatprep.mubr.f32.mxu0 %v16856_v0  ;;  %v13075_v17 = vld [vmem:[%s16838_s1 + $0x68] sm:$0x3f] }
 0x133   :  { %6368 = vrot.lane.b32.xlu1 %v14996_v28, %s14185_s14  ;;  %6366 = vrot.lane.b32.xlu0 %v14306_v6, %s14185_s14 }
 0x134   :  { %13058 = vmatprep.subr.msk.mxu0 %vm103_vm1, %v3722_v27  ;;  %13700 = vmatpush3.msk.msra.mxu1 %vm103_vm1, %v3723_v26 }
 0x135   :  { %13059 = vmatpush1.msk.msra.mxu0 %vm103_vm1, %v3721_v29  ;;  %13702 = vmatmul.mubr.msk.f32.vlgmr.msra.gmra.mxu1 %vm99_vm2, %v13051_v61  ;;  %v4038_v32 = vpop.permute.xlu1 %4037  ;;  %v4036_v33 = vpop.permute.xlu0 %4035 }
 0x136   :  { %13060 = vmatmul.mubr.msk.f32.vlgmr.msra.gmra.mxu0 %vm99_vm2, %v13051_v61  ;;  %v4051_v1 = vsel %vm16853_vm14, %v4036_v33, %v4038_v32  ;;  %4209 = vmatprep.mubr.f32.mxu1 %v16856_v0 }
 0x137   :  { %6372 = vrot.lane.b32.xlu1 %v14953_v2, %s14185_s14  ;;  %6370 = vrot.lane.b32.xlu0 %v14289_v3, %s14185_s14 }
 0x138   :  { %13064 = vmatprep.subr.msk.mxu0 %vm103_vm1, %v4051_v1  ;;  %4138 = vmatprep.mubr.f32.mxu0 %v16856_v0 }
 0x139   :  { %v4042_v35 = vpop.permute.xlu1 %4041  ;;  %v4040_v37 = vpop.permute.xlu0 %4039 }
 0x13a   :  { %v4052_v38 = vsel %vm16853_vm14, %v4038_v32, %v4040_v37  ;;  %v4053_v4 = vsel %vm16853_vm14, %v4040_v37, %v4042_v35 }
 0x13b   :  { %6374 = vrot.lane.b32.xlu1 %v14302_v5, %s14185_s14  ;;  %6364 = vrot.lane.b32.xlu0 %v14115_v59, %s14185_s14 }
 0x13c   :  { %13067 = vmatprep.subr.msk.mxu1 %vm103_vm1, %v4053_v4 }
 0x13d   :  { %13068 = vmatpush1.msk.msra.mxu1 %vm103_vm1, %v4052_v38  ;;  %v4044_v42 = vpop.permute.xlu1 %4043  ;;  %v4034_v45 = vpop.permute.xlu0 %4033 }
 0x13e   :  { %13069 = vmatmul.mubr.msk.f32.vlgmr.msra.gmra.mxu1 %vm99_vm2, %v13063_v41  ;;  %v4050_v7 = vsel %vm16853_vm14, %v4034_v45, %v4036_v33  ;;  %13704 = vmatprep.subr.mxu1 %v16856_v0  ;;  %v4054_v54 = vsel %vm16853_vm14, %v4042_v35, %v4044_v42 }
 0x13f   :  { %6378 = vrot.lane.b32.xlu1 %v14319_v8, %s14185_s14  ;;  %6376 = vrot.lane.b32.xlu0 %v14982_v12, %s14185_s14  ;;  %s16887_s14 = smov 60  }
 0x140   :  { %13065 = vmatpush1.msk.msra.mxu0 %vm103_vm1, %v4050_v7  ;;  %13706 = vmatprep.mubr.msk.f32.mxu1 %vm14174_vm3, %v16856_v0 }
 0x141   :  { %13066 = vmatmul.mubr.msk.f32.vlgmr.msra.gmra.mxu0 %vm99_vm2, %v13063_v41  ;;  %v4048_v49 = vpop.permute.xlu1 %4047  ;;  %v4046_v50 = vpop.permute.xlu0 %4045 }
 0x142   :  { %v4056_v51 = vsel %vm16853_vm14, %v4046_v50, %v4048_v49  ;;  %v4055_v52 = vsel %vm16853_vm14, %v4044_v42, %v4046_v50  ;;  %4280 = vmatprep.mubr.f32.mxu0 %v16856_v0  ;;  %vm16855_vm14 = vcmask 490496  }
 0x143   :  { %7295 = vrot.lane.b32.xlu1 %v63_v46, %s14167_s23  ;;  %6995 = vrot.lane.b32.xlu0 %v63_v46, %s14166_s19 }
 0x144   :  { %13070 = vmatprep.subr.msk.mxu0 %vm103_vm1, %v4055_v52  ;;  %13705 = vmatpush3.msk.msra.mxu1 %vm103_vm1, %v4056_v51 }
 0x145   :  { %13071 = vmatpush1.msk.msra.mxu0 %vm103_vm1, %v4054_v54  ;;  %13707 = vmatmul.mubr.msk.f32.vlgmr.msra.gmra.mxu1 %vm99_vm2, %v13063_v41  ;;  %v4371_v58 = vpop.permute.xlu1 %4370  ;;  %v4369_v59 = vpop.permute.xlu0 %4368 }
 0x146   :  { %13072 = vmatmul.mubr.msk.f32.vlgmr.msra.gmra.mxu0 %vm99_vm2, %v13063_v41  ;;  %v4384_v61 = vsel %vm4382_vm15, %v4369_v59, %v4371_v58  ;;  %4542 = vmatprep.mubr.f32.mxu1 %v16856_v0 }
 0x147   :  { %7895 = vrot.lane.b32.xlu1 %v63_v46, %s14169_s25  ;;  %7595 = vrot.lane.b32.xlu0 %v63_v46, %s14168_s24 }
 0x148   :  { %13076 = vmatprep.subr.msk.mxu0 %vm103_vm1, %v4384_v61  ;;  %4471 = vmatprep.mubr.f32.mxu0 %v16856_v0 }
 0x149   :  { %v4375_v62 = vpop.permute.xlu1 %4374  ;;  %v4373_v10 = vpop.permute.xlu0 %4372 }
 0x14a   :  { %v4385_v11 = vsel %vm4382_vm15, %v4371_v58, %v4373_v10  ;;  %v4386_v15 = vsel %vm4382_vm15, %v4373_v10, %v4375_v62  ;;  %v255_v26 = vpop.f32.mrf.mxu1 }
 0x14b   :  { %13079 = vmatprep.subr.msk.mxu1 %vm103_vm1, %v4386_v15 }
 0x14c   :  { %13080 = vmatpush1.msk.msra.mxu1 %vm103_vm1, %v4385_v11  ;;  %v15069_v33 = vpop.f32.mrf.mxu1 }
 0x14d   :  { %v4377_v27 = vpop.permute.xlu1 %4376  ;;  %13081 = vmatmul.mubr.msk.f32.vlgmr.msra.gmra.mxu1 %vm99_vm2, %v13075_v17  ;;  %v4367_v29 = vpop.permute.xlu0 %4366  ;;  %13709 = vmatprep.subr.mxu1 %v16856_v0 }
 0x14e   :  { %v4383_v32 = vsel %vm4382_vm15, %v4367_v29, %v4369_v59  ;;  %13711 = vmatprep.mubr.msk.f32.mxu1 %vm14174_vm3, %v16856_v0  ;;  %v184_v1 = vpop.f32.mrf.mxu0  ;;  %v4387_v45 = vsel %vm4382_vm15, %v4375_v62, %v4377_v27 }
 0x14f   :  { %13077 = vmatpush1.msk.msra.mxu0 %vm103_vm1, %v4383_v32 }
 0x150   :  { %13078 = vmatmul.mubr.msk.f32.vlgmr.msra.gmra.mxu0 %vm99_vm2, %v13075_v17  ;;  %v15073_v35 = vpop.f32.mrf.mxu0 }
 0x151   :  { %v4381_v37 = vpop.permute.xlu1 %4380  ;;  %v4379_v38 = vpop.permute.xlu0 %4378  ;;  %4613 = vmatprep.mubr.f32.mxu0 %v16856_v0 }
 0x152   :  { %v4389_v4 = vsel %vm4382_vm15, %v4379_v38, %v4381_v37  ;;  %v4388_v41 = vsel %vm4382_vm15, %v4377_v27, %v4379_v38  ;;  %v397_v42 = vpop.f32.mrf.mxu1 }
 0x153   :  { %13082 = vmatprep.subr.msk.mxu0 %vm103_vm1, %v4388_v41  ;;  %13710 = vmatpush3.msk.msra.mxu1 %vm103_vm1, %v4389_v4  ;;  %v326_v7 = vpop.f32.mrf.mxu0 }
 0x154   :  { %13083 = vmatpush1.msk.msra.mxu0 %vm103_vm1, %v4387_v45  ;;  %13712 = vmatmul.mubr.msk.f32.vlgmr.msra.gmra.mxu1 %vm99_vm2, %v13075_v17  ;;  %v13648_v46 = vpop.f32.mrf.mxu1 }
 0x155   :  { %v4704_v49 = vpop.permute.xlu1 %4703  ;;  %13084 = vmatmul.mubr.msk.f32.vlgmr.msra.gmra.mxu0 %vm99_vm2, %v13075_v17  ;;  %v4702_v50 = vpop.permute.xlu0 %4701  ;;  %4875 = vmatprep.mubr.f32.mxu1 %v16856_v0  ;;  %v13087_v17 = vld [vmem:[%s16838_s1 + $0x70] sm:$0x3f] }
 0x156   :  { %v4717_v51 = vsel %vm16855_vm14, %v4702_v50, %v4704_v49  ;;  %4804 = vmatprep.mubr.f32.mxu0 %v16856_v0  ;;  %v15087_v52 = vpop.f32.mrf.mxu0 }
 0x157   :  { %13088 = vmatprep.subr.msk.mxu0 %vm103_vm1, %v4717_v51  ;;  %v555_v54 = vpop.f32.mrf.mxu1 }
 0x158   :  { %v556_v58 = vadd.f32 %v555_v54, %v255_v26  ;;  %v484_v59 = vpop.f32.mrf.mxu0 }
 0x159   :  { %v4708_v61 = vpop.permute.xlu1 %4707  ;;  %v4706_v62 = vpop.permute.xlu0 %4705  ;;  %v485_v10 = vadd.f32 %v484_v59, %v184_v1 }
 0x15a   :  { %v4718_v11 = vsel %vm16855_vm14, %v4704_v49, %v4706_v62  ;;  %v4719_v15 = vsel %vm16855_vm14, %v4706_v62, %v4708_v61  ;;  %v15095_v27 = vpop.f32.mrf.mxu1  ;;  %v15097_v29 = vpop.f32.mrf.mxu0 }
 0x15b   :  { %16859 = vst [vmem:[#allocation8_spill] sm:$0xff] %v15097_v29  ;;  %13091 = vmatprep.subr.msk.mxu1 %vm103_vm1, %v4719_v15 }
 0x15c   :  { %13092 = vmatpush1.msk.msra.mxu1 %vm103_vm1, %v4718_v11 }
 0x15d   :  { %v4710_v26 = vpop.permute.xlu1 %4709  ;;  %13093 = vmatmul.mubr.msk.f32.vlgmr.msra.gmra.mxu1 %vm99_vm2, %v13087_v17  ;;  %v4700_v32 = vpop.permute.xlu0 %4699  ;;  %13714 = vmatprep.subr.mxu1 %v16856_v0 }
 0x15e   :  { %v4716_v1 = vsel %vm16855_vm14, %v4700_v32, %v4702_v50  ;;  %13716 = vmatprep.mubr.msk.f32.mxu1 %vm14174_vm3, %v16856_v0  ;;  %v697_v37 = vpop.f32.mrf.mxu1  ;;  %v626_v38 = vpop.f32.mrf.mxu0  ;;  %v4720_v62 = vsel %vm16855_vm14, %v4708_v61, %v4710_v26 }
 0x15f   :  { %13089 = vmatpush1.msk.msra.mxu0 %vm103_vm1, %v4716_v1  ;;  %v698_v4 = vadd.f32 %v697_v37, %v397_v42  ;;  %v627_v41 = vadd.f32 %v626_v38, %v326_v7 }
 0x160   :  { %13090 = vmatmul.mubr.msk.f32.vlgmr.msra.gmra.mxu0 %vm99_vm2, %v13087_v17  ;;  %v13653_v45 = vpop.f32.mrf.mxu1  ;;  %v15108_v46 = vpop.f32.mrf.mxu0 }
 0x161   :  { %v4714_v49 = vpop.permute.xlu1 %4713  ;;  %v4712_v51 = vpop.permute.xlu0 %4711  ;;  %4946 = vmatprep.mubr.f32.mxu0 %v16856_v0 }
 0x162   :  { %v4722_v50 = vsel %vm16855_vm14, %v4712_v51, %v4714_v49  ;;  %v4721_v54 = vsel %vm16855_vm14, %v4710_v26, %v4712_v51  ;;  %v881_v59 = vpop.f32.mrf.mxu1  ;;  %vm5381_vm14 = vcmask 252928  }
 0x163   :  { %13094 = vmatprep.subr.msk.mxu0 %vm103_vm1, %v4721_v54  ;;  %13715 = vmatpush3.msk.msra.mxu1 %vm103_vm1, %v4722_v50  ;;  %v1029_v42 = vadd.f32 %v881_v59, %v556_v58 }
 0x164   :  { %13095 = vmatpush1.msk.msra.mxu0 %vm103_vm1, %v4720_v62  ;;  %13717 = vmatmul.mubr.msk.f32.vlgmr.msra.gmra.mxu1 %vm99_vm2, %v13087_v17  ;;  %v15118_v7 = vpop.f32.mrf.mxu1  ;;  %v810_v11 = vpop.f32.mrf.mxu0 }
 0x165   :  { %16860 = vst [vmem:[#allocation9_spill] sm:$0xff] %v15118_v7  ;;  %v5037_v15 = vpop.permute.xlu1 %5036  ;;  %13096 = vmatmul.mubr.msk.f32.vlgmr.msra.gmra.mxu0 %vm99_vm2, %v13087_v17  ;;  %v5035_v32 = vpop.permute.xlu0 %5034  ;;  %5208 = vmatprep.mubr.f32.mxu1 %v16856_v0  ;;  %v1027_v61 = vadd.f32 %v810_v11, %v485_v10  ;;  %v13099_v10 = vld [vmem:[%s16838_s1 + $0x78] sm:$0x3f] }
 0x166   :  { %v5050_v26 = vsel %vm5048_vm12, %v5035_v32, %v5037_v15  ;;  %5137 = vmatprep.mubr.f32.mxu0 %v16856_v0  ;;  %v1023_v1 = vpop.f32.mrf.mxu1  ;;  %v15124_v58 = vpop.f32.mrf.mxu0 }
 0x167   :  { %16861 = vst [vmem:[#allocation10_spill] sm:$0xff] %v15124_v58  ;;  %13100 = vmatprep.subr.msk.mxu0 %vm103_vm1, %v5050_v26  ;;  %v1033_v37 = vadd.f32 %v1023_v1, %v698_v4 }
 0x168   :  { %v13658_v38 = vpop.f32.mrf.mxu1 }
 0x169   :  { %v5041_v45 = vpop.permute.xlu1 %5040  ;;  %v5039_v49 = vpop.permute.xlu0 %5038 }
 0x16a   :  { %v5051_v51 = vsel %vm5048_vm12, %v5037_v15, %v5039_v49  ;;  %v5052_v17 = vsel %vm5048_vm12, %v5039_v49, %v5041_v45  ;;  %v952_v50 = vpop.f32.mrf.mxu0 }
 0x16b   :  { %13103 = vmatprep.subr.msk.mxu1 %vm103_vm1, %v5052_v17  ;;  %v1031_v54 = vadd.f32 %v952_v50, %v627_v41 }
 0x16c   :  { %13104 = vmatpush1.msk.msra.mxu1 %vm103_vm1, %v5051_v51  ;;  %v15134_v59 = vpop.f32.mrf.mxu0 }
 0x16d   :  { %v5043_v4 = vpop.permute.xlu1 %5042  ;;  %13105 = vmatmul.mubr.msk.f32.vlgmr.msra.gmra.mxu1 %vm99_vm2, %v13099_v10  ;;  %v5033_v62 = vpop.permute.xlu0 %5032  ;;  %13719 = vmatprep.subr.mxu1 %v16856_v0 }
 0x16e   :  { %v5049_v11 = vsel %vm5048_vm12, %v5033_v62, %v5035_v32  ;;  %13721 = vmatprep.mubr.msk.f32.mxu1 %vm14174_vm3, %v16856_v0  ;;  %v1214_v15 = vpop.f32.mrf.mxu1  ;;  %v1143_v26 = vpop.f32.mrf.mxu0 }
 0x16f   :  { %13101 = vmatpush1.msk.msra.mxu0 %vm103_vm1, %v5049_v11  ;;  %v1362_v41 = vadd.f32 %v1214_v15, %v1029_v42  ;;  %v1360_v1 = vadd.f32 %v1143_v26, %v1027_v61  ;;  %v5053_v11 = vsel %vm5048_vm12, %v5041_v45, %v5043_v4 }
 0x170   :  { %13102 = vmatmul.mubr.msk.f32.vlgmr.msra.gmra.mxu0 %vm99_vm2, %v13099_v10  ;;  %v15143_v38 = vpop.f32.mrf.mxu1  ;;  %v15145_v49 = vpop.f32.mrf.mxu0 }
 0x171   :  { %16862 = vst [vmem:[#allocation11_spill] sm:$0xff] %v15143_v38  ;;  %16863 = vst [vmem:[#allocation12_spill] sm:$0xff] %v15145_v49  ;;  %v5047_v51 = vpop.permute.xlu1 %5046  ;;  %v5045_v17 = vpop.permute.xlu0 %5044  ;;  %5279 = vmatprep.mubr.f32.mxu0 %v16856_v0 }
 0x172   :  { %v5055_v32 = vsel %vm5048_vm12, %v5045_v17, %v5047_v51  ;;  %v5054_v50 = vsel %vm5048_vm12, %v5043_v4, %v5045_v17  ;;  %v1356_v62 = vpop.f32.mrf.mxu1  ;;  %v1285_v58 = vpop.f32.mrf.mxu0  ;;  %v13111_v17 = vld [vmem:[%s16838_s1 + $0x80] sm:$0x3f]  ;;  %vm5714_vm12 = vcmask 244736  }
 0x173   :  { %13106 = vmatprep.subr.msk.mxu0 %vm103_vm1, %v5054_v50  ;;  %13720 = vmatpush3.msk.msra.mxu1 %vm103_vm1, %v5055_v32  ;;  %v1366_v42 = vadd.f32 %v1356_v62, %v1033_v37  ;;  %v1364_v61 = vadd.f32 %v1285_v58, %v1031_v54 }
 0x174   :  { %13107 = vmatpush1.msk.msra.mxu0 %vm103_vm1, %v5053_v11  ;;  %13722 = vmatmul.mubr.msk.f32.vlgmr.msra.gmra.mxu1 %vm99_vm2, %v13099_v10  ;;  %v13663_v15 = vpop.f32.mrf.mxu1  ;;  %v15165_v32 = vpop.f32.mrf.mxu0 }
 0x175   :  { %v5370_v26 = vpop.permute.xlu1 %5369  ;;  %13108 = vmatmul.mubr.msk.f32.vlgmr.msra.gmra.mxu0 %vm99_vm2, %v13099_v10  ;;  %v5368_v51 = vpop.permute.xlu0 %5367  ;;  %5541 = vmatprep.mubr.f32.mxu1 %v16856_v0 }
 0x176   :  { %v5383_v45 = vsel %vm5381_vm14, %v5368_v51, %v5370_v26  ;;  %5470 = vmatprep.mubr.f32.mxu0 %v16856_v0 }
 0x177   :  { %13112 = vmatprep.subr.msk.mxu0 %vm103_vm1, %v5383_v45 }
 0x179   :  { %v5374_v4 = vpop.permute.xlu1 %5373  ;;  %v5372_v37 = vpop.permute.xlu0 %5371 }
 0x17a   :  { %v5384_v58 = vsel %vm5381_vm14, %v5370_v26, %v5372_v37  ;;  %v5385_v54 = vsel %vm5381_vm14, %v5372_v37, %v5374_v4  ;;  %v1547_v10 = vpop.f32.mrf.mxu1 }
 0x17b   :  { %13115 = vmatprep.subr.msk.mxu1 %vm103_vm1, %v5385_v54  ;;  %v1695_v50 = vadd.f32 %v1547_v10, %v1362_v41 }
 0x17c   :  { %13116 = vmatpush1.msk.msra.mxu1 %vm103_vm1, %v5384_v58  ;;  %v15174_v26 = vpop.f32.mrf.mxu1 }
 0x17d   :  { %v5376_v62 = vpop.permute.xlu1 %5375  ;;  %13117 = vmatmul.mubr.msk.f32.vlgmr.msra.gmra.mxu1 %vm99_vm2, %v13111_v17  ;;  %v5366_v11 = vpop.permute.xlu0 %5365  ;;  %13724 = vmatprep.subr.mxu1 %v16856_v0  ;;  %16864 = vst [vmem:[#allocation13_spill] sm:$0xff] %v15174_v26 }
 0x17e   :  { %v5382_v15 = vsel %vm5381_vm14, %v5366_v11, %v5368_v51  ;;  %13726 = vmatprep.mubr.msk.f32.mxu1 %vm14174_vm3, %v16856_v0  ;;  %v1476_v45 = vpop.f32.mrf.mxu0  ;;  %v5386_v26 = vsel %vm5381_vm14, %v5374_v4, %v5376_v62 }
 0x17f   :  { %13113 = vmatpush1.msk.msra.mxu0 %vm103_vm1, %v5382_v15  ;;  %v1693_v37 = vadd.f32 %v1476_v45, %v1360_v1 }
 0x180   :  { %13114 = vmatmul.mubr.msk.f32.vlgmr.msra.gmra.mxu0 %vm99_vm2, %v13111_v17  ;;  %v15178_v41 = vpop.f32.mrf.mxu0 }
 0x181   :  { %16865 = vst [vmem:[#allocation14_spill] sm:$0xff] %v15178_v41  ;;  %v5380_v58 = vpop.permute.xlu1 %5379  ;;  %v5378_v54 = vpop.permute.xlu0 %5377  ;;  %5612 = vmatprep.mubr.f32.mxu0 %v16856_v0 }
 0x182   :  { %v5387_v10 = vsel %vm5381_vm14, %v5376_v62, %v5378_v54  ;;  %v5388_v51 = vsel %vm5381_vm14, %v5378_v54, %v5380_v58  ;;  %v1689_v11 = vpop.f32.mrf.mxu1  ;;  %v1618_v49 = vpop.f32.mrf.mxu0  ;;  %v16866_v54 = vmov 0.0   ;;  %vm6047_vm14 = vcmask 236544  }
 0x183   :  { %13118 = vmatprep.subr.msk.mxu0 %vm103_vm1, %v5387_v10  ;;  %13725 = vmatpush3.msk.msra.mxu1 %vm103_vm1, %v5388_v51  ;;  %v1699_v1 = vadd.f32 %v1689_v11, %v1366_v42  ;;  %v1697_v15 = vadd.f32 %v1618_v49, %v1364_v61 }
 0x184   :  { %13119 = vmatpush1.msk.msra.mxu0 %vm103_vm1, %v5386_v26  ;;  %13727 = vmatmul.mubr.msk.f32.vlgmr.msra.gmra.mxu1 %vm99_vm2, %v13111_v17  ;;  %v13668_v45 = vpop.f32.mrf.mxu1  ;;  %v13123_v26 = vld [vmem:[%s16838_s1 + $0x88] sm:$0x3f]  ;;  %v15198_v10 = vpop.f32.mrf.mxu0 }
 0x185   :  { %v5703_v0 = vpop.permute.xlu1 %5702  ;;  %13120 = vmatmul.mubr.msk.f32.vlgmr.msra.gmra.mxu0 %vm99_vm2, %v13111_v17  ;;  %v5701_v58 = vpop.permute.xlu0 %5700  ;;  %5874 = vmatprep.mubr.f32.mxu1 %v16866_v54 }
 0x186   :  { %v5716_v4 = vsel %vm5714_vm12, %v5701_v58, %v5703_v0  ;;  %5803 = vmatprep.mubr.f32.mxu0 %v16866_v54 }
 0x187   :  { %13124 = vmatprep.subr.msk.mxu0 %vm103_vm1, %v5716_v4 }
 0x189   :  { %v5707_v62 = vpop.permute.xlu1 %5706  ;;  %v5705_v42 = vpop.permute.xlu0 %5704 }
 0x18a   :  { %v5717_v49 = vsel %vm5714_vm12, %v5703_v0, %v5705_v42  ;;  %v5718_v61 = vsel %vm5714_vm12, %v5705_v42, %v5707_v62  ;;  %v1880_v17 = vpop.f32.mrf.mxu1 }
 0x18b   :  { %13127 = vmatprep.subr.msk.mxu1 %vm103_vm1, %v5718_v61  ;;  %v2028_v51 = vadd.f32 %v1880_v17, %v1695_v50 }
 0x18c   :  { %13128 = vmatpush1.msk.msra.mxu1 %vm103_vm1, %v5717_v49  ;;  %v15207_v4 = vpop.f32.mrf.mxu1 }
 0x18d   :  { %v5709_v11 = vpop.permute.xlu1 %5708  ;;  %13129 = vmatmul.mubr.msk.f32.vlgmr.msra.gmra.mxu1 %vm99_vm2, %v13123_v26  ;;  %v5699_v45 = vpop.permute.xlu0 %5698  ;;  %13729 = vmatprep.subr.mxu1 %v16866_v54  ;;  %16867 = vst [vmem:[#allocation15_spill] sm:$0xff] %v15207_v4 }
 0x18e   :  { %v5715_v0 = vsel %vm5714_vm12, %v5699_v45, %v5701_v58  ;;  %13731 = vmatprep.mubr.msk.f32.mxu1 %vm14174_vm3, %v16866_v54  ;;  %v1809_v42 = vpop.f32.mrf.mxu0  ;;  %v5719_v4 = vsel %vm5714_vm12, %v5707_v62, %v5709_v11 }
 0x18f   :  { %13125 = vmatpush1.msk.msra.mxu0 %vm103_vm1, %v5715_v0  ;;  %v2026_v61 = vadd.f32 %v1809_v42, %v1693_v37 }
 0x190   :  { %13126 = vmatmul.mubr.msk.f32.vlgmr.msra.gmra.mxu0 %vm99_vm2, %v13123_v26  ;;  %v15211_v50 = vpop.f32.mrf.mxu0 }
 0x191   :  { %16868 = vst [vmem:[#allocation16_spill] sm:$0xff] %v15211_v50  ;;  %v5713_v49 = vpop.permute.xlu1 %5712  ;;  %v5711_v17 = vpop.permute.xlu0 %5710  ;;  %5945 = vmatprep.mubr.f32.mxu0 %v16866_v54 }
 0x192   :  { %v5720_v41 = vsel %vm5714_vm12, %v5709_v11, %v5711_v17  ;;  %v5721_v58 = vsel %vm5714_vm12, %v5711_v17, %v5713_v49  ;;  %v2022_v45 = vpop.f32.mrf.mxu1  ;;  %v1951_v38 = vpop.f32.mrf.mxu0  ;;  %v13135_v11 = vld [vmem:[%s16838_s1 + $0x90] sm:$0x3f]  ;;  %vm6380_vm12 = vcmask 228352  }
 0x193   :  { %13130 = vmatprep.subr.msk.mxu0 %vm103_vm1, %v5720_v41  ;;  %13730 = vmatpush3.msk.msra.mxu1 %vm103_vm1, %v5721_v58  ;;  %v2032_v37 = vadd.f32 %v2022_v45, %v1699_v1  ;;  %v2030_v0 = vadd.f32 %v1951_v38, %v1697_v15 }
 0x194   :  { %13131 = vmatpush1.msk.msra.mxu0 %vm103_vm1, %v5719_v4  ;;  %13732 = vmatmul.mubr.msk.f32.vlgmr.msra.gmra.mxu1 %vm99_vm2, %v13123_v26  ;;  %v13673_v42 = vpop.f32.mrf.mxu1  ;;  %v15231_v4 = vpop.f32.mrf.mxu0 }
 0x195   :  { %v6036_v50 = vpop.permute.xlu1 %6035  ;;  %13132 = vmatmul.mubr.msk.f32.vlgmr.msra.gmra.mxu0 %vm99_vm2, %v13123_v26  ;;  %v6034_v49 = vpop.permute.xlu0 %6033  ;;  %6207 = vmatprep.mubr.f32.mxu1 %v16866_v54 }
 0x196   :  { %v6049_v62 = vsel %vm6047_vm14, %v6034_v49, %v6036_v50  ;;  %6136 = vmatprep.mubr.f32.mxu0 %v16866_v54 }
 0x197   :  { %13136 = vmatprep.subr.msk.mxu0 %vm103_vm1, %v6049_v62 }
 0x199   :  { %v6040_v41 = vpop.permute.xlu1 %6039  ;;  %v6038_v1 = vpop.permute.xlu0 %6037 }
 0x19a   :  { %v6050_v38 = vsel %vm6047_vm14, %v6036_v50, %v6038_v1  ;;  %v6051_v15 = vsel %vm6047_vm14, %v6038_v1, %v6040_v41  ;;  %v2213_v26 = vpop.f32.mrf.mxu1 }
 0x19b   :  { %13139 = vmatprep.subr.msk.mxu1 %vm103_vm1, %v6051_v15  ;;  %v2361_v17 = vadd.f32 %v2213_v26, %v2028_v51  ;;  %v8193_v51 = vld [vmem:[%s16839_s2] sm:$0x3f] }
 0x19c   :  { %13140 = vmatpush1.msk.msra.mxu1 %vm103_vm1, %v6050_v38  ;;  %v15240_v42 = vpop.f32.mrf.mxu1  ;;  %v14186_v38 = vmov 0  }
 0x19d   :  { %v6042_v58 = vpop.permute.xlu1 %6041  ;;  %13141 = vmatmul.mubr.msk.f32.vlgmr.msra.gmra.mxu1 %vm99_vm2, %v13135_v11  ;;  %v6032_v45 = vpop.permute.xlu0 %6031  ;;  %13734 = vmatprep.subr.mxu1 %v16866_v54  ;;  %16869 = vst [vmem:[#allocation17_spill] sm:$0xff] %v15240_v42 }
 0x19e   :  { %v6048_v50 = vsel %vm6047_vm14, %v6032_v45, %v6034_v49  ;;  %13736 = vmatprep.mubr.msk.f32.mxu1 %vm14174_vm3, %v16866_v54  ;;  %v2142_v62 = vpop.f32.mrf.mxu0  ;;  %14083 = vset.pattern.permute.xlu0 %v14186_v38 }
 0x19f   :  { %13137 = vmatpush1.msk.msra.mxu0 %vm103_vm1, %v6048_v50  ;;  %v2359_v1 = vadd.f32 %v2142_v62, %v2026_v61  ;;  %8196 = vperm.xlu0 %14083, %v8193_v51   ;;  %v6052_v61 = vsel %vm6047_vm14, %v6040_v41, %v6042_v58 }
 0x1a0   :  { %13138 = vmatmul.mubr.msk.f32.vlgmr.msra.gmra.mxu0 %vm99_vm2, %v13135_v11  ;;  %v15247_v15 = vpop.f32.mrf.mxu0  ;;  %14109 = vset.pattern.permute.xlu1 %v14186_v38 }
 0x1a1   :  { %16870 = vst [vmem:[#allocation18_spill] sm:$0xff] %v15247_v15  ;;  %v6046_v49 = vpop.permute.xlu1 %6045  ;;  %v6044_v26 = vpop.permute.xlu0 %6043  ;;  %6278 = vmatprep.mubr.f32.mxu0 %v16866_v54 }
 0x1a2   :  { %v6053_v45 = vsel %vm6047_vm14, %v6042_v58, %v6044_v26  ;;  %v6054_v42 = vsel %vm6047_vm14, %v6044_v26, %v6046_v49  ;;  %v2355_v7 = vpop.f32.mrf.mxu1  ;;  %v2284_v29 = vpop.f32.mrf.mxu0  ;;  %vm8817_vm14 = vcmask 48128  }
 0x1a3   :  { %13142 = vmatprep.subr.msk.mxu0 %vm103_vm1, %v6053_v45  ;;  %13735 = vmatpush3.msk.msra.mxu1 %vm103_vm1, %v6054_v42  ;;  %v2365_v50 = vadd.f32 %v2355_v7, %v2032_v37  ;;  %v2363_v62 = vadd.f32 %v2284_v29, %v2030_v0  ;;  %v13147_v0 = vld [vmem:[%s16838_s1 + $0x98] sm:$0x3f] }
 0x1a4   :  { %13143 = vmatpush1.msk.msra.mxu0 %vm103_vm1, %v6052_v61  ;;  %13737 = vmatmul.mubr.msk.f32.vlgmr.msra.gmra.mxu1 %vm99_vm2, %v13135_v11  ;;  %v13678_v51 = vpop.f32.mrf.mxu1  ;;  %v15267_v42 = vpop.f32.mrf.mxu0 }
 0x1a5   :  { %v6369_v38 = vpop.permute.xlu1 %6368  ;;  %13144 = vmatmul.mubr.msk.f32.vlgmr.msra.gmra.mxu0 %vm99_vm2, %v13135_v11  ;;  %v6367_v49 = vpop.permute.xlu0 %6366  ;;  %6540 = vmatprep.mubr.f32.mxu1 %v16866_v54 }
 0x1a6   :  { %v6382_v41 = vsel %vm6380_vm12, %v6367_v49, %v6369_v38  ;;  %6469 = vmatprep.mubr.f32.mxu0 %v16866_v54 }
 0x1a7   :  { %13148 = vmatprep.subr.msk.mxu0 %vm103_vm1, %v6382_v41 }
 0x1a9   :  { %v6373_v58 = vpop.permute.xlu1 %6372  ;;  %v6371_v7 = vpop.permute.xlu0 %6370 }
 0x1aa   :  { %v6383_v29 = vsel %vm6380_vm12, %v6369_v38, %v6371_v7  ;;  %v6384_v37 = vsel %vm6380_vm12, %v6371_v7, %v6373_v58  ;;  %v2546_v11 = vpop.f32.mrf.mxu1 }
 0x1ab   :  { %13151 = vmatprep.subr.msk.mxu1 %vm103_vm1, %v6384_v37  ;;  %v2694_v26 = vadd.f32 %v2546_v11, %v2361_v17 }
 0x1ac   :  { %13152 = vmatpush1.msk.msra.mxu1 %vm103_vm1, %v6383_v29  ;;  %v15276_v38 = vpop.f32.mrf.mxu1 }
 0x1ad   :  { %v6375_v45 = vpop.permute.xlu1 %6374  ;;  %13153 = vmatmul.mubr.msk.f32.vlgmr.msra.gmra.mxu1 %vm99_vm2, %v13147_v0  ;;  %v6365_v61 = vpop.permute.xlu0 %6364  ;;  %13739 = vmatprep.subr.mxu1 %v16866_v54  ;;  %16871 = vst [vmem:[#allocation19_spill] sm:$0xff] %v15276_v38 }
 0x1ae   :  { %v6381_v51 = vsel %vm6380_vm12, %v6365_v61, %v6367_v49  ;;  %13741 = vmatprep.mubr.msk.f32.mxu1 %vm14174_vm3, %v16866_v54  ;;  %v2475_v41 = vpop.f32.mrf.mxu0  ;;  %v6385_v38 = vsel %vm6380_vm12, %v6373_v58, %v6375_v45 }
 0x1af   :  { %13149 = vmatpush1.msk.msra.mxu0 %vm103_vm1, %v6381_v51  ;;  %v2692_v7 = vadd.f32 %v2475_v41, %v2359_v1 }
 0x1b0   :  { %13150 = vmatmul.mubr.msk.f32.vlgmr.msra.gmra.mxu0 %vm99_vm2, %v13147_v0  ;;  %v15280_v17 = vpop.f32.mrf.mxu0 }
 0x1b1   :  { %v6379_v29 = vpop.permute.xlu1 %6378  ;;  %v6377_v37 = vpop.permute.xlu0 %6376  ;;  %6611 = vmatprep.mubr.f32.mxu0 %v16866_v54 }
 0x1b2   :  { %v6386_v11 = vsel %vm6380_vm12, %v6375_v45, %v6377_v37  ;;  %v6387_v49 = vsel %vm6380_vm12, %v6377_v37, %v6379_v29  ;;  %v2688_v61 = vpop.f32.mrf.mxu1  ;;  %v2617_v15 = vpop.f32.mrf.mxu0  ;;  %vm9297_vm12 = vcmask 916480  }
 0x1b3   :  { %13154 = vmatprep.subr.msk.mxu0 %vm103_vm1, %v6386_v11  ;;  %13740 = vmatpush3.msk.msra.mxu1 %vm103_vm1, %v6387_v49  ;;  %v2698_v1 = vadd.f32 %v2688_v61, %v2365_v50  ;;  %v2696_v51 = vadd.f32 %v2617_v15, %v2363_v62  ;;  %v13159_v15 = vld [vmem:[%s16838_s1 + $0xa0] sm:$0x3f] }
 0x1b4   :  { %13155 = vmatpush1.msk.msra.mxu0 %vm103_vm1, %v6385_v38  ;;  %13742 = vmatmul.mubr.msk.f32.vlgmr.msra.gmra.mxu1 %vm99_vm2, %v13147_v0  ;;  %v13683_v41 = vpop.f32.mrf.mxu1 }
 0x1b5   :  { %13156 = vmatmul.mubr.msk.f32.vlgmr.msra.gmra.mxu0 %vm99_vm2, %v13147_v0  ;;  %13163 = vmatprep.subr.msk.mxu1 %vm103_vm1, %v14953_v2  ;;  %v15311_v2 = vpop.f32.mrf.mxu0  ;;  %v7296_v58 = vpop.permute.xlu1 %7295 }
 0x1b6   :  { %13160 = vmatprep.subr.msk.mxu0 %vm103_vm1, %v14996_v28  ;;  %13164 = vmatpush1.msk.msra.mxu1 %vm103_vm1, %v14289_v3 }
 0x1b7   :  { %13161 = vmatpush1.msk.msra.mxu0 %vm103_vm1, %v14306_v6  ;;  %6837 = vmatprep.mubr.f32.mxu1 %v16866_v54 }
 0x1b8   :  { %13744 = vmatprep.subr.mxu1 %v16866_v54  ;;  %6766 = vmatprep.mubr.f32.mxu0 %v16866_v54 }
 0x1b9   :  { %13165 = vmatmul.mubr.msk.f32.vlgmr.msra.gmra.mxu1 %vm99_vm2, %v13159_v15  ;;  %13166 = vmatprep.subr.msk.mxu0 %vm103_vm1, %v14982_v12  ;;  %v6996_v12 = vpop.permute.xlu0 %6995 }
 0x1ba   :  { %13745 = vmatpush3.msk.msra.mxu1 %vm103_vm1, %v14319_v8  ;;  %13162 = vmatmul.mubr.msk.f32.vlgmr.msra.gmra.mxu0 %vm99_vm2, %v13159_v15  ;;  %v2879_v3 = vpop.f32.mrf.mxu1  ;;  %v6997_v28 = vsel %vm91_vm0, %v14461_v20, %v6996_v12 }
 0x1bb   :  { %13167 = vmatpush1.msk.msra.mxu0 %vm103_vm1, %v14302_v5  ;;  %13175 = vmatprep.subr.msk.mxu1 %vm103_vm1, %v14477_v24  ;;  %v3027_v6 = vadd.f32 %v2879_v3, %v2694_v26  ;;  %v13171_v5 = vld [vmem:[%s16838_s1 + $0xa8] sm:$0x3f] }
 0x1bc   :  { %13172 = vmatprep.subr.msk.mxu0 %vm103_vm1, %v14433_v14  ;;  %13746 = vmatprep.mubr.msk.f32.mxu1 %vm14174_vm3, %v16866_v54  ;;  %v15329_v8 = vpop.f32.mrf.mxu1 }
 0x1bd   :  { %6908 = vmatprep.mubr.f32.mxu0 %v16866_v54  ;;  %13747 = vmatmul.mubr.msk.f32.vlgmr.msra.gmra.mxu1 %vm99_vm2, %v13159_v15 }
 0x1be   :  { %13176 = vmatpush1.msk.msra.mxu1 %vm103_vm1, %v14430_v13  ;;  %13168 = vmatmul.mubr.msk.f32.vlgmr.msra.gmra.mxu0 %vm99_vm2, %v13159_v15  ;;  %v2808_v14 = vpop.f32.mrf.mxu0 }
 0x1bf   :  { %13173 = vmatpush1.msk.msra.mxu0 %vm103_vm1, %v14449_v18  ;;  %7138 = vmatprep.mubr.f32.mxu1 %v16866_v54  ;;  %v3025_v24 = vadd.f32 %v2808_v14, %v2692_v7 }
 0x1c0   :  { %13178 = vmatprep.subr.msk.mxu0 %vm103_vm1, %v14466_v22  ;;  %13749 = vmatprep.subr.mxu1 %v16866_v54  ;;  %v15337_v13 = vpop.f32.mrf.mxu0 }
 0x1c1   :  { %7067 = vmatprep.mubr.f32.mxu0 %v16866_v54  ;;  %13177 = vmatmul.mubr.msk.f32.vlgmr.msra.gmra.mxu1 %vm99_vm2, %v13171_v5 }
 0x1c2   :  { %13750 = vmatpush3.msk.msra.mxu1 %vm103_vm1, %v6997_v28  ;;  %13174 = vmatmul.mubr.msk.f32.vlgmr.msra.gmra.mxu0 %vm99_vm2, %v13171_v5  ;;  %v3021_v18 = vpop.f32.mrf.mxu1 }
 0x1c3   :  { %13179 = vmatpush1.msk.msra.mxu0 %vm103_vm1, %v14469_v23  ;;  %13187 = vmatprep.subr.msk.mxu1 %vm103_vm1, %v14569_v44  ;;  %v3031_v22 = vadd.f32 %v3021_v18, %v2698_v1  ;;  %v13183_v23 = vld [vmem:[%s16838_s1 + $0xb0] sm:$0x3f] }
 0x1c4   :  { %13184 = vmatprep.subr.msk.mxu0 %vm103_vm1, %v14522_v34  ;;  %13751 = vmatprep.mubr.msk.f32.mxu1 %vm14174_vm3, %v16866_v54  ;;  %v13688_v20 = vpop.f32.mrf.mxu1  ;;  %v2950_v50 = vpop.f32.mrf.mxu0  ;;  %v7297_v34 = vsel %vm719_vm4, %v14538_v36, %v7296_v58 }
 0x1c5   :  { %7209 = vmatprep.mubr.f32.mxu0 %v16866_v54  ;;  %13752 = vmatmul.mubr.msk.f32.vlgmr.msra.gmra.mxu1 %vm99_vm2, %v13171_v5  ;;  %v3029_v62 = vadd.f32 %v2950_v50, %v2696_v51  ;;  %v629_v51 = vadd.f32 %v15108_v46, %v15087_v52 }
 0x1c6   :  { %13188 = vmatpush1.msk.msra.mxu1 %vm103_vm1, %v14515_v31  ;;  %13180 = vmatmul.mubr.msk.f32.vlgmr.msra.gmra.mxu0 %vm99_vm2, %v13171_v5  ;;  %v15383_v36 = vpop.f32.mrf.mxu0 }
 0x1c7   :  { %13185 = vmatpush1.msk.msra.mxu0 %vm103_vm1, %v14512_v30  ;;  %7438 = vmatprep.mubr.f32.mxu1 %v16866_v54 }
 0x1c8   :  { %13190 = vmatprep.subr.msk.mxu0 %vm103_vm1, %v14554_v40  ;;  %13754 = vmatprep.subr.mxu1 %v16866_v54  ;;  %v7596_v40 = vpop.permute.xlu0 %7595 }
 0x1c9   :  { %7367 = vmatprep.mubr.f32.mxu0 %v16866_v54  ;;  %13189 = vmatmul.mubr.msk.f32.vlgmr.msra.gmra.mxu1 %vm99_vm2, %v13183_v23  ;;  %v7597_v44 = vsel %vm1052_vm5, %v14611_v53, %v7596_v40 }
 0x1ca   :  { %13755 = vmatpush3.msk.msra.mxu1 %vm103_vm1, %v7297_v34  ;;  %13186 = vmatmul.mubr.msk.f32.vlgmr.msra.gmra.mxu0 %vm99_vm2, %v13183_v23 }
 0x1cb   :  { %13191 = vmatpush1.msk.msra.mxu0 %vm103_vm1, %v14548_v39  ;;  %13199 = vmatprep.subr.msk.mxu1 %vm103_vm1, %v14628_v57  ;;  %v13195_v39 = vld [vmem:[%s16838_s1 + $0xb8] sm:$0x3f]  ;;  %v7896_v57 = vpop.permute.xlu1 %7895 }
 0x1cc   :  { %13196 = vmatprep.subr.msk.mxu0 %vm103_vm1, %v14586_v47  ;;  %13756 = vmatprep.mubr.msk.f32.mxu1 %vm14174_vm3, %v16866_v54  ;;  %v3212_v30 = vpop.f32.mrf.mxu1 }
 0x1cd   :  { %7509 = vmatprep.mubr.f32.mxu0 %v16866_v54  ;;  %13757 = vmatmul.mubr.msk.f32.vlgmr.msra.gmra.mxu1 %vm99_vm2, %v13183_v23  ;;  %v3360_v31 = vadd.f32 %v3212_v30, %v3027_v6  ;;  %v1032_v6 = vadd.f32 %v15134_v59, %v629_v51 }
 0x1ce   :  { %13200 = vmatpush1.msk.msra.mxu1 %vm103_vm1, %v14589_v48  ;;  %13192 = vmatmul.mubr.msk.f32.vlgmr.msra.gmra.mxu0 %vm99_vm2, %v13183_v23  ;;  %v15401_v47 = vpop.f32.mrf.mxu1 }
 0x1cf   :  { %13197 = vmatpush1.msk.msra.mxu0 %vm103_vm1, %v14566_v43  ;;  %7738 = vmatprep.mubr.f32.mxu1 %v16866_v54  ;;  %v1365_v28 = vadd.f32 %v15165_v32, %v1032_v6 }
 0x1d0   :  { %13202 = vmatprep.subr.msk.mxu0 %vm103_vm1, %v14622_v55  ;;  %13759 = vmatprep.subr.mxu1 %v16866_v54 }
 0x1d1   :  { %7667 = vmatprep.mubr.f32.mxu0 %v16866_v54  ;;  %13201 = vmatmul.mubr.msk.f32.vlgmr.msra.gmra.mxu1 %vm99_vm2, %v13195_v39  ;;  %v3141_v48 = vpop.f32.mrf.mxu0 }
 0x1d2   :  { %13760 = vmatpush3.msk.msra.mxu1 %vm103_vm1, %v7597_v44  ;;  %13198 = vmatmul.mubr.msk.f32.vlgmr.msra.gmra.mxu0 %vm99_vm2, %v13195_v39  ;;  %v3358_v43 = vadd.f32 %v3141_v48, %v3025_v24 }
 0x1d3   :  { %13203 = vmatpush1.msk.msra.mxu0 %vm103_vm1, %v14625_v56  ;;  %13211 = vmatprep.subr.msk.mxu1 %vm103_vm1, %v14692_v25  ;;  %v15409_v55 = vpop.f32.mrf.mxu0  ;;  %v13207_v56 = vld [vmem:[%s16838_s1 + $0xc0] sm:$0x3f]  ;;  %s14187_s1 = smov 112  }
 0x1d4   :  { %13208 = vmatprep.subr.msk.mxu0 %vm103_vm1, %v14654_v63  ;;  %13761 = vmatprep.mubr.msk.f32.mxu1 %vm14174_vm3, %v16866_v54 }
 0x1d5   :  { %7809 = vmatprep.mubr.f32.mxu0 %v16866_v54  ;;  %13762 = vmatmul.mubr.msk.f32.vlgmr.msra.gmra.mxu1 %vm99_vm2, %v13195_v39  ;;  %v3354_v53 = vpop.f32.mrf.mxu1 }
 0x1d6   :  { %13212 = vmatpush1.msk.msra.mxu1 %vm103_vm1, %v14657_v9  ;;  %13204 = vmatmul.mubr.msk.f32.vlgmr.msra.gmra.mxu0 %vm99_vm2, %v13195_v39  ;;  %v3364_v25 = vadd.f32 %v3354_v53, %v3031_v22  ;;  %v3283_v63 = vpop.f32.mrf.mxu0  ;;  %v7897_v9 = vsel %vm1385_vm6, %v14677_v16, %v7896_v57 }
 0x1d7   :  { %13209 = vmatpush1.msk.msra.mxu0 %vm103_vm1, %v14644_v60  ;;  %8038 = vmatprep.mubr.f32.mxu1 %v16866_v54  ;;  %v13693_v0 = vpop.f32.mrf.mxu1  ;;  %v3362_v26 = vadd.f32 %v3283_v63, %v3029_v62  ;;  %v1698_v62 = vadd.f32 %v15198_v10, %v1365_v28 }
 0x1d8   :  { %13214 = vmatprep.subr.msk.mxu0 %vm103_vm1, %v14686_v19  ;;  %13764 = vmatprep.subr.mxu1 %v16866_v54  ;;  %v3285_v60 = vpop.f32.mrf.mxu0 }
 0x1d9   :  { %7967 = vmatprep.mubr.f32.mxu0 %v16866_v54  ;;  %13213 = vmatmul.mubr.msk.f32.vlgmr.msra.gmra.mxu1 %vm99_vm2, %v13207_v56  ;;  %v2031_v52 = vadd.f32 %v15231_v4, %v1698_v62 }
 0x1da   :  { %13765 = vmatpush3.msk.msra.mxu1 %vm103_vm1, %v7897_v9  ;;  %13210 = vmatmul.mubr.msk.f32.vlgmr.msra.gmra.mxu0 %vm99_vm2, %v13207_v56 }
 0x1db   :  { %13215 = vmatpush1.msk.msra.mxu0 %vm103_vm1, %v14689_v21  ;;  %13766 = vmatprep.mubr.msk.f32.mxu1 %vm14174_vm3, %v16866_v54  ;;  %v2364_v34 = vadd.f32 %v15267_v42, %v2031_v52 }
 0x1dc   :  { %8109 = vmatprep.mubr.f32.mxu0 %v16866_v54 }
 0x1dd   :  { %13767 = vmatmul.mubr.msk.f32.vlgmr.msra.gmra.mxu1 %vm99_vm2, %v13207_v56  ;;  %v2697_v39 = vadd.f32 %v15311_v2, %v2364_v34 }
 0x1de   :  { %13216 = vmatmul.mubr.msk.f32.vlgmr.msra.gmra.mxu0 %vm99_vm2, %v13207_v56  ;;  %v3545_v16 = vpop.f32.mrf.mxu1  ;;  %vm8824_vm2 = vcmask 1045504  }
 0x1df   :  { %v3693_v19 = vadd.f32 %v3545_v16, %v3360_v31  ;;  %v3030_v4 = vadd.f32 %v15383_v36, %v2697_v39 }
 0x1e0   :  { %v15442_v45 = vpop.f32.mrf.mxu1 }
 0x1e1   :  { %v3474_v38 = vpop.f32.mrf.mxu0  ;;  %v3363_v57 = vadd.f32 %v3285_v60, %v3030_v4 }
 0x1e2   :  { %v3691_v7 = vadd.f32 %v3474_v38, %v3358_v43 }
 0x1e3   :  { %v15444_v29 = vpop.f32.mrf.mxu0 }
 0x1e5   :  { %v3687_v37 = vpop.f32.mrf.mxu1 }
 0x1e6   :  { %v3697_v21 = vadd.f32 %v3687_v37, %v3364_v25  ;;  %v3616_v11 = vpop.f32.mrf.mxu0 }
 0x1e7   :  { %v13698_v49 = vpop.f32.mrf.mxu1  ;;  %v3695_v61 = vadd.f32 %v3616_v11, %v3362_v26 }
 0x1e8   :  { %v3618_v1 = vpop.f32.mrf.mxu0 }
 0x1e9   :  { %v3696_v0 = vadd.f32 %v3618_v1, %v3363_v57 }
 0x1ee   :  { %v3878_v41 = vpop.f32.mrf.mxu1 }
 0x1ef   :  { %v4026_v15 = vadd.f32 %v3878_v41, %v3693_v19 }
 0x1f0   :  { %v15449_v5 = vpop.f32.mrf.mxu1 }
 0x1f1   :  { %v3807_v3 = vpop.f32.mrf.mxu0 }
 0x1f2   :  { %v4024_v12 = vadd.f32 %v3807_v3, %v3691_v7 }
 0x1f3   :  { %v15451_v14 = vpop.f32.mrf.mxu0 }
 0x1f5   :  { %v4020_v24 = vpop.f32.mrf.mxu1 }
 0x1f6   :  { %v4030_v18 = vadd.f32 %v4020_v24, %v3697_v21  ;;  %v3949_v22 = vpop.f32.mrf.mxu0 }
 0x1f7   :  { %v4028_v20 = vadd.f32 %v3949_v22, %v3695_v61  ;;  %v13703_v50 = vpop.f32.mrf.mxu1 }
 0x1f8   :  { %v3951_v58 = vpop.f32.mrf.mxu0 }
 0x1f9   :  { %v4029_v16 = vadd.f32 %v3951_v58, %v3696_v0 }
 0x1fe   :  { %v4211_v46 = vpop.f32.mrf.mxu1 }
 0x1ff   :  { %v4359_v23 = vadd.f32 %v4211_v46, %v4026_v15 }
 0x200   :  { %v15457_v31 = vpop.f32.mrf.mxu1 }
 0x201   :  { %v4140_v59 = vpop.f32.mrf.mxu0 }
 0x202   :  { %v4357_v30 = vadd.f32 %v4140_v59, %v4024_v12 }
 0x203   :  { %v15459_v40 = vpop.f32.mrf.mxu0 }
 0x205   :  { %v4353_v32 = vpop.f32.mrf.mxu1 }
 0x206   :  { %v4363_v44 = vadd.f32 %v4353_v32, %v4030_v18  ;;  %v4282_v48 = vpop.f32.mrf.mxu0 }
 0x207   :  { %v4361_v43 = vadd.f32 %v4282_v48, %v4028_v20  ;;  %v13708_v10 = vpop.f32.mrf.mxu1 }
 0x208   :  { %v4284_v56 = vpop.f32.mrf.mxu0 }
 0x209   :  { %v4362_v7 = vadd.f32 %v4284_v56, %v4029_v16  ;;  %v558_v16 = vadd.f32 %v15095_v27, %v15069_v33  ;;  %v16876_v27 = vld [vmem:[#allocation12_spill] sm:$0xff] }
 0x20d   :  { %v4544_v53 = vpop.f32.mrf.mxu1 }
 0x20e   :  { %v4692_v25 = vadd.f32 %v4544_v53, %v4359_v23 }
 0x20f   :  { %v15463_v26 = vpop.f32.mrf.mxu1 }
 0x210   :  { %v4473_v63 = vpop.f32.mrf.mxu0 }
 0x211   :  { %v4690_v42 = vadd.f32 %v4473_v63, %v4357_v30 }
 0x212   :  { %v15465_v9 = vpop.f32.mrf.mxu0 }
 0x214   :  { %v4686_v19 = vpop.f32.mrf.mxu1 }
 0x215   :  { %v4696_v2 = vadd.f32 %v4686_v19, %v4363_v44  ;;  %v4615_v38 = vpop.f32.mrf.mxu0 }
 0x216   :  { %v15467_v37 = vadd.f32 %v4615_v38, %v4361_v43  ;;  %v13713_v21 = vpop.f32.mrf.mxu1 }
 0x217   :  { %v4617_v36 = vpop.f32.mrf.mxu0 }
 0x218   :  { %v15469_v11 = vadd.f32 %v4617_v36, %v4362_v7  ;;  %v16873_v7 = vld [vmem:[#allocation9_spill] sm:$0xff] }
 0x219   :  { %v1030_v21 = vadd.f32 %v16873_v7, %v558_v16  ;;  %v16880_v16 = vld [vmem:[#allocation16_spill] sm:$0xff] }
 0x21d   :  { %v4877_v60 = vpop.f32.mrf.mxu1 }
 0x21e   :  { %v5025_v49 = vadd.f32 %v4877_v60, %v4692_v25 }
 0x21f   :  { %v15473_v1 = vpop.f32.mrf.mxu1 }
 0x220   :  { %v4806_v61 = vpop.f32.mrf.mxu0 }
 0x221   :  { %v15471_v51 = vadd.f32 %v4806_v61, %v4690_v42 }
 0x222   :  { %v15475_v12 = vpop.f32.mrf.mxu0 }
 0x224   :  { %v5019_v41 = vpop.f32.mrf.mxu1 }
 0x225   :  { %v5029_v15 = vadd.f32 %v5019_v41, %v4696_v2  ;;  %v15477_v28 = vpop.f32.mrf.mxu0  ;;  %v16872_v2 = vld [vmem:[#allocation8_spill] sm:$0xff]  ;;  %v16875_v41 = vld [vmem:[#allocation11_spill] sm:$0xff] }
 0x226   :  { %v13718_v3 = vpop.f32.mrf.mxu1  ;;  %v487_v38 = vadd.f32 %v16872_v2, %v15073_v35 }
 0x227   :  { %v15481_v50 = vpop.f32.mrf.mxu0 }
 0x22d   :  { %v5210_v6 = vpop.f32.mrf.mxu1 }
 0x22e   :  { %v5358_v24 = vadd.f32 %v5210_v6, %v5025_v49  ;;  %v16874_v49 = vld [vmem:[#allocation10_spill] sm:$0xff] }
 0x22f   :  { %v15479_v18 = vpop.f32.mrf.mxu1  ;;  %v1028_v61 = vadd.f32 %v16874_v49, %v487_v38  ;;  %v16881_v38 = vld [vmem:[#allocation17_spill] sm:$0xff] }
 0x230   :  { %v15483_v52 = vpop.f32.mrf.mxu0 }
 0x232   :  { %v15485_v46 = vpop.f32.mrf.mxu0 }
 0x234   :  { %v5352_v22 = vpop.f32.mrf.mxu1 }
 0x235   :  { %v5362_v20 = vadd.f32 %v5352_v22, %v5029_v15  ;;  %v15489_v59 = vpop.f32.mrf.mxu0  ;;  %v1363_v15 = vadd.f32 %v16875_v41, %v1030_v21 }
 0x236   :  { %v13723_v62 = vpop.f32.mrf.mxu1 }
 0x237   :  { %v15493_v30 = vpop.f32.mrf.mxu0 }
 0x23d   :  { %v5543_v58 = vpop.f32.mrf.mxu1 }
 0x23e   :  { %v15487_v23 = vadd.f32 %v5543_v58, %v5358_v24  ;;  %v1361_v24 = vadd.f32 %v16876_v27, %v1028_v61  ;;  %v16882_v61 = vld [vmem:[#allocation18_spill] sm:$0xff] }
 0x23f   :  { %v15491_v34 = vpop.f32.mrf.mxu1 }
 0x240   :  { %v15495_v44 = vpop.f32.mrf.mxu0 }
 0x242   :  { %v15497_v43 = vpop.f32.mrf.mxu0 }
 0x244   :  { %v5685_v32 = vpop.f32.mrf.mxu1 }
 0x245   :  { %v5695_v39 = vadd.f32 %v5685_v32, %v5362_v20  ;;  %v15499_v10 = vpop.f32.mrf.mxu0  ;;  %v16877_v20 = vld [vmem:[#allocation13_spill] sm:$0xff]  ;;  %v16878_v32 = vld [vmem:[#allocation14_spill] sm:$0xff] }
 0x246   :  { %v13728_v48 = vpop.f32.mrf.mxu1  ;;  %v1696_v35 = vadd.f32 %v16877_v20, %v1363_v15  ;;  %v16883_v15 = vld [vmem:[#allocation19_spill] sm:$0xff] }
 0x247   :  { %v15503_v53 = vpop.f32.mrf.mxu0  ;;  %v16879_v48 = vld [vmem:[#allocation15_spill] sm:$0xff] }
 0x24d   :  { %v15501_v4 = vpop.f32.mrf.mxu1 }
 0x24f   :  { %v15505_v57 = vpop.f32.mrf.mxu1 }
 0x250   :  { %v15507_v56 = vpop.f32.mrf.mxu0 }
 0x252   :  { %v15509_v0 = vpop.f32.mrf.mxu0 }
 0x254   :  { %v6018_v25 = vpop.f32.mrf.mxu1 }
 0x255   :  { %v6028_v63 = vadd.f32 %v6018_v25, %v5695_v39  ;;  %v15513_v19 = vpop.f32.mrf.mxu0  ;;  %v1694_v39 = vadd.f32 %v16878_v32, %v1361_v24  ;;  %v2029_v25 = vadd.f32 %v16879_v48, %v1696_v35 }
 0x256   :  { %v13733_v42 = vpop.f32.mrf.mxu1 }
 0x257   :  { %v15520_v60 = vpop.f32.mrf.mxu0  ;;  %v2027_v2 = vadd.f32 %v16880_v16, %v1694_v39  ;;  %v2362_v7 = vadd.f32 %v16881_v38, %v2029_v25 }
 0x259   :  { %v2360_v41 = vadd.f32 %v16882_v61, %v2027_v2 }
 0x25b   :  { %v2693_v35 = vadd.f32 %v15280_v17, %v2360_v41 }
 0x25d   :  { %v15518_v36 = vpop.f32.mrf.mxu1  ;;  %v3026_v16 = vadd.f32 %v15337_v13, %v2693_v35 }
 0x25f   :  { %v15524_v3 = vpop.f32.mrf.mxu1  ;;  %v3359_v17 = vadd.f32 %v15409_v55, %v3026_v16 }
 0x260   :  { %v15526_v6 = vpop.f32.mrf.mxu0 }
 0x261   :  { %v3692_v35 = vadd.f32 %v15444_v29, %v3359_v17 }
 0x262   :  { %v15530_v62 = vpop.f32.mrf.mxu0 }
 0x263   :  { %v4025_v54 = vadd.f32 %v15451_v14, %v3692_v35 }
 0x264   :  { %v6351_v33 = vpop.f32.mrf.mxu1 }
 0x265   :  { %v6361_v22 = vadd.f32 %v6351_v33, %v6028_v63  ;;  %v15534_v42 = vpop.f32.mrf.mxu0  ;;  %v2695_v33 = vadd.f32 %v16883_v15, %v2362_v7 }
 0x266   :  { %v13738_v58 = vpop.f32.mrf.mxu1 }
 0x267   :  { %v15538_v21 = vpop.f32.mrf.mxu0  ;;  %v3028_v39 = vadd.f32 %v15329_v8, %v2695_v33 }
 0x269   :  { %v3361_v38 = vadd.f32 %v15401_v47, %v3028_v39 }
 0x26b   :  { %v3694_v8 = vadd.f32 %v15442_v45, %v3361_v38  ;;  %v4358_v45 = vadd.f32 %v15459_v40, %v4025_v54 }
 0x26d   :  { %v15540_v49 = vpop.f32.mrf.mxu1  ;;  %v4027_v39 = vadd.f32 %v15449_v5, %v3694_v8  ;;  %v4691_v29 = vadd.f32 %v15465_v9, %v4358_v45 }
 0x26f   :  { %v15546_v27 = vpop.f32.mrf.mxu1  ;;  %v4360_v55 = vadd.f32 %v15457_v31, %v4027_v39  ;;  %v5024_v8 = vadd.f32 %v15475_v12, %v4691_v29  ;;  %v5356_v31 = vadd.f32 %v15483_v52, %v15471_v51  ;;  %v6024_v51 = vadd.f32 %v15501_v4, %v15487_v23 }
 0x270   :  { %v15542_v63 = vpop.f32.mrf.mxu0 }
 0x271   :  { %v4693_v38 = vadd.f32 %v15463_v26, %v4360_v55  ;;  %v5027_v26 = vadd.f32 %v15477_v28, %v15467_v37  ;;  %v5689_v9 = vadd.f32 %v15495_v44, %v5356_v31  ;;  %v6357_v45 = vadd.f32 %v15518_v36, %v6024_v51 }
 0x272   :  { %v15548_v24 = vpop.f32.mrf.mxu0 }
 0x273   :  { %v5026_v17 = vadd.f32 %v15473_v1, %v4693_v38  ;;  %v5028_v1 = vadd.f32 %v15481_v50, %v15469_v11  ;;  %v6022_v37 = vadd.f32 %v15507_v56, %v5689_v9 }
 0x274   :  { %v6684_v20 = vpop.f32.mrf.mxu1 }
 0x275   :  { %v6694_v58 = vadd.f32 %v6684_v20, %v6361_v22  ;;  %v15551_v32 = vpop.f32.mrf.mxu0  ;;  %v5359_v54 = vadd.f32 %v15479_v18, %v5026_v17  ;;  %v5360_v18 = vadd.f32 %v15489_v59, %v5027_v26  ;;  %v6355_v4 = vadd.f32 %v15526_v6, %v6022_v37 }
 0x276   :  { %v13743_v48 = vpop.f32.mrf.mxu1 }
 0x277   :  { %v15554_v25 = vpop.f32.mrf.mxu0  ;;  %v5692_v12 = vadd.f32 %v15491_v34, %v5359_v54  ;;  %v5693_v34 = vadd.f32 %v15499_v10, %v5360_v18  ;;  %v6688_v38 = vadd.f32 %v15542_v63, %v6355_v4 }
 0x278   :  { %16884 = vst [vmem:[#allocation8_spill] sm:$0xff] %v15554_v25 }
 0x279   :  { %v15557_v2 = vpop.f32.mrf.mxu1  ;;  %v6025_v44 = vadd.f32 %v15505_v57, %v5692_v12  ;;  %v6026_v57 = vadd.f32 %v15513_v19, %v5693_v34 }
 0x27a   :  { %v15560_v7 = vpop.f32.mrf.mxu0 }
 0x27b   :  { %v15562_v61 = vpop.f32.mrf.mxu1  ;;  %v6358_v56 = vadd.f32 %v15524_v3, %v6025_v44 }
 0x27c   :  { %v15564_v15 = vpop.f32.mrf.mxu0 }
 0x27d   :  { %v6981_v22 = vpop.f32.mrf.mxu1 }
 0x27e   :  { %v6991_v41 = vadd.f32 %v6981_v22, %v6694_v58  ;;  %v15568_v33 = vpop.f32.mrf.mxu0 }
 0x27f   :  { %v13748_v20 = vpop.f32.mrf.mxu1  ;;  %v16885_v31 = vld [vmem:[#allocation8_spill] sm:$0xff] }
 0x280   :  { %v15570_v13 = vpop.f32.mrf.mxu0 }
 0x281   :  { %v7140_v47 = vpop.f32.mrf.mxu1 }
 0x282   :  { %v7069_v48 = vpop.f32.mrf.mxu0 }
 0x283   :  { %v15575_v25 = vpop.f32.mrf.mxu1 }
 0x284   :  { %v15578_v16 = vpop.f32.mrf.mxu0 }
 0x285   :  { %v7282_v58 = vpop.f32.mrf.mxu1 }
 0x286   :  { %v7292_v22 = vadd.f32 %v7282_v58, %v6991_v41  ;;  %v15582_v20 = vpop.f32.mrf.mxu0  ;;  %v5357_v41 = vadd.f32 %v15485_v46, %v5024_v8  ;;  %v5361_v46 = vadd.f32 %v15493_v30, %v5028_v1  ;;  %v6690_v58 = vadd.f32 %v15540_v49, %v6357_v45 }
 0x287   :  { %v13753_v5 = vpop.f32.mrf.mxu1  ;;  %v6985_v49 = vadd.f32 %v15560_v7, %v6688_v38 }
 0x288   :  { %v15586_v14 = vpop.f32.mrf.mxu0  ;;  %v5690_v55 = vadd.f32 %v15497_v43, %v5357_v41  ;;  %v5694_v43 = vadd.f32 %v15503_v53, %v5361_v46  ;;  %v6987_v6 = vadd.f32 %v15557_v2, %v6690_v58  ;;  %v6359_v53 = vadd.f32 %v15534_v42, %v6026_v57 }
 0x289   :  { %v7440_v35 = vpop.f32.mrf.mxu1  ;;  %v7286_v8 = vadd.f32 %v7069_v48, %v6985_v49 }
 0x28a   :  { %v7369_v40 = vpop.f32.mrf.mxu0  ;;  %v6023_v23 = vadd.f32 %v15509_v0, %v5690_v55  ;;  %v6027_v10 = vadd.f32 %v15520_v60, %v5694_v43  ;;  %v6691_v0 = vadd.f32 %v15546_v27, %v6358_v56  ;;  %v7288_v63 = vadd.f32 %v7140_v47, %v6987_v6 }
 0x28b   :  { %v7442_v39 = vpop.f32.mrf.mxu1  ;;  %v6692_v60 = vadd.f32 %v15551_v32, %v6359_v53 }
 0x28c   :  { %v7371_v52 = vpop.f32.mrf.mxu0  ;;  %v6356_v36 = vadd.f32 %v15530_v62, %v6023_v23  ;;  %v6360_v19 = vadd.f32 %v15538_v21, %v6027_v10  ;;  %v6988_v62 = vadd.f32 %v15562_v61, %v6691_v0  ;;  %v7586_v61 = vadd.f32 %v7369_v40, %v7286_v8  ;;  %v8322_v8 = vld [vmem:[#allocation2 + $0xd8] sm:$0xff] }
 0x28d   :  { %v7582_v28 = vpop.f32.mrf.mxu1  ;;  %v6989_v41 = vadd.f32 %v15568_v33, %v6692_v60  ;;  %v15633_v33 = vpop.permute.xlu0 %8196  ;;  %v8323_v60 = vld [vmem:[#allocation2 + $0xe0] sm:$0xff] }
 0x28e   :  { %v7592_v11 = vadd.f32 %v7582_v28, %v7292_v22  ;;  %v7511_v50 = vpop.f32.mrf.mxu0  ;;  %v6689_v3 = vadd.f32 %v15548_v24, %v6356_v36  ;;  %v6693_v54 = vadd.f32 %v16885_v31, %v6360_v19  ;;  %v7289_v42 = vadd.f32 %v15575_v25, %v6988_v62  ;;  %v8325_v19 = vld [vmem:[#allocation2 + $0xf0] sm:$0xff]  ;;  %v8324_v62 = vld [vmem:[#allocation2 + $0xe8] sm:$0xff] }
 0x28f   :  { %v13758_v59 = vpop.f32.mrf.mxu1  ;;  %v7588_v24 = vadd.f32 %v7440_v35, %v7288_v63  ;;  %v7290_v48 = vadd.f32 %v15582_v20, %v6989_v41  ;;  %v8390_v63 = vld [vmem:[#allocation2 + $0x2f8] sm:$0xff]  ;;  %v8321_v31 = vld [vmem:[#allocation2 + $0xd0] sm:$0xff] }
 0x290   :  { %v7513_v30 = vpop.f32.mrf.mxu0  ;;  %v6986_v27 = vadd.f32 %v15564_v15, %v6689_v3  ;;  %v6990_v9 = vadd.f32 %v15570_v13, %v6693_v54  ;;  %v7589_v32 = vadd.f32 %v7442_v39, %v7289_v42  ;;  %8592 = vmatprep.subr.mxu1 %v8390_v63  ;;  %v8386_v54 = vld [vmem:[#allocation2 + $0x2d8] sm:$0xff]  ;;  %v8320_v42 = vld [vmem:[#allocation2 + $0xc8] sm:$0xff]  ;;  %v8299_v63 = vld [vmem:[#allocation2 + $0x20] sm:$0xff] }
 0x291   :  { %v7740_v22 = vpop.f32.mrf.mxu1  ;;  %v8318_v41 = vld [vmem:[#allocation2 + $0xb8] sm:$0xff] }
 0x292   :  { %v7669_v29 = vpop.f32.mrf.mxu0  ;;  %v7287_v21 = vadd.f32 %v15578_v16, %v6986_v27  ;;  %v7888_v1 = vadd.f32 %v7740_v22, %v7588_v24  ;;  %v7291_v25 = vadd.f32 %v15586_v14, %v6990_v9  ;;  %v7590_v16 = vadd.f32 %v7511_v50, %v7290_v48  ;;  %v8388_v27 = vld [vmem:[#allocation2 + $0x2e8] sm:$0xff]  ;;  %v8385_v24 = vld [vmem:[#allocation2 + $0x2d0] sm:$0xff]  ;;  %v8314_v48 = vld [vmem:[#allocation2 + $0x98] sm:$0xff] }
 0x293   :  { %v7742_v5 = vpop.f32.mrf.mxu1  ;;  %v7886_v51 = vadd.f32 %v7669_v29, %v7586_v61  ;;  %v8317_v61 = vld [vmem:[#allocation2 + $0xb0] sm:$0xff]  ;;  %v8316_v9 = vld [vmem:[#allocation2 + $0xa8] sm:$0xff] }
 0x294   :  { %v7671_v17 = vpop.f32.mrf.mxu0  ;;  %v7587_v12 = vadd.f32 %v7371_v52, %v7287_v21  ;;  %v7889_v35 = vadd.f32 %v7742_v5, %v7589_v32  ;;  %v7591_v13 = vadd.f32 %v7513_v30, %v7291_v25  ;;  %v8326_v5 = vld [vmem:[#allocation2 + $0xf8] sm:$0xff]  ;;  %v8383_v21 = vld [vmem:[#allocation2 + $0x2c0] sm:$0xff]  ;;  %v8381_v32 = vld [vmem:[#allocation2 + $0x2b0] sm:$0xff] }
 0x295   :  { %v7882_v2 = vpop.f32.mrf.mxu1  ;;  %8521 = vmatprep.subr.mxu0 %v8326_v5  ;;  %v8312_v25 = vld [vmem:[#allocation2 + $0x88] sm:$0xff]  ;;  %v8366_v5 = vld [vmem:[#allocation2 + $0x238] sm:$0xff] }
 0x296   :  { %v7892_v26 = vadd.f32 %v7882_v2, %v7592_v11  ;;  %v7811_v7 = vpop.f32.mrf.mxu0  ;;  %v7887_v40 = vadd.f32 %v7671_v17, %v7587_v12  ;;  %v8389_v17 = vld [vmem:[#allocation2 + $0x2f0] sm:$0xff]  ;;  %8522 = vmatpush1.msra.mxu0 %v8325_v19  ;;  %v8387_v2 = vld [vmem:[#allocation2 + $0x2e0] sm:$0xff]  ;;  %v8300_v19 = vld [vmem:[#allocation2 + $0x28] sm:$0xff] }
 0x297   :  { %v13763_v47 = vpop.f32.mrf.mxu1  ;;  %v7890_v45 = vadd.f32 %v7811_v7, %v7590_v16  ;;  %8523 = vmatprep.subr.mxu0 %v8324_v62  ;;  %8593 = vmatpush1.msra.mxu1 %v8389_v17  ;;  %v8384_v7 = vld [vmem:[#allocation2 + $0x2c8] sm:$0xff]  ;;  %v8379_v12 = vld [vmem:[#allocation2 + $0x2a0] sm:$0xff]  ;;  %v8310_v16 = vld [vmem:[#allocation2 + $0x78] sm:$0xff] }
 0x298   :  { %v7813_v15 = vpop.f32.mrf.mxu0  ;;  %8524 = vmatpush1.msra.mxu0 %v8323_v60  ;;  %8594 = vmatprep.subr.mxu1 %v8388_v27  ;;  %v8382_v47 = vld [vmem:[#allocation2 + $0x2b8] sm:$0xff]  ;;  %v8365_v62 = vld [vmem:[#allocation2 + $0x230] sm:$0xff]  ;;  %v8364_v17 = vld [vmem:[#allocation2 + $0x228] sm:$0xff] }
 0x299   :  { %v8040_v18 = vpop.f32.mrf.mxu1  ;;  %v7891_v34 = vadd.f32 %v7813_v15, %v7591_v13  ;;  %8525 = vmatprep.subr.mxu0 %v8322_v8  ;;  %8595 = vmatpush1.msra.mxu1 %v8387_v2  ;;  %v8380_v15 = vld [vmem:[#allocation2 + $0x2a8] sm:$0xff]  ;;  %v8298_v60 = vld [vmem:[#allocation2 + $0x18] sm:$0xff]  ;;  %v8363_v27 = vld [vmem:[#allocation2 + $0x220] sm:$0xff] }
 0x29a   :  { %v8188_v55 = vadd.f32 %v8040_v18, %v7888_v1  ;;  %v7969_v37 = vpop.f32.mrf.mxu0  ;;  %8526 = vmatpush1.msra.mxu0 %v8321_v31  ;;  %8596 = vmatprep.subr.mxu1 %v8386_v54  ;;  %v8315_v1 = vld [vmem:[#allocation2 + $0xa0] sm:$0xff]  ;;  %v8378_v18 = vld [vmem:[#allocation2 + $0x298] sm:$0xff]  ;;  %v8308_v13 = vld [vmem:[#allocation2 + $0x68] sm:$0xff] }
 0x29b   :  { %v8186_v28 = vadd.f32 %v7969_v37, %v7886_v51  ;;  %v8042_v46 = vpop.f32.mrf.mxu1  ;;  %8527 = vmatprep.subr.mxu0 %v8320_v42  ;;  %8597 = vmatpush1.msra.mxu1 %v8385_v24  ;;  %v8313_v51 = vld [vmem:[#allocation2 + $0x90] sm:$0xff]  ;;  %v8376_v37 = vld [vmem:[#allocation2 + $0x288] sm:$0xff]  ;;  %v8362_v2 = vld [vmem:[#allocation2 + $0x218] sm:$0xff] }
 0x29c   :  { %v8189_v39 = vadd.f32 %v8042_v46, %v7889_v35  ;;  %v7971_v44 = vpop.f32.mrf.mxu0  ;;  %v15636_v20 = vadd.f32 %v15633_v33, %v8188_v55  ;;  %8598 = vmatprep.subr.mxu1 %v8384_v7  ;;  %v8377_v35 = vld [vmem:[#allocation2 + $0x290] sm:$0xff]  ;;  %v8311_v55 = vld [vmem:[#allocation2 + $0x80] sm:$0xff]  ;;  %v8374_v46 = vld [vmem:[#allocation2 + $0x278] sm:$0xff] }
 0x29d   :  { %v8187_v11 = vadd.f32 %v7971_v44, %v7887_v40  ;;  %v8182_v52 = vpop.f32.mrf.mxu1  ;;  %v15644_v59 = vadd.f32 %v15633_v33, %v8186_v28  ;;  %8599 = vmatpush1.msra.mxu1 %v8383_v21  ;;  %v8375_v40 = vld [vmem:[#allocation2 + $0x280] sm:$0xff]  ;;  %v8309_v28 = vld [vmem:[#allocation2 + $0x70] sm:$0xff]  ;;  %v8296_v31 = vld [vmem:[#allocation2 + $0x8] sm:$0xff] }
 0x29e   :  { %v15638_v14 = vadd.f32 %v8182_v52, %v7892_v26  ;;  %v8111_v23 = vpop.f32.mrf.mxu0  ;;  %v15647_v43 = vadd.f32 %v15633_v33, %v8189_v39  ;;  %v8208_v57 = vmax.f32 %v15636_v20, 0.0  ;;  %v8319_v26 = vld [vmem:[#allocation2 + $0xc0] sm:$0xff]  ;;  %8600 = vmatprep.subr.mxu1 %v8382_v47  ;;  %v8373_v39 = vld [vmem:[#allocation2 + $0x270] sm:$0xff]  ;;  %v8360_v24 = vld [vmem:[#allocation2 + $0x208] sm:$0xff] }
 0x29f   :  { %v15641_v4 = vadd.f32 %v15633_v33, %v8187_v11  ;;  %v8190_v50 = vadd.f32 %v8111_v23, %v7890_v45  ;;  %v13768_v56 = vpop.f32.mrf.mxu1  ;;  %v8206_v0 = vmax.f32 %v15644_v59, 0.0  ;;  %8528 = vmatpush1.msra.mxu0 %v8319_v26  ;;  %8601 = vmatpush1.msra.mxu1 %v8381_v32  ;;  %v8307_v44 = vld [vmem:[#allocation2 + $0x60] sm:$0xff]  ;;  %v8372_v45 = vld [vmem:[#allocation2 + $0x268] sm:$0xff]  ;;  %v8306_v11 = vld [vmem:[#allocation2 + $0x58] sm:$0xff] }
 0x2a0   :  { %v8113_v58 = vpop.f32.mrf.mxu0  ;;  %v8209_v6 = vmax.f32 %v15647_v43, 0.0  ;;  %8529 = vmatprep.subr.mxu0 %v8318_v41  ;;  %8602 = vmatprep.subr.mxu1 %v8380_v15  ;;  %v8371_v52 = vld [vmem:[#allocation2 + $0x260] sm:$0xff]  ;;  %v8370_v23 = vld [vmem:[#allocation2 + $0x258] sm:$0xff]  ;;  %v8369_v56 = vld [vmem:[#allocation2 + $0x250] sm:$0xff] }
 0x2a1   :  { %v8207_v30 = vmax.f32 %v15641_v4, 0.0  ;;  %v15652_v36 = vadd.f32 %v15633_v33, %v8190_v50  ;;  %v8191_v38 = vadd.f32 %v8113_v58, %v7891_v34  ;;  %8530 = vmatpush1.msra.mxu0 %v8317_v61  ;;  %8603 = vmatpush1.msra.mxu1 %v8379_v12  ;;  %v8305_v34 = vld [vmem:[#allocation2 + $0x50] sm:$0xff]  ;;  %v8304_v50 = vld [vmem:[#allocation2 + $0x48] sm:$0xff]  ;;  %v8303_v58 = vld [vmem:[#allocation2 + $0x40] sm:$0xff] }
 0x2a2   :  { %v14089_v49 = vpack.i.bf16 %v8206_v0, %v8209_v6  ;;  %8531 = vmatprep.subr.mxu0 %v8316_v9  ;;  %8604 = vmatprep.subr.mxu1 %v8378_v18  ;;  %v8297_v8 = vld [vmem:[#allocation2 + $0x10] sm:$0xff]  ;;  %v8295_v42 = vld [vmem:[#allocation2] sm:$0xff]  ;;  %v8358_v26 = vld [vmem:[#allocation2 + $0x1f8] sm:$0xff] }
 0x2a3   :  { %v14084_v22 = vpack.i.bf16 %v8208_v57, %v8207_v30  ;;  %v15659_v10 = vadd.f32 %v15633_v33, %v8191_v38  ;;  %v8210_v29 = vmax.f32 %v15652_v36, 0.0  ;;  %8532 = vmatpush1.msra.mxu0 %v8315_v1  ;;  %8605 = vmatpush1.msra.mxu1 %v8377_v35  ;;  %v8368_v38 = vld [vmem:[#allocation2 + $0x248] sm:$0xff]  ;;  %v8361_v54 = vld [vmem:[#allocation2 + $0x210] sm:$0xff]  ;;  %v8359_v7 = vld [vmem:[#allocation2 + $0x200] sm:$0xff] }
 0x2a4   :  { %8533 = vmatprep.subr.mxu0 %v8314_v48  ;;  %8606 = vmatprep.subr.mxu1 %v8376_v37  ;;  %v8357_v41 = vld [vmem:[#allocation2 + $0x1f0] sm:$0xff]  ;;  %v8422_v21 = vld [vmem:[#allocation2 + $0x3f8] sm:$0xff]  ;;  %v8356_v61 = vld [vmem:[#allocation2 + $0x1e8] sm:$0xff] }
 0x2a5   :  { %v8211_v53 = vmax.f32 %v15659_v10, 0.0  ;;  %14085 = vrot.lane.b32.xlu1 %v14084_v22, %s14166_s19  ;;  %8534 = vmatpush1.msra.mxu0 %v8313_v51  ;;  %v8302_v22 = vld [vmem:[#allocation2 + $0x38] sm:$0xff]  ;;  %v8421_v47 = vld [vmem:[#allocation2 + $0x3f0] sm:$0xff]  ;;  %v8355_v9 = vld [vmem:[#allocation2 + $0x1e0] sm:$0xff] }
 0x2a6   :  { %8535 = vmatprep.subr.mxu0 %v8312_v25  ;;  %8607 = vmatpush1.msra.mxu1 %v8375_v40  ;;  %v8420_v32 = vld [vmem:[#allocation2 + $0x3e8] sm:$0xff]  ;;  %v8354_v1 = vld [vmem:[#allocation2 + $0x1d8] sm:$0xff]  ;;  %v8419_v15 = vld [vmem:[#allocation2 + $0x3e0] sm:$0xff] }
 0x2a7   :  { %v14094_v3 = vpack.i.bf16 %v8211_v53, %v8210_v29  ;;  %8536 = vmatpush1.msra.mxu0 %v8311_v55  ;;  %8608 = vmatprep.subr.mxu1 %v8374_v46  ;;  %v8353_v48 = vld [vmem:[#allocation2 + $0x1d0] sm:$0xff]  ;;  %v8418_v12 = vld [vmem:[#allocation2 + $0x3d8] sm:$0xff]  ;;  %v8352_v51 = vld [vmem:[#allocation2 + $0x1c8] sm:$0xff] }
 0x2a8   :  { %8537 = vmatprep.subr.mxu0 %v8310_v16  ;;  %8609 = vmatpush1.msra.mxu1 %v8373_v39  ;;  %v8417_v18 = vld [vmem:[#allocation2 + $0x3d0] sm:$0xff]  ;;  %v8351_v25 = vld [vmem:[#allocation2 + $0x1c0] sm:$0xff]  ;;  %v8416_v35 = vld [vmem:[#allocation2 + $0x3c8] sm:$0xff] }
 0x2a9   :  { %14095 = vrot.lane.b32.xlu0 %v14094_v3, %s14166_s19  ;;  %14090 = vrot.lane.b32.xlu1 %v14089_v49, %s14166_s19  ;;  %v8367_v3 = vld [vmem:[#allocation2 + $0x240] sm:$0xff]  ;;  %v8301_v49 = vld [vmem:[#allocation2 + $0x30] sm:$0xff]  ;;  %v8350_v55 = vld [vmem:[#allocation2 + $0x1b8] sm:$0xff] }
 0x2aa   :  { %8538 = vmatpush1.msra.mxu0 %v8309_v28  ;;  %8610 = vmatprep.subr.mxu1 %v8372_v45  ;;  %v8415_v37 = vld [vmem:[#allocation2 + $0x3c0] sm:$0xff]  ;;  %v8349_v16 = vld [vmem:[#allocation2 + $0x1b0] sm:$0xff]  ;;  %v8414_v40 = vld [vmem:[#allocation2 + $0x3b8] sm:$0xff] }
 0x2ab   :  { %8539 = vmatprep.subr.mxu0 %v8308_v13  ;;  %8611 = vmatpush1.msra.mxu1 %v8371_v52  ;;  %v8348_v28 = vld [vmem:[#allocation2 + $0x1a8] sm:$0xff]  ;;  %v8413_v46 = vld [vmem:[#allocation2 + $0x3b0] sm:$0xff]  ;;  %v8347_v13 = vld [vmem:[#allocation2 + $0x1a0] sm:$0xff] }
 0x2ac   :  { %8540 = vmatpush1.msra.mxu0 %v8307_v44  ;;  %8612 = vmatprep.subr.mxu1 %v8370_v23  ;;  %v8412_v39 = vld [vmem:[#allocation2 + $0x3a8] sm:$0xff]  ;;  %v8346_v44 = vld [vmem:[#allocation2 + $0x198] sm:$0xff]  ;;  %v8411_v45 = vld [vmem:[#allocation2 + $0x3a0] sm:$0xff] }
 0x2ad   :  { %8541 = vmatprep.subr.mxu0 %v8306_v11  ;;  %8613 = vmatpush1.msra.mxu1 %v8369_v56  ;;  %v8345_v11 = vld [vmem:[#allocation2 + $0x190] sm:$0xff]  ;;  %v8410_v52 = vld [vmem:[#allocation2 + $0x398] sm:$0xff]  ;;  %v8408_v56 = vld [vmem:[#allocation2 + $0x388] sm:$0xff] }
 0x2ae   :  { %8542 = vmatpush1.msra.mxu0 %v8305_v34  ;;  %8614 = vmatprep.subr.mxu1 %v8368_v38  ;;  %v8344_v34 = vld [vmem:[#allocation2 + $0x188] sm:$0xff]  ;;  %v8409_v23 = vld [vmem:[#allocation2 + $0x390] sm:$0xff]  ;;  %v8407_v38 = vld [vmem:[#allocation2 + $0x380] sm:$0xff] }
 0x2af   :  { %8543 = vmatprep.subr.mxu0 %v8304_v50  ;;  %8615 = vmatpush1.msra.mxu1 %v8367_v3  ;;  %v8343_v50 = vld [vmem:[#allocation2 + $0x180] sm:$0xff]  ;;  %v8406_v3 = vld [vmem:[#allocation2 + $0x378] sm:$0xff] }
 0x2b0   :  { %8544 = vmatpush1.msra.mxu0 %v8303_v58  ;;  %8616 = vmatprep.subr.mxu1 %v8366_v5  ;;  %v8342_v58 = vld [vmem:[#allocation2 + $0x178] sm:$0xff]  ;;  %v8405_v5 = vld [vmem:[#allocation2 + $0x370] sm:$0xff] }
 0x2b1   :  { %8545 = vmatprep.subr.mxu0 %v8302_v22  ;;  %8617 = vmatpush1.msra.mxu1 %v8365_v62  ;;  %v8341_v22 = vld [vmem:[#allocation2 + $0x170] sm:$0xff]  ;;  %v8404_v62 = vld [vmem:[#allocation2 + $0x368] sm:$0xff]  ;;  %v8510_v20 = vld [vmem:[#allocation2 + $0x6b8] sm:$0x7] }
 0x2b2   :  { %8546 = vmatpush1.msra.mxu0 %v8301_v49  ;;  %8618 = vmatprep.subr.mxu1 %v8364_v17  ;;  %v8340_v49 = vld [vmem:[#allocation2 + $0x168] sm:$0xff]  ;;  %v8403_v17 = vld [vmem:[#allocation2 + $0x360] sm:$0xff]  ;;  %v8450_v10 = vld [vmem:[#allocation2 + $0x4d8] sm:$0xff] }
 0x2b3   :  { %8547 = vmatprep.subr.mxu0 %v8300_v19  ;;  %8619 = vmatpush1.msra.mxu1 %v8363_v27  ;;  %v8339_v19 = vld [vmem:[#allocation2 + $0x160] sm:$0xff]  ;;  %v8402_v27 = vld [vmem:[#allocation2 + $0x358] sm:$0xff] }
 0x2b4   :  { %8548 = vmatpush1.msra.mxu0 %v8299_v63  ;;  %8620 = vmatprep.subr.mxu1 %v8362_v2  ;;  %v8338_v63 = vld [vmem:[#allocation2 + $0x158] sm:$0xff]  ;;  %v8401_v2 = vld [vmem:[#allocation2 + $0x350] sm:$0xff] }
 0x2b5   :  { %8549 = vmatprep.subr.mxu0 %v8298_v60  ;;  %8621 = vmatpush1.msra.mxu1 %v8361_v54  ;;  %v8337_v60 = vld [vmem:[#allocation2 + $0x150] sm:$0xff]  ;;  %v8334_v54 = vld [vmem:[#allocation2 + $0x138] sm:$0xff] }
 0x2b6   :  { %8550 = vmatpush1.msra.mxu0 %v8297_v8  ;;  %8622 = vmatprep.subr.mxu1 %v8360_v24  ;;  %v8336_v8 = vld [vmem:[#allocation2 + $0x148] sm:$0xff]  ;;  %v8333_v24 = vld [vmem:[#allocation2 + $0x130] sm:$0xff] }
 0x2b7   :  { %8551 = vmatprep.subr.mxu0 %v8296_v31  ;;  %8623 = vmatpush1.msra.mxu1 %v8359_v7  ;;  %v8335_v31 = vld [vmem:[#allocation2 + $0x140] sm:$0xff]  ;;  %v8332_v7 = vld [vmem:[#allocation2 + $0x128] sm:$0xff] }
 0x2b8   :  { %8552 = vmatpush1.msra.mxu0 %v8295_v42  ;;  %8624 = vmatprep.subr.mxu1 %v8422_v21  ;;  %v8400_v42 = vld [vmem:[#allocation2 + $0x348] sm:$0xff] }
 0x2b9   :  { %8553 = vmatprep.subr.mxu0 %v8358_v26  ;;  %8625 = vmatpush2.msra.mxu1 %v8421_v47  ;;  %v8399_v26 = vld [vmem:[#allocation2 + $0x340] sm:$0xff]  ;;  %v8397_v47 = vld [vmem:[#allocation2 + $0x330] sm:$0xff] }
 0x2ba   :  { %8554 = vmatpush2.msra.mxu0 %v8357_v41  ;;  %8626 = vmatprep.subr.mxu1 %v8420_v32  ;;  %v8398_v41 = vld [vmem:[#allocation2 + $0x338] sm:$0xff] }
 0x2bb   :  { %8555 = vmatprep.subr.mxu0 %v8356_v61  ;;  %8627 = vmatpush2.msra.mxu1 %v8419_v15  ;;  %v8331_v61 = vld [vmem:[#allocation2 + $0x120] sm:$0xff]  ;;  %v8396_v15 = vld [vmem:[#allocation2 + $0x328] sm:$0xff] }
 0x2bc   :  { %8556 = vmatpush2.msra.mxu0 %v8355_v9  ;;  %8628 = vmatprep.subr.mxu1 %v8418_v12  ;;  %v8395_v12 = vld [vmem:[#allocation2 + $0x320] sm:$0xff] }
 0x2bd   :  { %8557 = vmatprep.subr.mxu0 %v8354_v1  ;;  %8629 = vmatpush2.msra.mxu1 %v8417_v18  ;;  %v8330_v1 = vld [vmem:[#allocation2 + $0x118] sm:$0xff]  ;;  %v8328_v18 = vld [vmem:[#allocation2 + $0x108] sm:$0xff] }
 0x2be   :  { %8558 = vmatpush2.msra.mxu0 %v8353_v48  ;;  %8630 = vmatprep.subr.mxu1 %v8416_v35  ;;  %v8329_v48 = vld [vmem:[#allocation2 + $0x110] sm:$0xff] }
 0x2bf   :  { %8559 = vmatprep.subr.mxu0 %v8352_v51  ;;  %8631 = vmatpush2.msra.mxu1 %v8415_v37  ;;  %v8327_v37 = vld [vmem:[#allocation2 + $0x100] sm:$0xff] }
 0x2c0   :  { %8560 = vmatpush2.msra.mxu0 %v8351_v25  ;;  %8632 = vmatprep.subr.mxu1 %v8414_v40  ;;  %v8394_v25 = vld [vmem:[#allocation2 + $0x318] sm:$0xff]  ;;  %v8392_v40 = vld [vmem:[#allocation2 + $0x308] sm:$0xff] }
 0x2c1   :  { %8561 = vmatprep.subr.mxu0 %v8350_v55  ;;  %8633 = vmatpush2.msra.mxu1 %v8413_v46 }
 0x2c2   :  { %8562 = vmatpush2.msra.mxu0 %v8349_v16  ;;  %8634 = vmatprep.subr.mxu1 %v8412_v39  ;;  %v8393_v16 = vld [vmem:[#allocation2 + $0x310] sm:$0xff] }
 0x2c3   :  { %8563 = vmatprep.subr.mxu0 %v8348_v28  ;;  %8635 = vmatpush2.msra.mxu1 %v8411_v45 }
 0x2c4   :  { %8564 = vmatpush2.msra.mxu0 %v8347_v13  ;;  %8636 = vmatprep.subr.mxu1 %v8410_v52 }
 0x2c5   :  { %8565 = vmatprep.subr.mxu0 %v8346_v44  ;;  %8637 = vmatpush2.msra.mxu1 %v8409_v23  ;;  %v8391_v44 = vld [vmem:[#allocation2 + $0x300] sm:$0xff] }
 0x2c6   :  { %8566 = vmatpush2.msra.mxu0 %v8345_v11  ;;  %8638 = vmatprep.subr.mxu1 %v8408_v56 }
 0x2c7   :  { %8567 = vmatprep.subr.mxu0 %v8344_v34  ;;  %8639 = vmatpush2.msra.mxu1 %v8407_v38  ;;  %v8205_v38 = vadd.f32 %v15633_v33, %v15638_v14 }
 0x2c8   :  { %8568 = vmatpush2.msra.mxu0 %v8343_v50  ;;  %8640 = vmatprep.subr.mxu1 %v8406_v3  ;;  %v8454_v50 = vld [vmem:[#allocation2 + $0x4f8] sm:$0xff] }
 0x2c9   :  { %8569 = vmatprep.subr.mxu0 %v8342_v58  ;;  %8641 = vmatpush2.msra.mxu1 %v8405_v5 }
 0x2ca   :  { %8570 = vmatpush2.msra.mxu0 %v8341_v22  ;;  %8642 = vmatprep.subr.mxu1 %v8404_v62 }
 0x2cb   :  { %8571 = vmatprep.subr.mxu0 %v8340_v49  ;;  %8643 = vmatpush2.msra.mxu1 %v8403_v17 }
 0x2cc   :  { %8572 = vmatpush2.msra.mxu0 %v8339_v19  ;;  %8644 = vmatprep.subr.mxu1 %v8402_v27 }
 0x2cd   :  { %8573 = vmatprep.subr.mxu0 %v8338_v63  ;;  %8645 = vmatpush2.msra.mxu1 %v8401_v2 }
 0x2ce   :  { %8574 = vmatpush2.msra.mxu0 %v8337_v60  ;;  %8646 = vmatprep.subr.mxu1 %v8400_v42  ;;  %v8452_v42 = vld [vmem:[#allocation2 + $0x4e8] sm:$0xff] }
 0x2cf   :  { %8575 = vmatprep.subr.mxu0 %v8336_v8  ;;  %8647 = vmatpush2.msra.mxu1 %v8399_v26  ;;  %v8451_v26 = vld [vmem:[#allocation2 + $0x4e0] sm:$0xff] }
 0x2d0   :  { %8576 = vmatpush2.msra.mxu0 %v8335_v31  ;;  %8648 = vmatprep.subr.mxu1 %v8398_v41  ;;  %v8449_v41 = vld [vmem:[#allocation2 + $0x4d0] sm:$0xff] }
 0x2d1   :  { %8577 = vmatprep.subr.mxu0 %v8334_v54  ;;  %8649 = vmatpush2.msra.mxu1 %v8397_v47  ;;  %v8453_v54 = vld [vmem:[#allocation2 + $0x4f0] sm:$0xff] }
 0x2d2   :  { %8578 = vmatpush2.msra.mxu0 %v8333_v24  ;;  %8650 = vmatprep.subr.mxu1 %v8396_v15  ;;  %v8509_v24 = vld [vmem:[#allocation2 + $0x6b0] sm:$0x7]  ;;  %v8503_v15 = vld [vmem:[#allocation2 + $0x680] sm:$0xff] }
 0x2d3   :  { %8579 = vmatprep.subr.mxu0 %v8332_v7  ;;  %8651 = vmatpush2.msra.mxu1 %v8395_v12  ;;  %v8508_v7 = vld [vmem:[#allocation2 + $0x6a8] sm:$0xff]  ;;  %v8505_v47 = vld [vmem:[#allocation2 + $0x690] sm:$0xff]  ;;  %v8502_v12 = vld [vmem:[#allocation2 + $0x678] sm:$0xff] }
 0x2d4   :  { %8580 = vmatpush2.msra.mxu0 %v8331_v61  ;;  %8652 = vmatprep.subr.mxu1 %v8394_v25  ;;  %v8448_v61 = vld [vmem:[#allocation2 + $0x4c8] sm:$0xff]  ;;  %v8443_v25 = vld [vmem:[#allocation2 + $0x4a0] sm:$0xff] }
 0x2d5   :  { %8581 = vmatprep.subr.mxu0 %v8330_v1  ;;  %8653 = vmatpush2.msra.mxu1 %v8393_v16  ;;  %v8446_v1 = vld [vmem:[#allocation2 + $0x4b8] sm:$0xff]  ;;  %v8441_v16 = vld [vmem:[#allocation2 + $0x490] sm:$0xff] }
 0x2d6   :  { %8582 = vmatpush2.msra.mxu0 %v8329_v48  ;;  %8654 = vmatprep.subr.mxu1 %v8392_v40  ;;  %v8445_v48 = vld [vmem:[#allocation2 + $0x4b0] sm:$0xff]  ;;  %v8498_v40 = vld [vmem:[#allocation2 + $0x658] sm:$0xff] }
 0x2d7   :  { %8583 = vmatprep.subr.mxu0 %v8328_v18  ;;  %8655 = vmatpush2.msra.mxu1 %v8391_v44  ;;  %v8501_v18 = vld [vmem:[#allocation2 + $0x670] sm:$0xff]  ;;  %v8438_v44 = vld [vmem:[#allocation2 + $0x478] sm:$0xff] }
 0x2d8   :  { %8584 = vmatpush2.msra.mxu0 %v8327_v37  ;;  %13219 = vmatprep.subr.msk.mxu1 %vm103_vm1, %v8510_v20  ;;  %v8499_v37 = vld [vmem:[#allocation2 + $0x660] sm:$0xff] }
 0x2d9   :  { %8663 = vmatprep.subr.mxu0 %v8454_v50  ;;  %v8435_v50 = vld [vmem:[#allocation2 + $0x460] sm:$0xff] }
 0x2da   :  { %v8431_v20 = vld [vmem:[#allocation2 + $0x440] sm:$0xff] }
 0x317   :  { %v14086_v21 = vpop.permute.xlu1 %14085 }
 0x318   :  { %v14088_v9 = vunpack.i.h.bf16 %v14086_v21  ;;  %v14087_v32 = vunpack.i.l.bf16 %v14086_v21  ;;  %v8506_v21 = vld [vmem:[#allocation2 + $0x698] sm:$0xff] }
 0x31a   :  { %v8235_v51 = vsel %vm91_vm0, %v14087_v32, %v14088_v9 }
 0x31b   :  { %v14096_v35 = vpop.permute.xlu0 %14095  ;;  %v14091_v55 = vpop.permute.xlu1 %14090  ;;  %v8248_v45 = vmax.f32 %v8207_v30, %v8235_v51  ;;  %v8444_v51 = vld [vmem:[#allocation2 + $0x4a8] sm:$0xff] }
 0x31c   :  { %v14098_v28 = vunpack.i.h.bf16 %v14096_v35  ;;  %v14097_v46 = vunpack.i.l.bf16 %v14096_v35  ;;  %v14093_v13 = vunpack.i.h.bf16 %v14091_v55  ;;  %v14092_v39 = vunpack.i.l.bf16 %v14091_v55  ;;  %v8500_v35 = vld [vmem:[#allocation2 + $0x668] sm:$0xff]  ;;  %v8442_v55 = vld [vmem:[#allocation2 + $0x498] sm:$0xff] }
 0x31e   :  { %v8238_v11 = vsel %vm91_vm0, %v14097_v46, %v14098_v28  ;;  %v8234_v52 = vsel %vm91_vm0, %v14093_v13, %v14087_v32  ;;  %v8236_v34 = vsel %vm91_vm0, %v14088_v9, %v14092_v39  ;;  %v8237_v23 = vsel %vm91_vm0, %v14092_v39, %v14097_v46  ;;  %v8447_v9 = vld [vmem:[#allocation2 + $0x4c0] sm:$0xff]  ;;  %v8504_v32 = vld [vmem:[#allocation2 + $0x688] sm:$0xff]  ;;  %v8497_v46 = vld [vmem:[#allocation2 + $0x650] sm:$0xff] }
 0x31f   :  { %v15685_v56 = vmax.f32 %v8210_v29, %v8238_v11  ;;  %v8247_v58 = vmax.f32 %v8206_v0, %v8234_v52  ;;  %v8249_v4 = vmax.f32 %v8208_v57, %v8236_v34  ;;  %v8250_v30 = vmax.f32 %v8209_v6, %v8237_v23  ;;  %v8439_v13 = vld [vmem:[#allocation2 + $0x480] sm:$0xff]  ;;  %v8496_v39 = vld [vmem:[#allocation2 + $0x648] sm:$0xff]  ;;  %v8437_v11 = vld [vmem:[#allocation2 + $0x470] sm:$0xff] }
 0x320   :  { %v8212_v29 = vmax.f32 %v8205_v38, 0.0  ;;  %v8494_v52 = vld [vmem:[#allocation2 + $0x638] sm:$0xff]  ;;  %v8436_v34 = vld [vmem:[#allocation2 + $0x468] sm:$0xff]  ;;  %v8493_v23 = vld [vmem:[#allocation2 + $0x630] sm:$0xff] }
 0x321   :  { %8261 = vrot.lane.b32.xlu0 %v8247_v58, %s14170_s26  ;;  %v14099_v22 = vpack.i.bf16 %v8249_v4, %v8248_v45  ;;  %v14104_v36 = vpack.i.bf16 %v15685_v56, %v8250_v30  ;;  %v8433_v38 = vld [vmem:[#allocation2 + $0x450] sm:$0xff] }
 0x323   :  { %14100 = vrot.lane.b32.xlu1 %v14099_v22, %s14170_s26  ;;  %v8490_v22 = vld [vmem:[#allocation2 + $0x618] sm:$0xff] }
 0x325   :  { %14105 = vrot.lane.b32.xlu0 %v14104_v36, %s14170_s26  ;;  %v8432_v36 = vld [vmem:[#allocation2 + $0x448] sm:$0xff] }
 0x327   :  { %8232 = vrot.lane.b32.xlu1 %v8212_v29, %s14166_s19 }
 0x393   :  { %v8262_v59 = vpop.permute.xlu0 %8261 }
 0x395   :  { %v14101_v43 = vpop.permute.xlu1 %14100 }
 0x396   :  { %v14103_v57 = vunpack.i.h.bf16 %v14101_v43  ;;  %v14102_v0 = vunpack.i.l.bf16 %v14101_v43  ;;  %v8430_v43 = vld [vmem:[#allocation2 + $0x438] sm:$0xff] }
 0x397   :  { %v15701_v33 = vpop.permute.xlu0 %14105 }
 0x398   :  { %v8275_v14 = vsel %vm1718_vm7, %v8262_v59, %v14102_v0  ;;  %v14108_v6 = vunpack.i.h.bf16 %v15701_v33  ;;  %v14107_v3 = vunpack.i.l.bf16 %v15701_v33  ;;  %v8276_v49 = vsel %vm1718_vm7, %v14102_v0, %v14103_v57  ;;  %v8488_v59 = vld [vmem:[#allocation2 + $0x608] sm:$0xff]  ;;  %v8429_v0 = vld [vmem:[#allocation2 + $0x430] sm:$0xff] }
 0x399   :  { %v8288_v5 = vmax.f32 %v8247_v58, %v8275_v14  ;;  %v8233_v19 = vpop.permute.xlu1 %8232  ;;  %v8289_v62 = vmax.f32 %v8248_v45, %v8276_v49  ;;  %v8495_v45 = vld [vmem:[#allocation2 + $0x640] sm:$0xff]  ;;  %v8492_v58 = vld [vmem:[#allocation2 + $0x628] sm:$0xff]  ;;  %v8426_v49 = vld [vmem:[#allocation2 + $0x418] sm:$0xff] }
 0x39a   :  { %v8277_v63 = vsel %vm1718_vm7, %v14103_v57, %v14107_v3  ;;  %v8239_v17 = vsel %vm91_vm0, %v14098_v28, %v8233_v19  ;;  %v15709_v60 = vmax.f32 %v8212_v29, %v8233_v19  ;;  %v8278_v27 = vsel %vm1718_vm7, %v14107_v3, %v14108_v6  ;;  %v8440_v28 = vld [vmem:[#allocation2 + $0x488] sm:$0xff]  ;;  %v8489_v29 = vld [vmem:[#allocation2 + $0x610] sm:$0xff]  ;;  %v8487_v57 = vld [vmem:[#allocation2 + $0x600] sm:$0xff] }
 0x39b   :  { %v8290_v8 = vmax.f32 %v8249_v4, %v8277_v63  ;;  %v15716_v2 = vmax.f32 %v8211_v53, %v8239_v17  ;;  %8585 = vmatprep.mubr.f32.mxu0 %v8289_v62  ;;  %v8291_v31 = vmax.f32 %v8250_v30, %v8278_v27  ;;  %v8507_v53 = vld [vmem:[#allocation2 + $0x6a0] sm:$0xff]  ;;  %v8434_v4 = vld [vmem:[#allocation2 + $0x458] sm:$0xff]  ;;  %v8428_v14 = vld [vmem:[#allocation2 + $0x428] sm:$0xff] }
 0x39c   :  { %8273 = vrot.lane.b32.xlu0 %v15709_v60, %s14170_s26  ;;  %8586 = vmatmul.mubr.f32.vlgmr.msra.gmra.mxu0 %v8288_v5  ;;  %v8491_v30 = vld [vmem:[#allocation2 + $0x620] sm:$0xff]  ;;  %v16886_v5 = vmov 0.0   ;;  %v8425_v19 = vld [vmem:[#allocation2 + $0x410] sm:$0xff]  ;;  %v8424_v62 = vld [vmem:[#allocation2 + $0x408] sm:$0xff] }
 0x39d   :  { %8656 = vmatprep.mubr.f32.mxu1 %v8291_v31  ;;  %8271 = vrot.lane.b32.xlu1 %v15716_v2, %s14170_s26  ;;  %v8427_v3 = vld [vmem:[#allocation2 + $0x420] sm:$0xff]  ;;  %v8486_v17 = vld [vmem:[#allocation2 + $0x5f8] sm:$0xff]  ;;  %v8485_v27 = vld [vmem:[#allocation2 + $0x5f0] sm:$0xff] }
 0x39e   :  { %8657 = vmatmul.mubr.f32.vlgmr.msra.gmra.mxu1 %v8290_v8  ;;  %8664 = vmatpush1.msra.mxu0 %v8453_v54  ;;  %v8423_v63 = vld [vmem:[#allocation2 + $0x400] sm:$0xff]  ;;  %v8484_v8 = vld [vmem:[#allocation2 + $0x5e8] sm:$0xff]  ;;  %v8482_v54 = vld [vmem:[#allocation2 + $0x5d8] sm:$0xff] }
 0x39f   :  { %8665 = vmatprep.subr.mxu0 %v8452_v42  ;;  %13220 = vmatpush1.msk.msra.mxu1 %vm103_vm1, %v8509_v24  ;;  %v8483_v31 = vld [vmem:[#allocation2 + $0x5e0] sm:$0xff]  ;;  %v8481_v42 = vld [vmem:[#allocation2 + $0x5d0] sm:$0xff]  ;;  %v8480_v24 = vld [vmem:[#allocation2 + $0x5c8] sm:$0xff]  ;;  %vm8511_vm1 = vcmask 744448  }
 0x3a0   :  { %8666 = vmatpush1.msra.mxu0 %v8451_v26  ;;  %8744 = vmatprep.subr.mxu1 %v8508_v7  ;;  %v8479_v26 = vld [vmem:[#allocation2 + $0x5c0] sm:$0xff]  ;;  %v8478_v7 = vld [vmem:[#allocation2 + $0x5b8] sm:$0xff] }
 0x3a1   :  { %8667 = vmatprep.subr.mxu0 %v8450_v10  ;;  %8745 = vmatpush1.msra.mxu1 %v8507_v53  ;;  %v8477_v10 = vld [vmem:[#allocation2 + $0x5b0] sm:$0xff]  ;;  %v8476_v53 = vld [vmem:[#allocation2 + $0x5a8] sm:$0xff] }
 0x3a2   :  { %8668 = vmatpush1.msra.mxu0 %v8449_v41  ;;  %8746 = vmatprep.subr.mxu1 %v8506_v21  ;;  %v8475_v41 = vld [vmem:[#allocation2 + $0x5a0] sm:$0xff]  ;;  %v8474_v21 = vld [vmem:[#allocation2 + $0x598] sm:$0xff] }
 0x3a3   :  { %8669 = vmatprep.subr.mxu0 %v8448_v61  ;;  %8747 = vmatpush1.msra.mxu1 %v8505_v47  ;;  %v8473_v61 = vld [vmem:[#allocation2 + $0x590] sm:$0xff]  ;;  %v8472_v47 = vld [vmem:[#allocation2 + $0x588] sm:$0xff] }
 0x3a4   :  { %8670 = vmatpush1.msra.mxu0 %v8447_v9  ;;  %8748 = vmatprep.subr.mxu1 %v8504_v32  ;;  %v8471_v9 = vld [vmem:[#allocation2 + $0x580] sm:$0xff]  ;;  %v8470_v32 = vld [vmem:[#allocation2 + $0x578] sm:$0xff] }
 0x3a5   :  { %8671 = vmatprep.subr.mxu0 %v8446_v1  ;;  %8749 = vmatpush1.msra.mxu1 %v8503_v15  ;;  %v8469_v1 = vld [vmem:[#allocation2 + $0x570] sm:$0xff]  ;;  %v8468_v15 = vld [vmem:[#allocation2 + $0x568] sm:$0xff] }
 0x3a6   :  { %8672 = vmatpush1.msra.mxu0 %v8445_v48  ;;  %8750 = vmatprep.subr.mxu1 %v8502_v12  ;;  %v8467_v48 = vld [vmem:[#allocation2 + $0x560] sm:$0xff]  ;;  %v8466_v12 = vld [vmem:[#allocation2 + $0x558] sm:$0xff] }
 0x3a7   :  { %8673 = vmatprep.subr.mxu0 %v8444_v51  ;;  %8751 = vmatpush1.msra.mxu1 %v8501_v18  ;;  %v8465_v51 = vld [vmem:[#allocation2 + $0x550] sm:$0xff]  ;;  %v8464_v18 = vld [vmem:[#allocation2 + $0x548] sm:$0xff] }
 0x3a8   :  { %8674 = vmatpush1.msra.mxu0 %v8443_v25  ;;  %8752 = vmatprep.subr.mxu1 %v8500_v35  ;;  %v8463_v25 = vld [vmem:[#allocation2 + $0x540] sm:$0xff]  ;;  %v8462_v35 = vld [vmem:[#allocation2 + $0x538] sm:$0xff] }
 0x3a9   :  { %8675 = vmatprep.subr.mxu0 %v8442_v55  ;;  %8753 = vmatpush1.msra.mxu1 %v8499_v37  ;;  %v8461_v55 = vld [vmem:[#allocation2 + $0x530] sm:$0xff]  ;;  %v8460_v37 = vld [vmem:[#allocation2 + $0x528] sm:$0xff] }
 0x3aa   :  { %8676 = vmatpush1.msra.mxu0 %v8441_v16  ;;  %8754 = vmatprep.subr.mxu1 %v8498_v40  ;;  %v8459_v16 = vld [vmem:[#allocation2 + $0x520] sm:$0xff]  ;;  %v8458_v40 = vld [vmem:[#allocation2 + $0x518] sm:$0xff] }
 0x3ab   :  { %8677 = vmatprep.subr.mxu0 %v8440_v28  ;;  %8755 = vmatpush1.msra.mxu1 %v8497_v46  ;;  %v8457_v28 = vld [vmem:[#allocation2 + $0x510] sm:$0xff]  ;;  %v8456_v46 = vld [vmem:[#allocation2 + $0x508] sm:$0xff] }
 0x3ac   :  { %8678 = vmatpush1.msra.mxu0 %v8439_v13  ;;  %8756 = vmatprep.subr.mxu1 %v8496_v39  ;;  %v8455_v13 = vld [vmem:[#allocation2 + $0x500] sm:$0xff] }
 0x3ad   :  { %8679 = vmatprep.subr.mxu0 %v8438_v44  ;;  %8757 = vmatpush1.msra.mxu1 %v8495_v45 }
 0x3ae   :  { %8680 = vmatpush1.msra.mxu0 %v8437_v11  ;;  %8758 = vmatprep.subr.mxu1 %v8494_v52 }
 0x3af   :  { %8681 = vmatprep.subr.mxu0 %v8436_v34  ;;  %8759 = vmatpush1.msra.mxu1 %v8493_v23 }
 0x3b0   :  { %8682 = vmatpush1.msra.mxu0 %v8435_v50  ;;  %8760 = vmatprep.subr.mxu1 %v8492_v58 }
 0x3b1   :  { %8683 = vmatprep.subr.mxu0 %v8434_v4  ;;  %8761 = vmatpush1.msra.mxu1 %v8491_v30 }
 0x3b2   :  { %8684 = vmatpush1.msra.mxu0 %v8433_v38  ;;  %8762 = vmatprep.subr.mxu1 %v8490_v22 }
 0x3b3   :  { %8685 = vmatprep.subr.mxu0 %v8432_v36  ;;  %8763 = vmatpush1.msra.mxu1 %v8489_v29 }
 0x3b4   :  { %8686 = vmatpush1.msra.mxu0 %v8431_v20  ;;  %8764 = vmatprep.subr.mxu1 %v8488_v59  ;;  %v11281_v59 = vld [vmem:[%s16842_s5 + $0x8] sm:$0xff] }
 0x3b5   :  { %8687 = vmatprep.subr.mxu0 %v8430_v43  ;;  %8765 = vmatpush1.msra.mxu1 %v8487_v57  ;;  %v11280_v43 = vld [vmem:[%s16842_s5] sm:$0xff] }
 0x3b6   :  { %8688 = vmatpush1.msra.mxu0 %v8429_v0  ;;  %8798 = vmatprep.mubr.f32.mxu1 %v16886_v5 }
 0x3b7   :  { %8689 = vmatprep.subr.mxu0 %v8428_v14  ;;  %v13222_v14 = vld [vmem:[%s16841_s4 + $0x10] sm:$0xff] }
 0x3b8   :  { %8690 = vmatpush1.msra.mxu0 %v8427_v3 }
 0x3b9   :  { %8691 = vmatprep.subr.mxu0 %v8426_v49 }
 0x3ba   :  { %8692 = vmatpush1.msra.mxu0 %v8425_v19 }
 0x3bb   :  { %8693 = vmatprep.subr.mxu0 %v8424_v62  ;;  %v13223_v62 = vld [vmem:[%s16841_s4 + $0x18] sm:$0xff] }
 0x3bc   :  { %8694 = vmatpush1.msra.mxu0 %v8423_v63 }
 0x3bd   :  { %8695 = vmatprep.subr.mxu0 %v8486_v17 }
 0x3be   :  { %8696 = vmatpush2.msra.mxu0 %v8485_v27  ;;  %v8805_v27 = vld [vmem:[%s16841_s4] sm:$0xff] }
 0x3bf   :  { %8697 = vmatprep.subr.mxu0 %v8484_v8 }
 0x3c0   :  { %8698 = vmatpush2.msra.mxu0 %v8483_v31 }
 0x3c1   :  { %8699 = vmatprep.subr.mxu0 %v8482_v54 }
 0x3c2   :  { %8700 = vmatpush2.msra.mxu0 %v8481_v42  ;;  %v8806_v42 = vld [vmem:[%s16841_s4 + $0x8] sm:$0xff] }
 0x3c3   :  { %8701 = vmatprep.subr.mxu0 %v8480_v24 }
 0x3c4   :  { %8702 = vmatpush2.msra.mxu0 %v8479_v26 }
 0x3c5   :  { %8703 = vmatprep.subr.mxu0 %v8478_v7  ;;  %v13232_v7 = vld [vmem:[%s16841_s4 + $0x20] sm:$0xff] }
 0x3c6   :  { %8704 = vmatpush2.msra.mxu0 %v8477_v10  ;;  %v13250_v10 = vld [vmem:[%s16841_s4 + $0x50] sm:$0xff] }
 0x3c7   :  { %8705 = vmatprep.subr.mxu0 %v8476_v53 }
 0x3c8   :  { %8706 = vmatpush2.msra.mxu0 %v8475_v41 }
 0x3c9   :  { %8707 = vmatprep.subr.mxu0 %v8474_v21 }
 0x3ca   :  { %8708 = vmatpush2.msra.mxu0 %v8473_v61 }
 0x3cb   :  { %8709 = vmatprep.subr.mxu0 %v8472_v47  ;;  %v13233_v47 = vld [vmem:[%s16841_s4 + $0x28] sm:$0xff] }
 0x3cc   :  { %8710 = vmatpush2.msra.mxu0 %v8471_v9  ;;  %v13251_v9 = vld [vmem:[%s16841_s4 + $0x58] sm:$0xff] }
 0x3cd   :  { %8711 = vmatprep.subr.mxu0 %v8470_v32 }
 0x3ce   :  { %8712 = vmatpush2.msra.mxu0 %v8469_v1 }
 0x3cf   :  { %8713 = vmatprep.subr.mxu0 %v8468_v15  ;;  %v13238_v15 = vld [vmem:[%s16841_s4 + $0x30] sm:$0xff] }
 0x3d0   :  { %8714 = vmatpush2.msra.mxu0 %v8467_v48  ;;  %v13262_v48 = vld [vmem:[%s16841_s4 + $0x70] sm:$0xff] }
 0x3d1   :  { %8715 = vmatprep.subr.mxu0 %v8466_v12 }
 0x3d2   :  { %8716 = vmatpush2.msra.mxu0 %v8465_v51 }
 0x3d3   :  { %8717 = vmatprep.subr.mxu0 %v8464_v18 }
 0x3d4   :  { %8718 = vmatpush2.msra.mxu0 %v8463_v25 }
 0x3d5   :  { %8719 = vmatprep.subr.mxu0 %v8462_v35  ;;  %v13239_v35 = vld [vmem:[%s16841_s4 + $0x38] sm:$0xff] }
 0x3d6   :  { %8720 = vmatpush2.msra.mxu0 %v8461_v55  ;;  %v13263_v55 = vld [vmem:[%s16841_s4 + $0x78] sm:$0xff] }
 0x3d7   :  { %8721 = vmatprep.subr.mxu0 %v8460_v37 }
 0x3d8   :  { %8722 = vmatpush2.msra.mxu0 %v8459_v16 }
 0x3d9   :  { %8723 = vmatprep.subr.mxu0 %v8458_v40  ;;  %v13244_v40 = vld [vmem:[%s16841_s4 + $0x40] sm:$0xff] }
 0x3da   :  { %8724 = vmatpush2.msra.mxu0 %v8457_v28  ;;  %v13274_v28 = vld [vmem:[%s16841_s4 + $0x90] sm:$0xff] }
 0x3db   :  { %8725 = vmatprep.subr.mxu0 %v8456_v46 }
 0x3dc   :  { %8726 = vmatpush2.msra.mxu0 %v8455_v13 }
 0x40e   :  { %v8274_v39 = vpop.permute.xlu0 %8273 }
 0x40f   :  { %v8294_v44 = vmax.f32 %v15709_v60, %v8274_v39  ;;  %v8272_v45 = vpop.permute.xlu1 %8271 }
 0x410   :  { %v8279_v11 = vsel %vm1718_vm7, %v14108_v6, %v8272_v45  ;;  %v8280_v52 = vsel %vm1718_vm7, %v8272_v45, %v8274_v39  ;;  %v13245_v45 = vld [vmem:[%s16841_s4 + $0x48] sm:$0xff] }
 0x411   :  { %v8292_v34 = vmax.f32 %v15685_v56, %v8279_v11  ;;  %v8293_v23 = vmax.f32 %v15716_v2, %v8280_v52  ;;  %13221 = vmatmul.mubr.msk.f32.vlgmr.msra.gmra.mxu1 %vm8511_vm1, %v8294_v44  ;;  %v13275_v11 = vld [vmem:[%s16841_s4 + $0x98] sm:$0xff]  ;;  %vm9597_vm1 = vcmask 891904  }
 0x412   :  { %8893 = vmatprep.mubr.f32.mxu1 %v16886_v5 }
 0x413   :  { %8727 = vmatprep.mubr.f32.mxu0 %v8293_v23  ;;  %v13256_v23 = vld [vmem:[%s16841_s4 + $0x60] sm:$0xff] }
 0x414   :  { %8728 = vmatmul.mubr.f32.vlgmr.msra.gmra.mxu0 %v8292_v34 }
 0x415   :  { %9373 = vmatprep.mubr.f32.mxu0 %v16886_v5 }
 0x45c   :  { %v8587_v50 = vpop.f32.mrf.mxu0 }
 0x45e   :  { %v8658_v60 = vpop.f32.mrf.mxu1  ;;  %v8589_v58 = vpop.f32.mrf.mxu0 }
 0x45f   :  { %v8659_v33 = vadd.f32 %v8658_v60, %v8587_v50  ;;  %v13286_v50 = vld [vmem:[%s16841_s4 + $0xb0] sm:$0xff] }
 0x460   :  { %v8660_v4 = vpop.f32.mrf.mxu1 }
 0x461   :  { %v8661_v38 = vadd.f32 %v8660_v4, %v8589_v58 }
 0x4d1   :  { %v8800_v30 = vpop.f32.mrf.mxu1 }
 0x4d3   :  { %v8802_v29 = vpop.f32.mrf.mxu1 }
 0x4d4   :  { %v8729_v6 = vpop.f32.mrf.mxu0 }
 0x4d5   :  { %v8730_v22 = vadd.f32 %v8729_v6, %v8659_v33  ;;  %v13287_v6 = vld [vmem:[%s16841_s4 + $0xb8] sm:$0xff] }
 0x4d6   :  { %v8731_v36 = vpop.f32.mrf.mxu0 }
 0x4d7   :  { %v15733_v56 = vadd.f32 %v8800_v30, %v8730_v22  ;;  %v8732_v2 = vadd.f32 %v8731_v36, %v8661_v38  ;;  %v13257_v30 = vld [vmem:[%s16841_s4 + $0x68] sm:$0xff]  ;;  %v13268_v36 = vld [vmem:[%s16841_s4 + $0x80] sm:$0xff] }
 0x4d9   :  { %v15735_v20 = vadd.f32 %v8802_v29, %v8732_v2  ;;  %8812 = vrot.lane.b32.xlu1 %v15733_v56, %s14166_s19 }
 0x4db   :  { %8814 = vrot.lane.b32.xlu0 %v15735_v20, %s14166_s19 }
 0x4dd   :  { %8996 = vrot.lane.b32.xlu1 %v15733_v56, %s14167_s23 }
 0x4df   :  { %8998 = vrot.lane.b32.xlu0 %v15735_v20, %s14167_s23  ;;  %s14188_s23 = smov 111  }
 0x4e1   :  { %9095 = vrot.lane.b32.xlu1 %v15733_v56, %s14168_s24 }
 0x4e3   :  { %9097 = vrot.lane.b32.xlu0 %v15735_v20, %s14168_s24  ;;  %s14190_s24 = smov 109  }
 0x4e5   :  { %9194 = vrot.lane.b32.xlu1 %v15733_v56, %s14169_s25 }
 0x4e7   :  { %9196 = vrot.lane.b32.xlu0 %v15735_v20, %s14169_s25  ;;  %s14191_s25 = smov 108  }
 0x4e9   :  { %9293 = vrot.lane.b32.xlu1 %v15733_v56, %s14187_s1 }
 0x4eb   :  { %9295 = vrot.lane.b32.xlu0 %v15735_v20, %s14187_s1 }
 0x4ed   :  { %9393 = vrot.lane.b32.xlu1 %v15733_v56, %s14188_s23 }
 0x4ef   :  { %9395 = vrot.lane.b32.xlu0 %v15735_v20, %s14188_s23 }
 0x4f1   :  { %9493 = vrot.lane.b32.xlu1 %v15733_v56, %s14189_s0 }
 0x4f3   :  { %9495 = vrot.lane.b32.xlu0 %v15735_v20, %s14189_s0 }
 0x4f5   :  { %9593 = vrot.lane.b32.xlu1 %v15733_v56, %s14190_s24 }
 0x4f7   :  { %9595 = vrot.lane.b32.xlu0 %v15735_v20, %s14190_s24 }
 0x4f9   :  { %9693 = vrot.lane.b32.xlu1 %v15733_v56, %s14191_s25 }
 0x4fb   :  { %9695 = vrot.lane.b32.xlu0 %v15735_v20, %s14191_s25 }
 0x4fd   :  { %9793 = vrot.lane.b32.xlu1 %v15733_v56, %s14170_s26 }
 0x4ff   :  { %9795 = vrot.lane.b32.xlu0 %v15735_v20, %s14170_s26  ;;  %s14192_s26 = smov 80  }
 0x501   :  { %9892 = vrot.lane.b32.xlu1 %v15733_v56, %s14171_s27 }
 0x503   :  { %9894 = vrot.lane.b32.xlu0 %v15735_v20, %s14171_s27  ;;  %s14193_s27 = smov 79  }
 0x505   :  { %9991 = vrot.lane.b32.xlu1 %v15733_v56, %s14172_s28 }
 0x507   :  { %9993 = vrot.lane.b32.xlu0 %v15735_v20, %s14172_s28  ;;  %s14194_s28 = smov 78  }
 0x509   :  { %10090 = vrot.lane.b32.xlu1 %v15733_v56, %s14173_s29 }
 0x50b   :  { %10092 = vrot.lane.b32.xlu0 %v15735_v20, %s14173_s29  ;;  %s14195_s29 = smov 77  }
 0x50d   :  { %10189 = vrot.lane.b32.xlu1 %v15733_v56, %s14175_s15 }
 0x50f   :  { %10191 = vrot.lane.b32.xlu0 %v15735_v20, %s14175_s15  ;;  %s14196_s15 = smov 76  }
 0x511   :  { %10288 = vrot.lane.b32.xlu1 %v15733_v56, %s14192_s26 }
 0x513   :  { %10290 = vrot.lane.b32.xlu0 %v15735_v20, %s14192_s26 }
 0x515   :  { %10388 = vrot.lane.b32.xlu1 %v15733_v56, %s14193_s27 }
 0x517   :  { %10390 = vrot.lane.b32.xlu0 %v15735_v20, %s14193_s27 }
 0x519   :  { %10488 = vrot.lane.b32.xlu1 %v15733_v56, %s14194_s28 }
 0x51b   :  { %10490 = vrot.lane.b32.xlu0 %v15735_v20, %s14194_s28 }
 0x51d   :  { %10588 = vrot.lane.b32.xlu1 %v15733_v56, %s14195_s29 }
 0x51f   :  { %10590 = vrot.lane.b32.xlu0 %v15735_v20, %s14195_s29 }
 0x521   :  { %10688 = vrot.lane.b32.xlu1 %v15733_v56, %s14196_s15 }
 0x523   :  { %10690 = vrot.lane.b32.xlu0 %v15735_v20, %s14196_s15 }
 0x525   :  { %10788 = vrot.lane.b32.xlu1 %v15733_v56, %s14176_s20 }
 0x527   :  { %10790 = vrot.lane.b32.xlu0 %v15735_v20, %s14176_s20 }
 0x529   :  { %10887 = vrot.lane.b32.xlu1 %v15733_v56, %s14177_s30 }
 0x52b   :  { %10889 = vrot.lane.b32.xlu0 %v15735_v20, %s14177_s30 }
 0x52d   :  { %10986 = vrot.lane.b32.xlu1 %v15733_v56, %s14178_s17 }
 0x52f   :  { %10988 = vrot.lane.b32.xlu0 %v15735_v20, %s14178_s17 }
 0x531   :  { %11085 = vrot.lane.b32.xlu1 %v15733_v56, %s14179_s21 }
 0x533   :  { %11087 = vrot.lane.b32.xlu0 %v15735_v20, %s14179_s21 }
 0x535   :  { %11184 = vrot.lane.b32.xlu1 %v15733_v56, %s16887_s14 }
 0x537   :  { %11186 = vrot.lane.b32.xlu0 %v15735_v20, %s16887_s14 }
 0x539   :  { %11284 = vperm.xlu1 %14109, %v11280_v43   ;;  %v13269_v43 = vld [vmem:[%s16841_s4 + $0x88] sm:$0xff] }
 0x53b   :  { %11289 = vperm.xlu0 %14083, %v11281_v59  }
 0x54b   :  { %v8813_v57 = vpop.permute.xlu1 %8812 }
 0x54d   :  { %v8815_v0 = vpop.permute.xlu0 %8814 }
 0x54e   :  { %v8816_v3 = vsel %vm91_vm0, %v8813_v57, %v8815_v0  ;;  %13224 = vmatprep.subr.msk.mxu1 %vm8824_vm2, %v8815_v0  ;;  %v13299_v57 = vld [vmem:[%s16841_s4 + $0xd8] sm:$0xff] }
 0x54f   :  { %v8997_v49 = vpop.permute.xlu1 %8996  ;;  %13225 = vmatpush1.msk.msra.mxu1 %vm8824_vm2, %v8816_v3  ;;  %v13280_v3 = vld [vmem:[%s16841_s4 + $0xa0] sm:$0xff] }
 0x550   :  { %13226 = vmatmul.mubr.msk.f32.vlgmr.msra.gmra.mxu1 %vm8817_vm14, %v13222_v14  ;;  %13228 = vmatprep.subr.msk.mxu1 %vm8824_vm2, %v15735_v20 }
 0x551   :  { %13229 = vmatpush1.msk.msra.mxu1 %vm8824_vm2, %v15733_v56  ;;  %v8999_v19 = vpop.permute.xlu0 %8998  ;;  %8899 = vmatprep.mubr.f32.mxu1 %v16886_v5  ;;  %v13298_v56 = vld [vmem:[%s16841_s4 + $0xd0] sm:$0xff] }
 0x552   :  { %13234 = vmatprep.subr.msk.mxu1 %vm8824_vm2, %v8999_v19  ;;  %v9000_v31 = vsel %vm719_vm4, %v8997_v49, %v8999_v19  ;;  %vm9497_vm4 = vcmask 900096   ;;  %v13310_v49 = vld [vmem:[%s16841_s4 + $0xf0] sm:$0xff] }
 0x553   :  { %v9096_v63 = vpop.permute.xlu1 %9095 }
 0x554   :  { %13227 = vmatmul.mubr.msk.f32.gmra.mxu1 %vm8817_vm14, %v13223_v62 }
 0x555   :  { %v9098_v17 = vpop.permute.xlu0 %9097  ;;  %8980 = vmatprep.mubr.f32.mxu1 %v16886_v5 }
 0x556   :  { %v9099_v21 = vsel %vm1052_vm5, %v9096_v63, %v9098_v17  ;;  %vm9697_vm5 = vcmask 883712  }
 0x557   :  { %v9195_v8 = vpop.permute.xlu1 %9194 }
 0x558   :  { %13230 = vmatmul.mubr.msk.f32.vlgmr.msra.gmra.mxu1 %vm8817_vm14, %v8805_v27  ;;  %v13281_v27 = vld [vmem:[%s16841_s4 + $0xa8] sm:$0xff] }
 0x559   :  { %13235 = vmatpush1.msk.msra.mxu1 %vm8824_vm2, %v9000_v31  ;;  %v9197_v54 = vpop.permute.xlu0 %9196  ;;  %8986 = vmatprep.mubr.f32.mxu1 %v16886_v5 }
 0x55a   :  { %13240 = vmatprep.subr.msk.mxu1 %vm8824_vm2, %v9098_v17  ;;  %v9198_v18 = vsel %vm1385_vm6, %v9195_v8, %v9197_v54  ;;  %vm9397_vm6 = vcmask 908288   ;;  %v13311_v8 = vld [vmem:[%s16841_s4 + $0xf8] sm:$0xff] }
 0x55b   :  { %v9294_v24 = vpop.permute.xlu1 %9293 }
 0x55c   :  { %13231 = vmatmul.mubr.msk.f32.gmra.mxu1 %vm8817_vm14, %v8806_v42  ;;  %v13292_v42 = vld [vmem:[%s16841_s4 + $0xc0] sm:$0xff] }
 0x55d   :  { %v9296_v26 = vpop.permute.xlu0 %9295  ;;  %9075 = vmatprep.mubr.f32.mxu1 %v16886_v5 }
 0x55e   :  { %v9298_v53 = vsel %vm9297_vm12, %v9294_v24, %v9296_v26  ;;  %13252 = vmatprep.subr.msk.mxu0 %vm8824_vm2, %v9296_v26  ;;  %v13322_v24 = vld [vmem:[%s16841_s4 + $0x110] sm:$0xff] }
 0x55f   :  { %v9394_v41 = vpop.permute.xlu1 %9393  ;;  %13253 = vmatpush1.msk.msra.mxu0 %vm8824_vm2, %v9298_v53 }
 0x560   :  { %13236 = vmatmul.mubr.msk.f32.vlgmr.msra.gmra.mxu1 %vm8817_vm14, %v13232_v7  ;;  %13254 = vmatmul.mubr.msk.f32.vlgmr.msra.gmra.mxu0 %vm8817_vm14, %v13250_v10 }
 0x561   :  { %13241 = vmatpush1.msk.msra.mxu1 %vm8824_vm2, %v9099_v21  ;;  %v9396_v61 = vpop.permute.xlu0 %9395  ;;  %9081 = vmatprep.mubr.f32.mxu1 %v16886_v5  ;;  %v13323_v21 = vld [vmem:[%s16841_s4 + $0x118] sm:$0xff] }
 0x562   :  { %13246 = vmatprep.subr.msk.mxu1 %vm8824_vm2, %v9197_v54  ;;  %9379 = vmatprep.mubr.f32.mxu0 %v16886_v5  ;;  %v9398_v39 = vsel %vm9397_vm6, %v9394_v41, %v9396_v61  ;;  %v13293_v41 = vld [vmem:[%s16841_s4 + $0xc8] sm:$0xff] }
 0x563   :  { %v9494_v32 = vpop.permute.xlu1 %9493 }
 0x564   :  { %13237 = vmatmul.mubr.msk.f32.gmra.mxu1 %vm8817_vm14, %v13233_v47  ;;  %13255 = vmatmul.mubr.msk.f32.gmra.mxu0 %vm8817_vm14, %v13251_v9  ;;  %v13304_v9 = vld [vmem:[%s16841_s4 + $0xe0] sm:$0xff] }
 0x565   :  { %v9496_v1 = vpop.permute.xlu0 %9495  ;;  %9174 = vmatprep.mubr.f32.mxu1 %v16886_v5  ;;  %9573 = vmatprep.mubr.f32.mxu0 %v16886_v5 }
 0x566   :  { %v9498_v12 = vsel %vm9497_vm4, %v9494_v32, %v9496_v1  ;;  %13264 = vmatprep.subr.msk.mxu0 %vm8824_vm2, %v9496_v1  ;;  %v13334_v32 = vld [vmem:[%s16841_s4 + $0x130] sm:$0xff]  ;;  %vm16890_vm4 = vcmask 490496  }
 0x567   :  { %v9594_v51 = vpop.permute.xlu1 %9593  ;;  %13265 = vmatpush1.msk.msra.mxu0 %vm8824_vm2, %v9498_v12 }
 0x568   :  { %13242 = vmatmul.mubr.msk.f32.vlgmr.msra.gmra.mxu1 %vm8817_vm14, %v13238_v15  ;;  %13266 = vmatmul.mubr.msk.f32.vlgmr.msra.gmra.mxu0 %vm8817_vm14, %v13262_v48 }
 0x569   :  { %13247 = vmatpush1.msk.msra.mxu1 %vm8824_vm2, %v9198_v18  ;;  %v9596_v25 = vpop.permute.xlu0 %9595  ;;  %9180 = vmatprep.mubr.f32.mxu1 %v16886_v5  ;;  %v13335_v18 = vld [vmem:[%s16841_s4 + $0x138] sm:$0xff] }
 0x56a   :  { %13258 = vmatprep.subr.msk.mxu1 %vm8824_vm2, %v9396_v61  ;;  %9579 = vmatprep.mubr.f32.mxu0 %v16886_v5  ;;  %v9598_v4 = vsel %vm9597_vm1, %v9594_v51, %v9596_v25  ;;  %v13305_v51 = vld [vmem:[%s16841_s4 + $0xe8] sm:$0xff] }
 0x56b   :  { %v9694_v37 = vpop.permute.xlu1 %9693 }
 0x56c   :  { %13243 = vmatmul.mubr.msk.f32.gmra.mxu1 %vm8817_vm14, %v13239_v35  ;;  %13267 = vmatmul.mubr.msk.f32.gmra.mxu0 %vm8817_vm14, %v13263_v55  ;;  %v13316_v55 = vld [vmem:[%s16841_s4 + $0x100] sm:$0xff] }
 0x56d   :  { %v9696_v16 = vpop.permute.xlu0 %9695  ;;  %9273 = vmatprep.mubr.f32.mxu1 %v16886_v5  ;;  %9773 = vmatprep.mubr.f32.mxu0 %v16886_v5 }
 0x56e   :  { %v9698_v46 = vsel %vm9697_vm5, %v9694_v37, %v9696_v16  ;;  %13276 = vmatprep.subr.msk.mxu0 %vm8824_vm2, %v9696_v16  ;;  %v13346_v37 = vld [vmem:[%s16841_s4 + $0x150] sm:$0xff] }
 0x56f   :  { %v9794_v13 = vpop.permute.xlu1 %9793  ;;  %13277 = vmatpush1.msk.msra.mxu0 %vm8824_vm2, %v9698_v46 }
 0x570   :  { %13248 = vmatmul.mubr.msk.f32.vlgmr.msra.gmra.mxu1 %vm8817_vm14, %v13244_v40  ;;  %13278 = vmatmul.mubr.msk.f32.vlgmr.msra.gmra.mxu0 %vm8817_vm14, %v13274_v28 }
 0x571   :  { %13259 = vmatpush1.msk.msra.mxu1 %vm8824_vm2, %v9398_v39  ;;  %v9796_v44 = vpop.permute.xlu0 %9795  ;;  %9279 = vmatprep.mubr.f32.mxu1 %v16886_v5  ;;  %v13347_v39 = vld [vmem:[%s16841_s4 + $0x158] sm:$0xff] }
 0x572   :  { %13270 = vmatprep.subr.msk.mxu1 %vm8824_vm2, %v9596_v25  ;;  %9779 = vmatprep.mubr.f32.mxu0 %v16886_v5  ;;  %v9797_v20 = vsel %vm1718_vm7, %v9794_v13, %v9796_v44  ;;  %vm10292_vm7 = vcmask 654336   ;;  %v13317_v13 = vld [vmem:[%s16841_s4 + $0x108] sm:$0xff] }
 0x573   :  { %v9893_v52 = vpop.permute.xlu1 %9892 }
 0x574   :  { %13249 = vmatmul.mubr.msk.f32.gmra.mxu1 %vm8817_vm14, %v13245_v45  ;;  %13279 = vmatmul.mubr.msk.f32.gmra.mxu0 %vm8817_vm14, %v13275_v11  ;;  %v13328_v11 = vld [vmem:[%s16841_s4 + $0x120] sm:$0xff] }
 0x575   :  { %v9895_v34 = vpop.permute.xlu0 %9894  ;;  %9473 = vmatprep.mubr.f32.mxu1 %v16886_v5  ;;  %9971 = vmatprep.mubr.f32.mxu0 %v16886_v5 }
 0x576   :  { %v9896_v60 = vsel %vm2051_vm8, %v9893_v52, %v9895_v34  ;;  %13288 = vmatprep.subr.msk.mxu0 %vm8824_vm2, %v9895_v34  ;;  %vm10492_vm8 = vcmask 637952   ;;  %v13358_v52 = vld [vmem:[%s16841_s4 + $0x170] sm:$0xff] }
 0x577   :  { %v9992_v58 = vpop.permute.xlu1 %9991  ;;  %13289 = vmatpush1.msk.msra.mxu0 %vm8824_vm2, %v9896_v60  ;;  %v13359_v60 = vld [vmem:[%s16841_s4 + $0x178] sm:$0xff] }
 0x578   :  { %13260 = vmatmul.mubr.msk.f32.vlgmr.msra.gmra.mxu1 %vm8817_vm14, %v13256_v23  ;;  %13290 = vmatmul.mubr.msk.f32.vlgmr.msra.gmra.mxu0 %vm8817_vm14, %v13286_v50  ;;  %v13329_v50 = vld [vmem:[%s16841_s4 + $0x128] sm:$0xff] }
 0x579   :  { %13271 = vmatpush1.msk.msra.mxu1 %vm8824_vm2, %v9598_v4  ;;  %v9994_v33 = vpop.permute.xlu0 %9993  ;;  %9479 = vmatprep.mubr.f32.mxu1 %v16886_v5 }
 0x57a   :  { %13282 = vmatprep.subr.msk.mxu1 %vm8824_vm2, %v9796_v44  ;;  %9977 = vmatprep.mubr.f32.mxu0 %v16886_v5  ;;  %v9995_v63 = vsel %vm2384_vm9, %v9992_v58, %v9994_v33  ;;  %vm10692_vm9 = vcmask 621568   ;;  %v13340_v58 = vld [vmem:[%s16841_s4 + $0x140] sm:$0xff] }
 0x57b   :  { %v10091_v38 = vpop.permute.xlu1 %10090 }
 0x57c   :  { %13261 = vmatmul.mubr.msk.f32.gmra.mxu1 %vm8817_vm14, %v13257_v30  ;;  %13291 = vmatmul.mubr.msk.f32.gmra.mxu0 %vm8817_vm14, %v13287_v6  ;;  %v13341_v30 = vld [vmem:[%s16841_s4 + $0x148] sm:$0xff]  ;;  %v13352_v6 = vld [vmem:[%s16841_s4 + $0x160] sm:$0xff] }
 0x57d   :  { %v10093_v22 = vpop.permute.xlu0 %10092  ;;  %9673 = vmatprep.mubr.f32.mxu1 %v16886_v5  ;;  %10169 = vmatprep.mubr.f32.mxu0 %v16886_v5 }
 0x57e   :  { %v10094_v2 = vsel %vm2717_vm10, %v10091_v38, %v10093_v22  ;;  %13300 = vmatprep.subr.msk.mxu0 %vm8824_vm2, %v10093_v22  ;;  %vm10392_vm10 = vcmask 646144  }
 0x57f   :  { %v10190_v29 = vpop.permute.xlu1 %10189  ;;  %13301 = vmatpush1.msk.msra.mxu0 %vm8824_vm2, %v10094_v2  ;;  %v13365_v2 = vld [vmem:[%s16841_s4 + $0x188] sm:$0xff] }
 0x580   :  { %13272 = vmatmul.mubr.msk.f32.vlgmr.msra.gmra.mxu1 %vm8817_vm14, %v13268_v36  ;;  %13302 = vmatmul.mubr.msk.f32.vlgmr.msra.gmra.mxu0 %vm8817_vm14, %v13298_v56  ;;  %v13353_v36 = vld [vmem:[%s16841_s4 + $0x168] sm:$0xff]  ;;  %v13364_v56 = vld [vmem:[%s16841_s4 + $0x180] sm:$0xff]  ;;  %s12911_s4 = sshll.u32 %s14197_s22, 4  ;;  %s12912_s4 = int_to_ptr.vmem [resolvable:$true] %s12911_s4 }
 0x581   :  { %13283 = vmatpush1.msk.msra.mxu1 %vm8824_vm2, %v9797_v20  ;;  %v10192_v59 = vpop.permute.xlu0 %10191  ;;  %9679 = vmatprep.mubr.f32.mxu1 %v16886_v5  ;;  %s14142_s17 = scalar_lea.vmem %s12912_s4, 32  ;;  %p14143_p6 = scmp.lt.s32.totalorder %s12912_s4, %s12912_s4 }
 0x582   :  { %13294 = vmatprep.subr.msk.mxu1 %vm8824_vm2, %v9994_v33  ;;  %10175 = vmatprep.mubr.f32.mxu0 %v16886_v5  ;;  %v10193_v10 = vsel %vm3050_vm11, %v10190_v29, %v10192_v59  ;;  %vm10592_vm11 = vcmask 629760  }
 0x583   :  { %v10289_v0 = vpop.permute.xlu1 %10288 }
 0x584   :  { %13273 = vmatmul.mubr.msk.f32.gmra.mxu1 %vm8817_vm14, %v13269_v43  ;;  %13303 = vmatmul.mubr.msk.f32.gmra.mxu0 %vm8817_vm14, %v13299_v57 }
 0x585   :  { %v10291_v14 = vpop.permute.xlu0 %10290  ;;  %9872 = vmatprep.mubr.f32.mxu1 %v16886_v5  ;;  %10368 = vmatprep.mubr.f32.mxu0 %v16886_v5 }
 0x586   :  { %v10293_v19 = vsel %vm10292_vm7, %v10289_v0, %v10291_v14  ;;  %13312 = vmatprep.subr.msk.mxu0 %vm8824_vm2, %v10291_v14 }
 0x587   :  { %v10389_v62 = vpop.permute.xlu1 %10388  ;;  %13313 = vmatpush1.msk.msra.mxu0 %vm8824_vm2, %v10293_v19 }
 0x588   :  { %13284 = vmatmul.mubr.msk.f32.vlgmr.msra.gmra.mxu1 %vm8817_vm14, %v13280_v3  ;;  %13314 = vmatmul.mubr.msk.f32.vlgmr.msra.gmra.mxu0 %vm8817_vm14, %v13310_v49 }
 0x589   :  { %13295 = vmatpush1.msk.msra.mxu1 %vm8824_vm2, %v9995_v63  ;;  %v10391_v17 = vpop.permute.xlu0 %10390  ;;  %9878 = vmatprep.mubr.f32.mxu1 %v16886_v5 }
 0x58a   :  { %13306 = vmatprep.subr.msk.mxu1 %vm8824_vm2, %v10192_v59  ;;  %10374 = vmatprep.mubr.f32.mxu0 %v16886_v5  ;;  %v10393_v48 = vsel %vm10392_vm10, %v10389_v62, %v10391_v17 }
 0x58b   :  { %v10489_v31 = vpop.permute.xlu1 %10488 }
 0x58c   :  { %13285 = vmatmul.mubr.msk.f32.gmra.mxu1 %vm8817_vm14, %v13281_v27  ;;  %13315 = vmatmul.mubr.msk.f32.gmra.mxu0 %vm8817_vm14, %v13311_v8 }
 0x58d   :  { %v10491_v54 = vpop.permute.xlu0 %10490  ;;  %10070 = vmatprep.mubr.f32.mxu1 %v16886_v5  ;;  %10568 = vmatprep.mubr.f32.mxu0 %v16886_v5 }
 0x58e   :  { %v10493_v26 = vsel %vm10492_vm8, %v10489_v31, %v10491_v54  ;;  %13324 = vmatprep.subr.msk.mxu0 %vm8824_vm2, %v10491_v54 }
 0x58f   :  { %v10589_v7 = vpop.permute.xlu1 %10588  ;;  %13325 = vmatpush1.msk.msra.mxu0 %vm8824_vm2, %v10493_v26 }
 0x590   :  { %13296 = vmatmul.mubr.msk.f32.vlgmr.msra.gmra.mxu1 %vm8817_vm14, %v13292_v42  ;;  %13326 = vmatmul.mubr.msk.f32.vlgmr.msra.gmra.mxu0 %vm8817_vm14, %v13322_v24 }
 0x591   :  { %13307 = vmatpush1.msk.msra.mxu1 %vm8824_vm2, %v10193_v10  ;;  %v10591_v53 = vpop.permute.xlu0 %10590  ;;  %10076 = vmatprep.mubr.f32.mxu1 %v16886_v5 }
 0x592   :  { %13318 = vmatprep.subr.msk.mxu1 %vm8824_vm2, %v10391_v17  ;;  %10574 = vmatprep.mubr.f32.mxu0 %v16886_v5  ;;  %v10593_v28 = vsel %vm10592_vm11, %v10589_v7, %v10591_v53 }
 0x593   :  { %v10689_v61 = vpop.permute.xlu1 %10688 }
 0x594   :  { %13297 = vmatmul.mubr.msk.f32.gmra.mxu1 %vm8817_vm14, %v13293_v41  ;;  %13327 = vmatmul.mubr.msk.f32.gmra.mxu0 %vm8817_vm14, %v13323_v21 }
 0x595   :  { %v10691_v47 = vpop.permute.xlu0 %10690  ;;  %10268 = vmatprep.mubr.f32.mxu1 %v16886_v5  ;;  %10768 = vmatprep.mubr.f32.mxu0 %v16886_v5 }
 0x596   :  { %v10693_v1 = vsel %vm10692_vm9, %v10689_v61, %v10691_v47  ;;  %13336 = vmatprep.subr.msk.mxu0 %vm8824_vm2, %v10691_v47 }
 0x597   :  { %v10789_v15 = vpop.permute.xlu1 %10788  ;;  %13337 = vmatpush1.msk.msra.mxu0 %vm8824_vm2, %v10693_v1 }
 0x598   :  { %13308 = vmatmul.mubr.msk.f32.vlgmr.msra.gmra.mxu1 %vm8817_vm14, %v13304_v9  ;;  %13338 = vmatmul.mubr.msk.f32.vlgmr.msra.gmra.mxu0 %vm8817_vm14, %v13334_v32 }
 0x599   :  { %13319 = vmatpush1.msk.msra.mxu1 %vm8824_vm2, %v10393_v48  ;;  %v10791_v12 = vpop.permute.xlu0 %10790  ;;  %10274 = vmatprep.mubr.f32.mxu1 %v16886_v5 }
 0x59a   :  { %13330 = vmatprep.subr.msk.mxu1 %vm8824_vm2, %v10591_v53  ;;  %10774 = vmatprep.mubr.f32.mxu0 %v16886_v5 }
 0x59b   :  { %v10888_v25 = vpop.permute.xlu1 %10887 }
 0x59c   :  { %13309 = vmatmul.mubr.msk.f32.gmra.mxu1 %vm8817_vm14, %v13305_v51  ;;  %13339 = vmatmul.mubr.msk.f32.gmra.mxu0 %vm8817_vm14, %v13335_v18 }
 0x59d   :  { %v10890_v35 = vpop.permute.xlu0 %10889  ;;  %10468 = vmatprep.mubr.f32.mxu1 %v16886_v5  ;;  %10966 = vmatprep.mubr.f32.mxu0 %v16886_v5 }
 0x59e   :  { %v10891_v16 = vsel %vm3716_vm13, %v10888_v25, %v10890_v35  ;;  %13348 = vmatprep.subr.msk.mxu0 %vm8824_vm2, %v10890_v35  ;;  %vm16888_vm13 = vcmask 523264  }
 0x59f   :  { %v10987_v40 = vpop.permute.xlu1 %10986  ;;  %13349 = vmatpush1.msk.msra.mxu0 %vm8824_vm2, %v10891_v16  ;;  %v10792_v23 = vsel %vm16888_vm13, %v10789_v15, %v10791_v12 }
 0x5a0   :  { %13320 = vmatmul.mubr.msk.f32.vlgmr.msra.gmra.mxu1 %vm8817_vm14, %v13316_v55  ;;  %13350 = vmatmul.mubr.msk.f32.vlgmr.msra.gmra.mxu0 %vm8817_vm14, %v13346_v37 }
 0x5a1   :  { %13331 = vmatpush1.msk.msra.mxu1 %vm8824_vm2, %v10593_v28  ;;  %v10989_v46 = vpop.permute.xlu0 %10988  ;;  %10474 = vmatprep.mubr.f32.mxu1 %v16886_v5 }
 0x5a2   :  { %13342 = vmatprep.subr.msk.mxu1 %vm8824_vm2, %v10791_v12  ;;  %10972 = vmatprep.mubr.f32.mxu0 %v16886_v5 }
 0x5a3   :  { %v11086_v44 = vpop.permute.xlu1 %11085 }
 0x5a4   :  { %13321 = vmatmul.mubr.msk.f32.gmra.mxu1 %vm8817_vm14, %v13317_v13  ;;  %13351 = vmatmul.mubr.msk.f32.gmra.mxu0 %vm8817_vm14, %v13347_v39 }
 0x5a5   :  { %v11088_v45 = vpop.permute.xlu0 %11087  ;;  %10668 = vmatprep.mubr.f32.mxu1 %v16886_v5  ;;  %11164 = vmatprep.mubr.f32.mxu0 %v16886_v5 }
 0x5a6   :  { %v11089_v34 = vsel %vm4382_vm15, %v11086_v44, %v11088_v45  ;;  %13360 = vmatprep.subr.msk.mxu0 %vm8824_vm2, %v11088_v45  ;;  %vm16889_vm15 = vcmask 506880  }
 0x5a7   :  { %13361 = vmatpush1.msk.msra.mxu0 %vm8824_vm2, %v11089_v34  ;;  %v10990_v4 = vsel %vm16889_vm15, %v10987_v40, %v10989_v46  ;;  %v11185_v38 = vpop.permute.xlu1 %11184 }
 0x5a8   :  { %13332 = vmatmul.mubr.msk.f32.vlgmr.msra.gmra.mxu1 %vm8817_vm14, %v13328_v11  ;;  %13362 = vmatmul.mubr.msk.f32.vlgmr.msra.gmra.mxu0 %vm8817_vm14, %v13358_v52 }
 0x5a9   :  { %13343 = vmatpush1.msk.msra.mxu1 %vm8824_vm2, %v10792_v23  ;;  %10674 = vmatprep.mubr.f32.mxu1 %v16886_v5  ;;  %v11187_v33 = vpop.permute.xlu0 %11186 }
 0x5aa   :  { %13354 = vmatprep.subr.msk.mxu1 %vm8824_vm2, %v10989_v46  ;;  %11170 = vmatprep.mubr.f32.mxu0 %v16886_v5  ;;  %v11188_v22 = vsel %vm16890_vm4, %v11185_v38, %v11187_v33 }
 0x5ab   :  { %11373 = vmatprep.subr.mxu0 %v16886_v5 }
 0x5ac   :  { %13333 = vmatmul.mubr.msk.f32.gmra.mxu1 %vm8817_vm14, %v13329_v50  ;;  %13363 = vmatmul.mubr.msk.f32.gmra.mxu0 %vm8817_vm14, %v13359_v60 }
 0x5ad   :  { %10867 = vmatprep.mubr.f32.mxu1 %v16886_v5 }
 0x5b0   :  { %13344 = vmatmul.mubr.msk.f32.vlgmr.msra.gmra.mxu1 %vm8817_vm14, %v13340_v58 }
 0x5b1   :  { %13355 = vmatpush1.msk.msra.mxu1 %vm8824_vm2, %v10990_v4  ;;  %10873 = vmatprep.mubr.f32.mxu1 %v16886_v5 }
 0x5b2   :  { %13366 = vmatprep.subr.msk.mxu1 %vm8824_vm2, %v11187_v33 }
 0x5b4   :  { %13345 = vmatmul.mubr.msk.f32.gmra.mxu1 %vm8817_vm14, %v13341_v30 }
 0x5b5   :  { %11065 = vmatprep.mubr.f32.mxu1 %v16886_v5 }
 0x5b8   :  { %13356 = vmatmul.mubr.msk.f32.vlgmr.msra.gmra.mxu1 %vm8817_vm14, %v13352_v6 }
 0x5b9   :  { %13367 = vmatpush1.msk.msra.mxu1 %vm8824_vm2, %v11188_v22  ;;  %11071 = vmatprep.mubr.f32.mxu1 %v16886_v5  ;;  %vm11369_vm2 = vcmask 1040384  }
 0x5ba   :  { %13769 = vmatprep.subr.mxu1 %v16886_v5 }
 0x5bc   :  { %13357 = vmatmul.mubr.msk.f32.gmra.mxu1 %vm8817_vm14, %v13353_v36 }
 0x5bd   :  { %11263 = vmatprep.mubr.f32.mxu1 %v16886_v5 }
 0x5c0   :  { %13368 = vmatmul.mubr.msk.f32.vlgmr.msra.gmra.mxu1 %vm8817_vm14, %v13364_v56 }
 0x5c1   :  { %11269 = vmatprep.mubr.f32.mxu1 %v16886_v5 }
 0x5c4   :  { %13369 = vmatmul.mubr.msk.f32.gmra.mxu1 %vm8817_vm14, %v13365_v2  ;;  %vm11362_vm14 = vcmask 72704  }
 0x5c5   :  { %13779 = vmatprep.mubr.msk.f32.mxu1 %vm14174_vm3, %v16886_v5 }
 0x610   :  { %v8895_v29 = vpop.f32.mrf.mxu1 }
 0x612   :  { %v8897_v20 = vpop.f32.mrf.mxu1 }
 0x614   :  { %v8901_v59 = vpop.f32.mrf.mxu1 }
 0x616   :  { %v8903_v43 = vpop.f32.mrf.mxu1 }
 0x618   :  { %v8982_v57 = vpop.f32.mrf.mxu1 }
 0x619   :  { %v8983_v40 = vadd.f32 %v8982_v57, %v8895_v29 }
 0x61a   :  { %v8984_v0 = vpop.f32.mrf.mxu1 }
 0x61b   :  { %v8985_v13 = vadd.f32 %v8984_v0, %v8897_v20 }
 0x61c   :  { %v8988_v14 = vpop.f32.mrf.mxu1 }
 0x61d   :  { %v8989_v11 = vadd.f32 %v8988_v14, %v8901_v59 }
 0x61e   :  { %v8990_v3 = vpop.f32.mrf.mxu1 }
 0x61f   :  { %v8991_v60 = vadd.f32 %v8990_v3, %v8903_v43 }
 0x620   :  { %v9077_v49 = vpop.f32.mrf.mxu1  ;;  %v9375_v19 = vpop.f32.mrf.mxu0 }
 0x621   :  { %v9088_v39 = vadd.f32 %v9077_v49, %v8983_v40 }
 0x622   :  { %v9079_v62 = vpop.f32.mrf.mxu1  ;;  %v9377_v63 = vpop.f32.mrf.mxu0 }
 0x623   :  { %v9089_v52 = vadd.f32 %v9079_v62, %v8985_v13 }
 0x624   :  { %v9083_v17 = vpop.f32.mrf.mxu1  ;;  %v9381_v27 = vpop.f32.mrf.mxu0 }
 0x625   :  { %v9090_v58 = vadd.f32 %v9083_v17, %v8989_v11 }
 0x626   :  { %v9085_v8 = vpop.f32.mrf.mxu1  ;;  %v9383_v31 = vpop.f32.mrf.mxu0 }
 0x627   :  { %v9091_v38 = vadd.f32 %v9085_v8, %v8991_v60 }
 0x628   :  { %v9176_v54 = vpop.f32.mrf.mxu1  ;;  %v9575_v42 = vpop.f32.mrf.mxu0 }
 0x629   :  { %v9187_v34 = vadd.f32 %v9176_v54, %v9088_v39 }
 0x62a   :  { %v9178_v24 = vpop.f32.mrf.mxu1  ;;  %v16140_v26 = vpop.f32.mrf.mxu0 }
 0x62b   :  { %v9188_v4 = vadd.f32 %v9178_v24, %v9089_v52 }
 0x62c   :  { %v9182_v7 = vpop.f32.mrf.mxu1  ;;  %v16142_v10 = vpop.f32.mrf.mxu0 }
 0x62d   :  { %v9189_v22 = vadd.f32 %v9182_v7, %v9090_v58 }
 0x62e   :  { %v9184_v53 = vpop.f32.mrf.mxu1  ;;  %v16144_v41 = vpop.f32.mrf.mxu0 }
 0x62f   :  { %v9190_v29 = vadd.f32 %v9184_v53, %v9091_v38 }
 0x630   :  { %v9275_v21 = vpop.f32.mrf.mxu1  ;;  %v16146_v61 = vpop.f32.mrf.mxu0 }
 0x631   :  { %v9286_v33 = vadd.f32 %v9275_v21, %v9187_v34 }
 0x632   :  { %v9277_v47 = vpop.f32.mrf.mxu1  ;;  %v16148_v9 = vpop.f32.mrf.mxu0 }
 0x633   :  { %v9287_v36 = vadd.f32 %v9277_v47, %v9188_v4  ;;  %v9386_v20 = vadd.f32 %v9375_v19, %v9286_v33 }
 0x634   :  { %v9281_v32 = vpop.f32.mrf.mxu1  ;;  %v16150_v1 = vpop.f32.mrf.mxu0 }
 0x635   :  { %v9288_v59 = vadd.f32 %v9281_v32, %v9189_v22  ;;  %v9387_v14 = vadd.f32 %v9377_v63, %v9287_v36 }
 0x636   :  { %v9283_v15 = vpop.f32.mrf.mxu1  ;;  %v16152_v48 = vpop.f32.mrf.mxu0 }
 0x637   :  { %v9289_v43 = vadd.f32 %v9283_v15, %v9190_v29  ;;  %v9388_v17 = vadd.f32 %v9381_v27, %v9288_v59 }
 0x638   :  { %v9475_v12 = vpop.f32.mrf.mxu1  ;;  %v16154_v51 = vpop.f32.mrf.mxu0 }
 0x639   :  { %v9486_v3 = vadd.f32 %v9475_v12, %v9386_v20  ;;  %v9389_v7 = vadd.f32 %v9383_v31, %v9289_v43 }
 0x63a   :  { %v9477_v18 = vpop.f32.mrf.mxu1  ;;  %v16156_v25 = vpop.f32.mrf.mxu0 }
 0x63b   :  { %v9487_v54 = vadd.f32 %v9477_v18, %v9387_v14  ;;  %v9586_v21 = vadd.f32 %v9575_v42, %v9486_v3 }
 0x63c   :  { %v9481_v35 = vpop.f32.mrf.mxu1  ;;  %v16158_v55 = vpop.f32.mrf.mxu0 }
 0x63d   :  { %v9488_v47 = vadd.f32 %v9481_v35, %v9388_v17  ;;  %v9587_v32 = vadd.f32 %v16140_v26, %v9487_v54 }
 0x63e   :  { %v9483_v37 = vpop.f32.mrf.mxu1  ;;  %v16160_v16 = vpop.f32.mrf.mxu0 }
 0x63f   :  { %v9489_v40 = vadd.f32 %v9483_v37, %v9389_v7  ;;  %v9588_v12 = vadd.f32 %v16142_v10, %v9488_v47 }
 0x640   :  { %v9675_v28 = vpop.f32.mrf.mxu1  ;;  %v16162_v46 = vpop.f32.mrf.mxu0 }
 0x641   :  { %v9686_v13 = vadd.f32 %v9675_v28, %v9586_v21  ;;  %v9589_v18 = vadd.f32 %v16144_v41, %v9489_v40 }
 0x642   :  { %v9677_v44 = vpop.f32.mrf.mxu1  ;;  %v16164_v45 = vpop.f32.mrf.mxu0 }
 0x643   :  { %v9687_v39 = vadd.f32 %v9677_v44, %v9587_v32  ;;  %v9786_v52 = vadd.f32 %v16146_v61, %v9686_v13 }
 0x644   :  { %v9681_v23 = vpop.f32.mrf.mxu1  ;;  %v16166_v50 = vpop.f32.mrf.mxu0 }
 0x645   :  { %v9688_v31 = vadd.f32 %v9681_v23, %v9588_v12  ;;  %v9787_v34 = vadd.f32 %v16148_v9, %v9687_v39 }
 0x646   :  { %v9683_v30 = vpop.f32.mrf.mxu1  ;;  %v16168_v6 = vpop.f32.mrf.mxu0 }
 0x647   :  { %v9689_v60 = vadd.f32 %v9683_v30, %v9589_v18  ;;  %v9788_v58 = vadd.f32 %v16150_v1, %v9688_v31 }
 0x648   :  { %v9874_v56 = vpop.f32.mrf.mxu1  ;;  %v16170_v2 = vpop.f32.mrf.mxu0 }
 0x649   :  { %v9885_v26 = vadd.f32 %v9874_v56, %v9786_v52  ;;  %v9789_v33 = vadd.f32 %v16152_v48, %v9689_v60 }
 0x64a   :  { %v9876_v57 = vpop.f32.mrf.mxu1  ;;  %v16172_v0 = vpop.f32.mrf.mxu0 }
 0x64b   :  { %v9886_v4 = vadd.f32 %v9876_v57, %v9787_v34  ;;  %v9984_v41 = vadd.f32 %v16154_v51, %v9885_v26 }
 0x64c   :  { %v9880_v49 = vpop.f32.mrf.mxu1  ;;  %v16174_v62 = vpop.f32.mrf.mxu0 }
 0x64d   :  { %v9887_v38 = vadd.f32 %v9880_v49, %v9788_v58  ;;  %v9985_v23 = vadd.f32 %v16156_v25, %v9886_v4 }
 0x64e   :  { %v9882_v8 = vpop.f32.mrf.mxu1  ;;  %v16176_v24 = vpop.f32.mrf.mxu0 }
 0x64f   :  { %v9888_v22 = vadd.f32 %v9882_v8, %v9789_v33  ;;  %v9986_v56 = vadd.f32 %v16158_v55, %v9887_v38 }
 0x650   :  { %v10072_v53 = vpop.f32.mrf.mxu1  ;;  %v10570_v19 = vpop.f32.mrf.mxu0 }
 0x651   :  { %v10083_v36 = vadd.f32 %v10072_v53, %v9984_v41  ;;  %v9987_v1 = vadd.f32 %v16160_v16, %v9888_v22 }
 0x652   :  { %v10074_v63 = vpop.f32.mrf.mxu1  ;;  %v10572_v15 = vpop.f32.mrf.mxu0 }
 0x653   :  { %v10084_v29 = vadd.f32 %v10074_v63, %v9985_v23  ;;  %v10182_v59 = vadd.f32 %v16162_v46, %v10083_v36 }
 0x654   :  { %v10078_v11 = vpop.f32.mrf.mxu1  ;;  %v10576_v27 = vpop.f32.mrf.mxu0 }
 0x655   :  { %v10085_v57 = vadd.f32 %v10078_v11, %v9986_v56  ;;  %v10183_v51 = vadd.f32 %v16164_v45, %v10084_v29 }
 0x656   :  { %v10080_v42 = vpop.f32.mrf.mxu1  ;;  %v10578_v35 = vpop.f32.mrf.mxu0 }
 0x657   :  { %v10086_v43 = vadd.f32 %v10080_v42, %v9987_v1  ;;  %v10184_v49 = vadd.f32 %v16166_v50, %v10085_v57 }
 0x658   :  { %v10270_v37 = vpop.f32.mrf.mxu1  ;;  %v10770_v28 = vpop.f32.mrf.mxu0 }
 0x659   :  { %v10281_v3 = vadd.f32 %v10270_v37, %v10182_v59  ;;  %v10185_v55 = vadd.f32 %v16168_v6, %v10086_v43 }
 0x65a   :  { %v10272_v10 = vpop.f32.mrf.mxu1  ;;  %v10772_v44 = vpop.f32.mrf.mxu0 }
 0x65b   :  { %v10282_v17 = vadd.f32 %v10272_v10, %v10183_v51  ;;  %v10381_v7 = vadd.f32 %v16170_v2, %v10281_v3 }
 0x65c   :  { %v10276_v61 = vpop.f32.mrf.mxu1  ;;  %v10776_v30 = vpop.f32.mrf.mxu0 }
 0x65d   :  { %v10283_v16 = vadd.f32 %v10276_v61, %v10184_v49  ;;  %v10382_v46 = vadd.f32 %v16172_v0, %v10282_v17 }
 0x65e   :  { %v10278_v9 = vpop.f32.mrf.mxu1  ;;  %v10778_v14 = vpop.f32.mrf.mxu0 }
 0x65f   :  { %v10284_v47 = vadd.f32 %v10278_v9, %v10185_v55  ;;  %v10383_v40 = vadd.f32 %v16174_v62, %v10283_v16  ;;  %v11359_v55 = vld [vmem:[%s16843_s6 + $0x78] sm:$0xff] }
 0x660   :  { %v10470_v20 = vpop.f32.mrf.mxu1  ;;  %v10968_v8 = vpop.f32.mrf.mxu0  ;;  %11374 = vmatpush1.msra.mxu0 %v11359_v55 }
 0x661   :  { %v10481_v53 = vadd.f32 %v10470_v20, %v10381_v7  ;;  %v10384_v50 = vadd.f32 %v16176_v24, %v10284_v47  ;;  %v11358_v7 = vld [vmem:[%s16843_s6 + $0x70] sm:$0xff]  ;;  %11375 = vmatprep.subr.mxu0 %v16886_v5 }
 0x662   :  { %v10472_v48 = vpop.f32.mrf.mxu1  ;;  %v10970_v45 = vpop.f32.mrf.mxu0  ;;  %11376 = vmatpush1.msra.mxu0 %v11358_v7  ;;  %v11452_v7 = vld [vmem:[%s16844_s7 + $0x20] sm:$0xff] }
 0x663   :  { %v10482_v13 = vadd.f32 %v10472_v48, %v10382_v46  ;;  %v10581_v12 = vadd.f32 %v10570_v19, %v10481_v53  ;;  %11377 = vmatprep.subr.mxu0 %v16886_v5 }
 0x664   :  { %v10476_v25 = vpop.f32.mrf.mxu1  ;;  %v10974_v6 = vpop.f32.mrf.mxu0 }
 0x665   :  { %v10483_v39 = vadd.f32 %v10476_v25, %v10383_v40  ;;  %v10582_v18 = vadd.f32 %v10572_v15, %v10482_v13 }
 0x666   :  { %v10478_v54 = vpop.f32.mrf.mxu1  ;;  %v10976_v60 = vpop.f32.mrf.mxu0 }
 0x667   :  { %v10484_v2 = vadd.f32 %v10478_v54, %v10384_v50  ;;  %v10583_v42 = vadd.f32 %v10576_v27, %v10483_v39 }
 0x668   :  { %v10670_v21 = vpop.f32.mrf.mxu1  ;;  %v11166_v19 = vpop.f32.mrf.mxu0 }
 0x669   :  { %v10681_v52 = vadd.f32 %v10670_v21, %v10581_v12  ;;  %v10584_v26 = vadd.f32 %v10578_v35, %v10484_v2  ;;  %v11356_v12 = vld [vmem:[%s16843_s6 + $0x60] sm:$0xff]  ;;  %v11354_v2 = vld [vmem:[%s16843_s6 + $0x50] sm:$0xff] }
 0x66a   :  { %v10672_v32 = vpop.f32.mrf.mxu1  ;;  %v11168_v27 = vpop.f32.mrf.mxu0 }
 0x66b   :  { %v10682_v0 = vadd.f32 %v10672_v32, %v10582_v18  ;;  %v10781_v37 = vadd.f32 %v10770_v28, %v10681_v52  ;;  %v11357_v32 = vld [vmem:[%s16843_s6 + $0x68] sm:$0xff] }
 0x66c   :  { %v10676_v63 = vpop.f32.mrf.mxu1  ;;  %11378 = vmatpush1.msra.mxu0 %v11357_v32  ;;  %v11353_v52 = vld [vmem:[%s16843_s6 + $0x48] sm:$0xff]  ;;  %v11450_v32 = vld [vmem:[%s16844_s7 + $0x10] sm:$0xff] }
 0x66d   :  { %v10683_v58 = vadd.f32 %v10676_v63, %v10583_v42  ;;  %v10782_v4 = vadd.f32 %v10772_v44, %v10682_v0  ;;  %v11172_v44 = vpop.f32.mrf.mxu0  ;;  %11379 = vmatprep.subr.mxu0 %v16886_v5  ;;  %v11351_v42 = vld [vmem:[%s16843_s6 + $0x38] sm:$0xff]  ;;  %v11350_v0 = vld [vmem:[%s16843_s6 + $0x30] sm:$0xff] }
 0x66e   :  { %v10678_v11 = vpop.f32.mrf.mxu1  ;;  %11380 = vmatpush1.msra.mxu0 %v11356_v12  ;;  %v13404_v12 = vld [vmem:[%s16844_s7 + $0xf0] sm:$0xff] }
 0x66f   :  { %v10684_v10 = vadd.f32 %v10678_v11, %v10584_v26  ;;  %v10783_v41 = vadd.f32 %v10776_v30, %v10683_v58  ;;  %v11285_v30 = vpop.permute.xlu1 %11284  ;;  %v11174_v25 = vpop.f32.mrf.mxu0  ;;  %11381 = vmatprep.subr.mxu0 %v16886_v5  ;;  %v11347_v26 = vld [vmem:[%s16843_s6 + $0x18] sm:$0xff]  ;;  %v11345_v58 = vld [vmem:[%s16843_s6 + $0x8] sm:$0xff] }
 0x670   :  { %v10869_v31 = vpop.f32.mrf.mxu1 }
 0x671   :  { %v10880_v33 = vadd.f32 %v10869_v31, %v10781_v37  ;;  %v10784_v15 = vadd.f32 %v10778_v14, %v10684_v10  ;;  %v11352_v31 = vld [vmem:[%s16843_s6 + $0x40] sm:$0xff]  ;;  %v11346_v37 = vld [vmem:[%s16843_s6 + $0x10] sm:$0xff] }
 0x672   :  { %v10871_v34 = vpop.f32.mrf.mxu1  ;;  %v11360_v10 = vld [vmem:[%s16843_s6 + $0x80] sm:$0xff] }
 0x673   :  { %v10881_v38 = vadd.f32 %v10871_v34, %v10782_v4  ;;  %v10979_v23 = vadd.f32 %v10968_v8, %v10880_v33  ;;  %v11349_v34 = vld [vmem:[%s16843_s6 + $0x28] sm:$0xff] }
 0x674   :  { %v10875_v62 = vpop.f32.mrf.mxu1  ;;  %v11361_v4 = vld [vmem:[%s16843_s6 + $0x88] sm:$0x1] }
 0x675   :  { %v10882_v22 = vadd.f32 %v10875_v62, %v10783_v41  ;;  %v10980_v9 = vadd.f32 %v10970_v45, %v10881_v38  ;;  %v11290_v45 = vpop.permute.xlu0 %11289  ;;  %v11344_v62 = vld [vmem:[%s16843_s6] sm:$0xff]  ;;  %v13375_v38 = vld [vmem:[%s16844_s7 + $0x38] sm:$0xff] }
 0x676   :  { %v10877_v24 = vpop.f32.mrf.mxu1 }
 0x677   :  { %v10883_v56 = vadd.f32 %v10877_v24, %v10784_v15  ;;  %v10981_v28 = vadd.f32 %v10974_v6, %v10882_v22  ;;  %v11355_v6 = vld [vmem:[%s16843_s6 + $0x58] sm:$0xff]  ;;  %v13377_v24 = vld [vmem:[%s16844_s7 + $0x48] sm:$0xff]  ;;  %v13374_v22 = vld [vmem:[%s16844_s7 + $0x30] sm:$0xff] }
 0x678   :  { %v11067_v61 = vpop.f32.mrf.mxu1  ;;  %11382 = vmatpush1.msra.mxu0 %v11355_v6  ;;  %13770 = vmatpush3.msra.mxu1 %v13377_v24  ;;  %v13420_v6 = vld [vmem:[%s16844_s7 + $0x160] sm:$0xff] }
 0x679   :  { %v11078_v29 = vadd.f32 %v11067_v61, %v10979_v23  ;;  %v10982_v59 = vadd.f32 %v10976_v60, %v10883_v56  ;;  %11383 = vmatprep.subr.mxu0 %v16886_v5  ;;  %v11348_v60 = vld [vmem:[%s16843_s6 + $0x20] sm:$0xff]  ;;  %13771 = vmatprep.subr.mxu1 %v16886_v5 }
 0x67a   :  { %v11069_v36 = vpop.f32.mrf.mxu1  ;;  %11384 = vmatpush1.msra.mxu0 %v11354_v2  ;;  %v13419_v2 = vld [vmem:[%s16844_s7 + $0x158] sm:$0xff]  ;;  %v13387_v24 = vld [vmem:[%s16844_s7 + $0x80] sm:$0xff] }
 0x67b   :  { %v11079_v20 = vadd.f32 %v11069_v36, %v10980_v9  ;;  %v11177_v57 = vadd.f32 %v11166_v19, %v11078_v29  ;;  %11385 = vmatprep.subr.mxu0 %v16886_v5  ;;  %v13376_v19 = vld [vmem:[%s16844_s7 + $0x40] sm:$0xff] }
 0x67c   :  { %v11073_v35 = vpop.f32.mrf.mxu1  ;;  %11386 = vmatpush1.msra.mxu0 %v11353_v52  ;;  %13772 = vmatpush3.msra.mxu1 %v13376_v19  ;;  %v13382_v52 = vld [vmem:[%s16844_s7 + $0x60] sm:$0xff]  ;;  %v13429_v19 = vld [vmem:[%s16844_s7 + $0x198] sm:$0xff] }
 0x67d   :  { %v11080_v48 = vadd.f32 %v11073_v35, %v10981_v28  ;;  %v11178_v43 = vadd.f32 %v11168_v27, %v11079_v20  ;;  %11387 = vmatprep.subr.mxu0 %v16886_v5  ;;  %13773 = vmatprep.subr.mxu1 %v16886_v5 }
 0x67e   :  { %v11075_v1 = vpop.f32.mrf.mxu1  ;;  %11388 = vmatpush1.msra.mxu0 %v11352_v31  ;;  %13774 = vmatpush3.msra.mxu1 %v13375_v38  ;;  %v13418_v31 = vld [vmem:[%s16844_s7 + $0x150] sm:$0xff] }
 0x67f   :  { %v11081_v3 = vadd.f32 %v11075_v1, %v10982_v59  ;;  %v11179_v17 = vadd.f32 %v11172_v44, %v11080_v48  ;;  %11389 = vmatprep.subr.mxu0 %v16886_v5  ;;  %13775 = vmatprep.subr.mxu1 %v16886_v5  ;;  %v13396_v59 = vld [vmem:[%s16844_s7 + $0xc0] sm:$0xff]  ;;  %v13428_v38 = vld [vmem:[%s16844_s7 + $0x190] sm:$0xff] }
 0x680   :  { %v11265_v51 = vpop.f32.mrf.mxu1  ;;  %11390 = vmatpush1.msra.mxu0 %v11351_v42  ;;  %13776 = vmatpush3.msra.mxu1 %v13374_v22  ;;  %v13381_v42 = vld [vmem:[%s16844_s7 + $0x58] sm:$0xff]  ;;  %v13444_v22 = vld [vmem:[%s16844_s7 + $0x200] sm:$0xff] }
 0x681   :  { %v11276_v14 = vadd.f32 %v11265_v51, %v11177_v57  ;;  %v11180_v21 = vadd.f32 %v11174_v25, %v11081_v3  ;;  %11391 = vmatprep.subr.mxu0 %v16886_v5  ;;  %13777 = vmatprep.subr.mxu1 %v16886_v5  ;;  %v13393_v25 = vld [vmem:[%s16844_s7 + $0xa8] sm:$0xff] }
 0x682   :  { %v11267_v49 = vpop.f32.mrf.mxu1  ;;  %11392 = vmatpush1.msra.mxu0 %v11350_v0  ;;  %v13417_v0 = vld [vmem:[%s16844_s7 + $0x148] sm:$0xff] }
 0x683   :  { %v16197_v54 = vadd.f32 %v11285_v30, %v11276_v14  ;;  %v11277_v8 = vadd.f32 %v11267_v49, %v11178_v43  ;;  %11393 = vmatprep.subr.mxu0 %v16886_v5  ;;  %v13394_v14 = vld [vmem:[%s16844_s7 + $0xb0] sm:$0xff]  ;;  %v13373_v49 = vld [vmem:[%s16844_s7 + $0x28] sm:$0xff] }
 0x684   :  { %v11271_v16 = vpop.f32.mrf.mxu1  ;;  %11394 = vmatpush1.msra.mxu0 %v11349_v34  ;;  %13778 = vmatpush3.msra.mxu1 %v13373_v49  ;;  %v13380_v34 = vld [vmem:[%s16844_s7 + $0x50] sm:$0xff] }
 0x685   :  { %v11296_v46 = vmax.f32 %v16197_v54, 0.0  ;;  %v16206_v47 = vadd.f32 %v11285_v30, %v11277_v8  ;;  %v11278_v53 = vadd.f32 %v11271_v16, %v11179_v17  ;;  %11395 = vmatprep.subr.mxu0 %v16886_v5  ;;  %v13395_v30 = vld [vmem:[%s16844_s7 + $0xb8] sm:$0xff]  ;;  %v13392_v17 = vld [vmem:[%s16844_s7 + $0xa0] sm:$0xff]  ;;  %13782 = vmatprep.subr.mxu1 %v16886_v5  ;;  %v13408_v16 = vld [vmem:[%s16844_s7 + $0x110] sm:$0xff] }
 0x686   :  { %v11273_v40 = vpop.f32.mrf.mxu1  ;;  %11396 = vmatpush1.msra.mxu0 %v11348_v60  ;;  %v13416_v60 = vld [vmem:[%s16844_s7 + $0x140] sm:$0xff]  ;;  %v13452_v49 = vld [vmem:[%s16844_s7 + $0x230] sm:$0xff] }
 0x687   :  { %v11297_v13 = vmax.f32 %v16206_v47, 0.0  ;;  %v16213_v63 = vadd.f32 %v11290_v45, %v11278_v53  ;;  %v11279_v50 = vadd.f32 %v11273_v40, %v11180_v21  ;;  %11304 = vrot.lane.b32.xlu1 %v11296_v46, %s14166_s19  ;;  %11397 = vmatprep.subr.mxu0 %v16886_v5  ;;  %v13407_v47 = vld [vmem:[%s16844_s7 + $0x108] sm:$0xff] }
 0x688   :  { %11398 = vmatpush1.msra.mxu0 %v11347_v26 }
 0x689   :  { %v11298_v39 = vmax.f32 %v16213_v63, 0.0  ;;  %v16223_v11 = vadd.f32 %v11290_v45, %v11279_v50  ;;  %11306 = vrot.lane.b32.xlu0 %v11297_v13, %s14166_s19  ;;  %11399 = vmatprep.subr.mxu0 %v16886_v5  ;;  %v13406_v45 = vld [vmem:[%s16844_s7 + $0x100] sm:$0xff]  ;;  %v13405_v63 = vld [vmem:[%s16844_s7 + $0xf8] sm:$0xff] }
 0x68a   :  { %11400 = vmatpush1.msra.mxu0 %v11346_v37  ;;  %v11448_v50 = vld [vmem:[%s16844_s7] sm:$0xff]  ;;  %v13390_v37 = vld [vmem:[%s16844_s7 + $0x98] sm:$0xff] }
 0x68b   :  { %v11299_v18 = vmax.f32 %v16223_v11, 0.0  ;;  %11308 = vrot.lane.b32.xlu1 %v11298_v39, %s14166_s19  ;;  %11401 = vmatprep.subr.mxu0 %v16886_v5  ;;  %v13384_v11 = vld [vmem:[%s16844_s7 + $0x70] sm:$0xff] }
 0x68c   :  { %11402 = vmatpush1.msra.mxu0 %v11345_v58  ;;  %v13432_v58 = vld [vmem:[%s16844_s7 + $0x1b0] sm:$0xff] }
 0x68d   :  { %11310 = vrot.lane.b32.xlu0 %v11299_v18, %s14166_s19  ;;  %11403 = vmatprep.subr.mxu0 %v16886_v5 }
 0x68e   :  { %11404 = vmatpush1.msra.mxu0 %v11344_v62  ;;  %v13389_v62 = vld [vmem:[%s16844_s7 + $0x90] sm:$0xff] }
 0x68f   :  { %11433 = vmatprep.subr.mxu0 %v16886_v5 }
 0x690   :  { %13370 = vmatpush2.msk.msra.mxu0 %vm11369_vm2, %v11361_v4  ;;  %v13431_v4 = vld [vmem:[%s16844_s7 + $0x1a8] sm:$0xff] }
 0x691   :  { %11435 = vmatprep.subr.mxu0 %v16886_v5 }
 0x692   :  { %11436 = vmatpush2.msra.mxu0 %v11360_v10  ;;  %v13388_v10 = vld [vmem:[%s16844_s7 + $0x88] sm:$0xff] }
 0x693   :  { %13821 = vmatprep.subr.mxu0 %v16886_v5 }
 0x6f9   :  { %v11305_v33 = vpop.permute.xlu1 %11304 }
 0x6fb   :  { %v11307_v41 = vpop.permute.xlu0 %11306 }
 0x6fc   :  { %v11312_v61 = vsel %vm91_vm0, %v11305_v33, %v11307_v41  ;;  %v11319_v15 = vmax.f32 %v11297_v13, %v11307_v41  ;;  %v11449_v13 = vld [vmem:[%s16844_s7 + $0x8] sm:$0xff]  ;;  %v13430_v33 = vld [vmem:[%s16844_s7 + $0x1a0] sm:$0xff]  ;;  %v13386_v41 = vld [vmem:[%s16844_s7 + $0x78] sm:$0xff] }
 0x6fd   :  { %v11318_v23 = vmax.f32 %v11296_v46, %v11312_v61  ;;  %v11309_v36 = vpop.permute.xlu1 %11308  ;;  %v11451_v46 = vld [vmem:[%s16844_s7 + $0x18] sm:$0xff] }
 0x6fe   :  { %11328 = vrot.lane.b32.xlu0 %v11319_v15, %s14187_s1 }
 0x6ff   :  { %11326 = vrot.lane.b32.xlu1 %v11318_v23, %s14187_s1  ;;  %v11311_v27 = vpop.permute.xlu0 %11310 }
 0x700   :  { %v11313_v9 = vsel %vm91_vm0, %v11309_v36, %v11311_v27  ;;  %v11321_v56 = vmax.f32 %v11299_v18, %v11311_v27  ;;  %vm11461_vm0 = vcmask 326656   ;;  %v13383_v18 = vld [vmem:[%s16844_s7 + $0x68] sm:$0xff]  ;;  %v13401_v36 = vld [vmem:[%s16844_s7 + $0xe0] sm:$0xff]  ;;  %v13443_v27 = vld [vmem:[%s16844_s7 + $0x1f8] sm:$0xff] }
 0x701   :  { %v11320_v29 = vmax.f32 %v11298_v39, %v11313_v9  ;;  %v13400_v9 = vld [vmem:[%s16844_s7 + $0xd8] sm:$0xff] }
 0x702   :  { %11332 = vrot.lane.b32.xlu0 %v11321_v56, %s14187_s1 }
 0x703   :  { %11330 = vrot.lane.b32.xlu1 %v11320_v29, %s14187_s1 }
 0x770   :  { %v11329_v35 = vpop.permute.xlu0 %11328 }
 0x771   :  { %v11341_v28 = vmax.f32 %v11319_v15, %v11329_v35  ;;  %v11327_v20 = vpop.permute.xlu1 %11326 }
 0x772   :  { %v11334_v1 = vsel %vm9297_vm12, %v11327_v20, %v11329_v35  ;;  %v13441_v35 = vld [vmem:[%s16844_s7 + $0x1e8] sm:$0xff]  ;;  %v13440_v20 = vld [vmem:[%s16844_s7 + $0x1e0] sm:$0xff] }
 0x773   :  { %v11340_v44 = vmax.f32 %v11318_v23, %v11334_v1  ;;  %13371 = vmatprep.mubr.msk.f32.mxu0 %vm11362_vm14, %v11341_v28  ;;  %v13402_v23 = vld [vmem:[%s16844_s7 + $0xe8] sm:$0xff] }
 0x774   :  { %v11333_v57 = vpop.permute.xlu0 %11332  ;;  %v13398_v28 = vld [vmem:[%s16844_s7 + $0xc8] sm:$0xff] }
 0x775   :  { %v11343_v48 = vmax.f32 %v11321_v56, %v11333_v57  ;;  %v11331_v51 = vpop.permute.xlu1 %11330  ;;  %11438 = vmatmul.mubr.f32.vlgmr.msra.gmra.mxu0 %v11340_v44  ;;  %v13442_v56 = vld [vmem:[%s16844_s7 + $0x1f0] sm:$0xff] }
 0x776   :  { %v11335_v43 = vsel %vm9297_vm12, %v11331_v51, %v11333_v57  ;;  %13822 = vmatpush3.msra.mxu0 %v13396_v59  ;;  %v13414_v59 = vld [vmem:[%s16844_s7 + $0x138] sm:$0xff]  ;;  %v13456_v57 = vld [vmem:[%s16844_s7 + $0x250] sm:$0xff]  ;;  %v13455_v51 = vld [vmem:[%s16844_s7 + $0x248] sm:$0xff] }
 0x777   :  { %v11342_v3 = vmax.f32 %v11320_v29, %v11335_v43  ;;  %13372 = vmatprep.mubr.msk.f32.mxu0 %vm11362_vm14, %v11343_v48  ;;  %13823 = vmatprep.subr.mxu0 %v16886_v5  ;;  %v13399_v29 = vld [vmem:[%s16844_s7 + $0xd0] sm:$0xff]  ;;  %v13454_v43 = vld [vmem:[%s16844_s7 + $0x240] sm:$0xff] }
 0x778   :  { %13824 = vmatpush3.msra.mxu0 %v13395_v30  ;;  %v13413_v48 = vld [vmem:[%s16844_s7 + $0x130] sm:$0xff]  ;;  %v13412_v30 = vld [vmem:[%s16844_s7 + $0x128] sm:$0xff] }
 0x779   :  { %11443 = vmatmul.mubr.f32.gmra.mxu0 %v11342_v3  ;;  %13825 = vmatprep.subr.mxu0 %v16886_v5  ;;  %v13411_v3 = vld [vmem:[%s16844_s7 + $0x120] sm:$0xff] }
 0x77a   :  { %13826 = vmatpush3.msra.mxu0 %v13394_v14  ;;  %13831 = vmatprep.mubr.msk.f32.mxu0 %vm14174_vm3, %v16886_v5  ;;  %v13453_v14 = vld [vmem:[%s16844_s7 + $0x238] sm:$0xff] }
 0x77b   :  { %13827 = vmatprep.subr.mxu0 %v16886_v5 }
 0x77c   :  { %13828 = vmatpush3.msra.mxu0 %v13393_v25  ;;  %v13410_v25 = vld [vmem:[%s16844_s7 + $0x118] sm:$0xff] }
 0x77d   :  { %13829 = vmatprep.subr.mxu0 %v16886_v5 }
 0x77e   :  { %13830 = vmatpush3.msra.mxu0 %v13392_v17 }
 0x77f   :  { %13847 = vmatprep.subr.mxu0 %v16886_v5 }
 0x835   :  { %v16351_v54 = vpop.f32.mrf.mxu0 }
 0x836   :  { %v11460_v8 = vrot.slane %v16351_v54, 1  ;;  %v11772_v55 = vrot.slane %v16351_v54, 4  ;;  %v11932_v39 = vrot.slane %v16351_v54, 6  ;;  %v11612_v26 = vrot.slane %v16351_v54, 2 }
 0x837   :  { %v11441_v21 = vpop.f32.mrf.mxu0  ;;  %v11692_v61 = vrot.slane %v16351_v54, 3  ;;  %v11852_v1 = vrot.slane %v16351_v54, 5  ;;  %v12012_v17 = vrot.slane %v16351_v54, 7 }
 0x838   :  { %13780 = vmatmul.mubr.msk.f32.vlgmr.msra.gmra.mxu1 %vm11461_vm0, %v11460_v8  ;;  %13832 = vmatmul.mubr.msk.f32.vlgmr.msra.gmra.mxu0 %vm11461_vm0, %v11772_v55  ;;  %v13426_v8 = vld [vmem:[%s16844_s7 + $0x188] sm:$0xff] }
 0x839   :  { %13783 = vmatpush3.msra.mxu1 %v11452_v7  ;;  %13848 = vmatpush3.msra.mxu0 %v13408_v16  ;;  %v16369_v53 = vpop.f32.mrf.mxu0  ;;  %v13425_v7 = vld [vmem:[%s16844_s7 + $0x180] sm:$0xff]  ;;  %v13423_v16 = vld [vmem:[%s16844_s7 + $0x170] sm:$0xff]  ;;  %v13422_v21 = vld [vmem:[%s16844_s7 + $0x168] sm:$0xff] }
 0x83a   :  { %13784 = vmatprep.subr.mxu1 %v16886_v5  ;;  %13849 = vmatprep.subr.mxu0 %v16886_v5  ;;  %v12252_v15 = vrot.slane %v16369_v53, 2  ;;  %v12412_v44 = vrot.slane %v16369_v53, 4  ;;  %v12572_v55 = vrot.slane %v16369_v53, 6 }
 0x83b   :  { %13785 = vmatpush3.msra.mxu1 %v11451_v46  ;;  %13850 = vmatpush3.msra.mxu0 %v13407_v47  ;;  %v11446_v40 = vpop.f32.mrf.mxu0  ;;  %v12172_v46 = vrot.slane %v16369_v53, 1  ;;  %v13438_v47 = vld [vmem:[%s16844_s7 + $0x1d8] sm:$0xff] }
 0x83c   :  { %13786 = vmatprep.subr.mxu1 %v16886_v5  ;;  %13851 = vmatprep.subr.mxu0 %v16886_v5  ;;  %v13435_v40 = vld [vmem:[%s16844_s7 + $0x1c0] sm:$0xff] }
 0x83d   :  { %13787 = vmatpush3.msra.mxu1 %v11450_v32  ;;  %13852 = vmatpush3.msra.mxu0 %v13406_v45  ;;  %v13437_v32 = vld [vmem:[%s16844_s7 + $0x1d0] sm:$0xff]  ;;  %v13436_v45 = vld [vmem:[%s16844_s7 + $0x1c8] sm:$0xff] }
 0x83e   :  { %13788 = vmatprep.subr.mxu1 %v16886_v5  ;;  %13853 = vmatprep.subr.mxu0 %v16886_v5 }
 0x83f   :  { %13789 = vmatpush3.msra.mxu1 %v11449_v13  ;;  %13854 = vmatpush3.msra.mxu0 %v13405_v63  ;;  %v13434_v13 = vld [vmem:[%s16844_s7 + $0x1b8] sm:$0xff]  ;;  %v12332_v63 = vrot.slane %v16369_v53, 3 }
 0x840   :  { %13790 = vmatprep.subr.mxu1 %v16886_v5  ;;  %13855 = vmatprep.subr.mxu0 %v16886_v5 }
 0x841   :  { %13791 = vmatpush3.msra.mxu1 %v11448_v50  ;;  %13792 = vmatprep.mubr.msk.f32.mxu1 %vm14174_vm3, %v16886_v5  ;;  %v13450_v50 = vld [vmem:[%s16844_s7 + $0x228] sm:$0xff] }
 0x842   :  { %13856 = vmatpush3.msra.mxu0 %v13404_v12  ;;  %13857 = vmatprep.mubr.msk.f32.mxu0 %vm14174_vm3, %v16886_v5  ;;  %v13449_v12 = vld [vmem:[%s16844_s7 + $0x220] sm:$0xff] }
 0x843   :  { %13793 = vmatmul.mubr.msk.f32.vlgmr.msra.gmra.mxu1 %vm11461_vm0, %v16351_v54  ;;  %13795 = vmatprep.subr.mxu1 %v16886_v5  ;;  %v13424_v54 = vld [vmem:[%s16844_s7 + $0x178] sm:$0xff] }
 0x844   :  { %13858 = vmatmul.mubr.msk.f32.vlgmr.msra.gmra.mxu0 %vm11461_vm0, %v11932_v39  ;;  %13873 = vmatprep.subr.mxu0 %v16886_v5  ;;  %v13448_v39 = vld [vmem:[%s16844_s7 + $0x218] sm:$0xff] }
 0x845   :  { %13796 = vmatpush3.msra.mxu1 %v13384_v11  ;;  %13874 = vmatpush3.msra.mxu0 %v13420_v6  ;;  %v13447_v11 = vld [vmem:[%s16844_s7 + $0x210] sm:$0xff]  ;;  %v13446_v6 = vld [vmem:[%s16844_s7 + $0x208] sm:$0xff] }
 0x846   :  { %13797 = vmatprep.subr.mxu1 %v16886_v5  ;;  %13875 = vmatprep.subr.mxu0 %v16886_v5 }
 0x847   :  { %13798 = vmatpush3.msra.mxu1 %v13383_v18  ;;  %13876 = vmatpush3.msra.mxu0 %v13419_v2  ;;  %v12492_v18 = vrot.slane %v16369_v53, 5  ;;  %v13462_v2 = vld [vmem:[%s16844_s7 + $0x278] sm:$0xff] }
 0x848   :  { %13799 = vmatprep.subr.mxu1 %v16886_v5  ;;  %13877 = vmatprep.subr.mxu0 %v16886_v5 }
 0x849   :  { %13800 = vmatpush3.msra.mxu1 %v13382_v52  ;;  %13878 = vmatpush3.msra.mxu0 %v13418_v31  ;;  %v13461_v52 = vld [vmem:[%s16844_s7 + $0x270] sm:$0xff]  ;;  %v13460_v31 = vld [vmem:[%s16844_s7 + $0x268] sm:$0xff] }
 0x84a   :  { %13801 = vmatprep.subr.mxu1 %v16886_v5  ;;  %13879 = vmatprep.subr.mxu0 %v16886_v5 }
 0x84b   :  { %13802 = vmatpush3.msra.mxu1 %v13381_v42  ;;  %13880 = vmatpush3.msra.mxu0 %v13417_v0  ;;  %v13459_v42 = vld [vmem:[%s16844_s7 + $0x260] sm:$0xff]  ;;  %v13458_v0 = vld [vmem:[%s16844_s7 + $0x258] sm:$0xff] }
 0x84c   :  { %13803 = vmatprep.subr.mxu1 %v16886_v5  ;;  %13881 = vmatprep.subr.mxu0 %v16886_v5 }
 0x84d   :  { %13804 = vmatpush3.msra.mxu1 %v13380_v34  ;;  %13805 = vmatprep.mubr.msk.f32.mxu1 %vm14174_vm3, %v16886_v5  ;;  %v12652_v34 = vrot.slane %v16369_v53, 7 }
 0x84e   :  { %13882 = vmatpush3.msra.mxu0 %v13416_v60  ;;  %13883 = vmatprep.mubr.msk.f32.mxu0 %vm14174_vm3, %v16886_v5  ;;  %v12744_v60 = vld [vmem:[%s16846_s9 + $0x78] sm:$0xff] }
 0x84f   :  { %13806 = vmatmul.mubr.msk.f32.vlgmr.msra.gmra.mxu1 %vm11461_vm0, %v11612_v26  ;;  %13808 = vmatprep.subr.mxu1 %v16886_v5  ;;  %v12743_v26 = vld [vmem:[%s16846_s9 + $0x70] sm:$0xff] }
 0x850   :  { %13884 = vmatmul.mubr.msk.f32.vlgmr.msra.gmra.mxu0 %vm11461_vm0, %v16369_v53  ;;  %13899 = vmatprep.subr.mxu0 %v16886_v5  ;;  %v12742_v53 = vld [vmem:[%s16846_s9 + $0x68] sm:$0xff] }
 0x851   :  { %13809 = vmatpush3.msra.mxu1 %v13390_v37  ;;  %13900 = vmatpush3.msra.mxu0 %v13432_v58  ;;  %v12741_v37 = vld [vmem:[%s16846_s9 + $0x60] sm:$0xff]  ;;  %v12740_v58 = vld [vmem:[%s16846_s9 + $0x58] sm:$0xff] }
 0x852   :  { %13810 = vmatprep.subr.mxu1 %v16886_v5  ;;  %13901 = vmatprep.subr.mxu0 %v16886_v5 }
 0x853   :  { %13811 = vmatpush3.msra.mxu1 %v13389_v62  ;;  %13902 = vmatpush3.msra.mxu0 %v13431_v4  ;;  %v12739_v62 = vld [vmem:[%s16846_s9 + $0x50] sm:$0xff]  ;;  %v12738_v4 = vld [vmem:[%s16846_s9 + $0x48] sm:$0xff] }
 0x854   :  { %13812 = vmatprep.subr.mxu1 %v16886_v5  ;;  %13903 = vmatprep.subr.mxu0 %v16886_v5 }
 0x855   :  { %13813 = vmatpush3.msra.mxu1 %v13388_v10  ;;  %13904 = vmatpush3.msra.mxu0 %v13430_v33  ;;  %v12737_v10 = vld [vmem:[%s16846_s9 + $0x40] sm:$0xff]  ;;  %v12736_v33 = vld [vmem:[%s16846_s9 + $0x38] sm:$0xff] }
 0x856   :  { %13814 = vmatprep.subr.mxu1 %v16886_v5  ;;  %13905 = vmatprep.subr.mxu0 %v16886_v5 }
 0x857   :  { %13815 = vmatpush3.msra.mxu1 %v13387_v24  ;;  %13906 = vmatpush3.msra.mxu0 %v13429_v19  ;;  %v12735_v24 = vld [vmem:[%s16846_s9 + $0x30] sm:$0xff]  ;;  %v12734_v19 = vld [vmem:[%s16846_s9 + $0x28] sm:$0xff] }
 0x858   :  { %13816 = vmatprep.subr.mxu1 %v16886_v5  ;;  %13907 = vmatprep.subr.mxu0 %v16886_v5 }
 0x859   :  { %13817 = vmatpush3.msra.mxu1 %v13386_v41  ;;  %13818 = vmatprep.mubr.msk.f32.mxu1 %vm14174_vm3, %v16886_v5  ;;  %v12733_v41 = vld [vmem:[%s16846_s9 + $0x20] sm:$0xff] }
 0x85a   :  { %13908 = vmatpush3.msra.mxu0 %v13428_v38  ;;  %13909 = vmatprep.mubr.msk.f32.mxu0 %vm14174_vm3, %v16886_v5  ;;  %v12732_v38 = vld [vmem:[%s16846_s9 + $0x18] sm:$0xff] }
 0x85b   :  { %13819 = vmatmul.mubr.msk.f32.vlgmr.msra.gmra.mxu1 %vm11461_vm0, %v11692_v61  ;;  %13834 = vmatprep.subr.mxu1 %v16886_v5  ;;  %v12731_v61 = vld [vmem:[%s16846_s9 + $0x10] sm:$0xff] }
 0x85c   :  { %13910 = vmatmul.mubr.msk.f32.vlgmr.msra.gmra.mxu0 %vm11461_vm0, %v12252_v15  ;;  %13925 = vmatprep.subr.mxu0 %v16886_v5  ;;  %v12730_v15 = vld [vmem:[%s16846_s9 + $0x8] sm:$0xff] }
 0x85d   :  { %13835 = vmatpush3.msra.mxu1 %v13402_v23  ;;  %13926 = vmatpush3.msra.mxu0 %v13444_v22  ;;  %v12729_v23 = vld [vmem:[%s16846_s9] sm:$0xff]  ;;  %v12832_v22 = vld [vmem:[%s16848_s11 + $0x78] sm:$0xff] }
 0x85e   :  { %13836 = vmatprep.subr.mxu1 %v16886_v5  ;;  %13927 = vmatprep.subr.mxu0 %v16886_v5 }
 0x85f   :  { %13837 = vmatpush3.msra.mxu1 %v13401_v36  ;;  %13928 = vmatpush3.msra.mxu0 %v13443_v27  ;;  %v12831_v36 = vld [vmem:[%s16848_s11 + $0x70] sm:$0xff]  ;;  %v12830_v27 = vld [vmem:[%s16848_s11 + $0x68] sm:$0xff] }
 0x860   :  { %13838 = vmatprep.subr.mxu1 %v16886_v5  ;;  %13929 = vmatprep.subr.mxu0 %v16886_v5 }
 0x861   :  { %13839 = vmatpush3.msra.mxu1 %v13400_v9  ;;  %13930 = vmatpush3.msra.mxu0 %v13442_v56  ;;  %v12829_v9 = vld [vmem:[%s16848_s11 + $0x60] sm:$0xff]  ;;  %v12828_v56 = vld [vmem:[%s16848_s11 + $0x58] sm:$0xff] }
 0x862   :  { %13840 = vmatprep.subr.mxu1 %v16886_v5  ;;  %13931 = vmatprep.subr.mxu0 %v16886_v5 }
 0x863   :  { %13841 = vmatpush3.msra.mxu1 %v13399_v29  ;;  %13932 = vmatpush3.msra.mxu0 %v13441_v35  ;;  %v12827_v29 = vld [vmem:[%s16848_s11 + $0x50] sm:$0xff]  ;;  %v12826_v35 = vld [vmem:[%s16848_s11 + $0x48] sm:$0xff] }
 0x864   :  { %13842 = vmatprep.subr.mxu1 %v16886_v5  ;;  %13933 = vmatprep.subr.mxu0 %v16886_v5 }
 0x865   :  { %13843 = vmatpush3.msra.mxu1 %v13398_v28  ;;  %13844 = vmatprep.mubr.msk.f32.mxu1 %vm14174_vm3, %v16886_v5  ;;  %v12825_v28 = vld [vmem:[%s16848_s11 + $0x40] sm:$0xff] }
 0x866   :  { %13934 = vmatpush3.msra.mxu0 %v13440_v20  ;;  %13935 = vmatprep.mubr.msk.f32.mxu0 %vm14174_vm3, %v16886_v5  ;;  %v12824_v20 = vld [vmem:[%s16848_s11 + $0x38] sm:$0xff] }
 0x867   :  { %13845 = vmatmul.mubr.msk.f32.vlgmr.msra.gmra.mxu1 %vm11461_vm0, %v11852_v1  ;;  %13860 = vmatprep.subr.mxu1 %v16886_v5  ;;  %v12823_v1 = vld [vmem:[%s16848_s11 + $0x30] sm:$0xff] }
 0x868   :  { %13936 = vmatmul.mubr.msk.f32.vlgmr.msra.gmra.mxu0 %vm11461_vm0, %v12412_v44  ;;  %13951 = vmatprep.subr.mxu0 %v16886_v5  ;;  %v12822_v44 = vld [vmem:[%s16848_s11 + $0x28] sm:$0xff] }
 0x869   :  { %13861 = vmatpush3.msra.mxu1 %v13414_v59  ;;  %13952 = vmatpush3.msra.mxu0 %v13456_v57  ;;  %v12821_v59 = vld [vmem:[%s16848_s11 + $0x20] sm:$0xff] }
 0x86a   :  { %13862 = vmatprep.subr.mxu1 %v16886_v5  ;;  %13953 = vmatprep.subr.mxu0 %v16886_v5 }
 0x86b   :  { %13863 = vmatpush3.msra.mxu1 %v13413_v48  ;;  %13954 = vmatpush3.msra.mxu0 %v13455_v51  ;;  %v12820_v51 = vld [vmem:[%s16848_s11 + $0x18] sm:$0xff] }
 0x86c   :  { %13864 = vmatprep.subr.mxu1 %v16886_v5  ;;  %13955 = vmatprep.subr.mxu0 %v16886_v5 }
 0x86d   :  { %13865 = vmatpush3.msra.mxu1 %v13412_v30  ;;  %13956 = vmatpush3.msra.mxu0 %v13454_v43 }
 0x86e   :  { %13866 = vmatprep.subr.mxu1 %v16886_v5  ;;  %13957 = vmatprep.subr.mxu0 %v16886_v5 }
 0x86f   :  { %13867 = vmatpush3.msra.mxu1 %v13411_v3  ;;  %13958 = vmatpush3.msra.mxu0 %v13453_v14 }
 0x870   :  { %13868 = vmatprep.subr.mxu1 %v16886_v5  ;;  %13959 = vmatprep.subr.mxu0 %v16886_v5 }
 0x871   :  { %13869 = vmatpush3.msra.mxu1 %v13410_v25  ;;  %13870 = vmatprep.mubr.msk.f32.mxu1 %vm14174_vm3, %v16886_v5 }
 0x872   :  { %13960 = vmatpush3.msra.mxu0 %v13452_v49  ;;  %13961 = vmatprep.mubr.msk.f32.mxu0 %vm14174_vm3, %v16886_v5 }
 0x873   :  { %13871 = vmatmul.mubr.msk.f32.vlgmr.msra.gmra.mxu1 %vm11461_vm0, %v12012_v17  ;;  %13886 = vmatprep.subr.mxu1 %v16886_v5 }
 0x874   :  { %13962 = vmatmul.mubr.msk.f32.vlgmr.msra.gmra.mxu0 %vm11461_vm0, %v12572_v55  ;;  %13887 = vmatpush3.msra.mxu1 %v13426_v8 }
 0x875   :  { %13888 = vmatprep.subr.mxu1 %v16886_v5  ;;  %13896 = vmatprep.mubr.msk.f32.mxu1 %vm14174_vm3, %v16886_v5 }
 0x876   :  { %13889 = vmatpush3.msra.mxu1 %v13425_v7  ;;  %13977 = vmatprep.subr.mxu0 %v16886_v5 }
 0x877   :  { %13890 = vmatprep.subr.mxu1 %v16886_v5  ;;  %14009 = vmatprep.mubr.msk.f32.mxu0 %vm14174_vm3, %v16886_v5 }
 0x878   :  { %13891 = vmatpush3.msra.mxu1 %v13424_v54  ;;  %13978 = vmatpush3.msra.mxu0 %v12744_v60 }
 0x879   :  { %13892 = vmatprep.subr.mxu1 %v16886_v5  ;;  %13979 = vmatprep.subr.mxu0 %v16886_v5 }
 0x87a   :  { %13893 = vmatpush3.msra.mxu1 %v13423_v16  ;;  %13980 = vmatpush3.msra.mxu0 %v12743_v26 }
 0x87b   :  { %13894 = vmatprep.subr.mxu1 %v16886_v5  ;;  %13981 = vmatprep.subr.mxu0 %v16886_v5 }
 0x87c   :  { %13895 = vmatpush3.msra.mxu1 %v13422_v21  ;;  %13982 = vmatpush3.msra.mxu0 %v12742_v53 }
 0x87d   :  { %13897 = vmatmul.mubr.msk.f32.vlgmr.msra.gmra.mxu1 %vm11461_vm0, %v12172_v46  ;;  %13912 = vmatprep.subr.mxu1 %v16886_v5 }
 0x87e   :  { %13913 = vmatpush3.msra.mxu1 %v13438_v47  ;;  %13922 = vmatprep.mubr.msk.f32.mxu1 %vm14174_vm3, %v16886_v5 }
 0x87f   :  { %13914 = vmatprep.subr.mxu1 %v16886_v5  ;;  %13983 = vmatprep.subr.mxu0 %v16886_v5 }
 0x880   :  { %13915 = vmatpush3.msra.mxu1 %v13437_v32  ;;  %13984 = vmatpush3.msra.mxu0 %v12741_v37 }
 0x881   :  { %13916 = vmatprep.subr.mxu1 %v16886_v5  ;;  %13985 = vmatprep.subr.mxu0 %v16886_v5 }
 0x882   :  { %13917 = vmatpush3.msra.mxu1 %v13436_v45  ;;  %13986 = vmatpush3.msra.mxu0 %v12740_v58 }
 0x883   :  { %13918 = vmatprep.subr.mxu1 %v16886_v5  ;;  %13987 = vmatprep.subr.mxu0 %v16886_v5 }
 0x884   :  { %13919 = vmatpush3.msra.mxu1 %v13435_v40  ;;  %13988 = vmatpush3.msra.mxu0 %v12739_v62 }
 0x885   :  { %13920 = vmatprep.subr.mxu1 %v16886_v5  ;;  %13989 = vmatprep.subr.mxu0 %v16886_v5 }
 0x886   :  { %13921 = vmatpush3.msra.mxu1 %v13434_v13  ;;  %13990 = vmatpush3.msra.mxu0 %v12738_v4 }
 0x887   :  { %13923 = vmatmul.mubr.msk.f32.vlgmr.msra.gmra.mxu1 %vm11461_vm0, %v12332_v63  ;;  %13938 = vmatprep.subr.mxu1 %v16886_v5 }
 0x888   :  { %13939 = vmatpush3.msra.mxu1 %v13450_v50  ;;  %13948 = vmatprep.mubr.msk.f32.mxu1 %vm14174_vm3, %v16886_v5 }
 0x889   :  { %13940 = vmatprep.subr.mxu1 %v16886_v5  ;;  %13991 = vmatprep.subr.mxu0 %v16886_v5 }
 0x88a   :  { %13941 = vmatpush3.msra.mxu1 %v13449_v12  ;;  %13992 = vmatpush3.msra.mxu0 %v12737_v10 }
 0x88b   :  { %13942 = vmatprep.subr.mxu1 %v16886_v5  ;;  %13993 = vmatprep.subr.mxu0 %v16886_v5 }
 0x88c   :  { %13943 = vmatpush3.msra.mxu1 %v13448_v39  ;;  %13994 = vmatpush3.msra.mxu0 %v12736_v33 }
 0x88d   :  { %13944 = vmatprep.subr.mxu1 %v16886_v5  ;;  %13995 = vmatprep.subr.mxu0 %v16886_v5 }
 0x88e   :  { %13945 = vmatpush3.msra.mxu1 %v13447_v11  ;;  %13996 = vmatpush3.msra.mxu0 %v12735_v24 }
 0x88f   :  { %13946 = vmatprep.subr.mxu1 %v16886_v5  ;;  %13997 = vmatprep.subr.mxu0 %v16886_v5 }
 0x890   :  { %13947 = vmatpush3.msra.mxu1 %v13446_v6  ;;  %13998 = vmatpush3.msra.mxu0 %v12734_v19 }
 0x891   :  { %13949 = vmatmul.mubr.msk.f32.vlgmr.msra.gmra.mxu1 %vm11461_vm0, %v12492_v18  ;;  %13964 = vmatprep.subr.mxu1 %v16886_v5 }
 0x892   :  { %13965 = vmatpush3.msra.mxu1 %v13462_v2  ;;  %13974 = vmatprep.mubr.msk.f32.mxu1 %vm14174_vm3, %v16886_v5 }
 0x893   :  { %13966 = vmatprep.subr.mxu1 %v16886_v5  ;;  %13999 = vmatprep.subr.mxu0 %v16886_v5 }
 0x894   :  { %13967 = vmatpush3.msra.mxu1 %v13461_v52  ;;  %14000 = vmatpush3.msra.mxu0 %v12733_v41  ;;  %v12726_v41 = vld [vmem:[%s16845_s8] sm:$0x1] }
 0x895   :  { %13968 = vmatprep.subr.mxu1 %v16886_v5  ;;  %14001 = vmatprep.subr.mxu0 %v16886_v5 }
 0x896   :  { %13969 = vmatpush3.msra.mxu1 %v13460_v31  ;;  %14002 = vmatpush3.msra.mxu0 %v12732_v38 }
 0x897   :  { %13970 = vmatprep.subr.mxu1 %v16886_v5  ;;  %14003 = vmatprep.subr.mxu0 %v16886_v5 }
 0x898   :  { %13971 = vmatpush3.msra.mxu1 %v13459_v42  ;;  %14004 = vmatpush3.msra.mxu0 %v12731_v61 }
 0x899   :  { %13972 = vmatprep.subr.mxu1 %v16886_v5  ;;  %14005 = vmatprep.subr.mxu0 %v16886_v5 }
 0x89a   :  { %13973 = vmatpush3.msra.mxu1 %v13458_v0  ;;  %14006 = vmatpush3.msra.mxu0 %v12730_v15 }
 0x89b   :  { %13975 = vmatmul.mubr.msk.f32.vlgmr.msra.gmra.mxu1 %vm11461_vm0, %v12652_v34  ;;  %14012 = vmatprep.subr.mxu1 %v16886_v5 }
 0x89c   :  { %14044 = vmatprep.mubr.msk.f32.mxu1 %vm14174_vm3, %v16886_v5  ;;  %14007 = vmatprep.subr.mxu0 %v16886_v5 }
 0x89d   :  { %14008 = vmatpush3.msra.mxu0 %v12729_v23  ;;  %14013 = vmatpush3.msra.mxu1 %v12832_v22  ;;  %v12819_v22 = vld [vmem:[%s16848_s11 + $0x10] sm:$0xff] }
 0x89e   :  { %14014 = vmatprep.subr.mxu1 %v16886_v5 }
 0x89f   :  { %14015 = vmatpush3.msra.mxu1 %v12831_v36  ;;  %v12818_v36 = vld [vmem:[%s16848_s11 + $0x8] sm:$0xff] }
 0x8a0   :  { %14016 = vmatprep.subr.mxu1 %v16886_v5 }
 0x8a1   :  { %14017 = vmatpush3.msra.mxu1 %v12830_v27  ;;  %v12817_v27 = vld [vmem:[%s16848_s11] sm:$0xff]  ;;  %s14138_s11 = scalar_lea.vmem %s12912_s4, 16 }
 0x8a2   :  { %14018 = vmatprep.subr.mxu1 %v16886_v5  ;;  %p14139_p5 = scmp.ne.s32.totalorder %s12912_s4, %s14138_s11  ;;  %p14144_p7 = scmp.lt.s32.totalorder %s14142_s17, %s14138_s11 }
 0x8a3   :  { %14019 = vmatpush3.msra.mxu1 %v12829_v9  ;;  %v12745_v9 = vld [vmem:[%s16847_s10] sm:$0x1] }
 0x8a4   :  { %14020 = vmatprep.subr.mxu1 %v16886_v5  ;;  %p14145_p8 = por %p14144_p7, %p14143_p6 }
 0x8a5   :  { %14021 = vmatpush3.msra.mxu1 %v12828_v56 }
 0x8a6   :  { %14022 = vmatprep.subr.mxu1 %v16886_v5  ;;  %p14146_p9 = pnand %p14145_p8, %p14139_p5 }
 0x8a7   :  { %14023 = vmatpush3.msra.mxu1 %v12827_v29 }
 0x8a8   :  { %14024 = vmatprep.subr.mxu1 %v16886_v5 }
 0x8a9   :  { %14025 = vmatpush3.msra.mxu1 %v12826_v35 }
 0x8aa   :  { %14026 = vmatprep.subr.mxu1 %v16886_v5 }
 0x8ab   :  { %14027 = vmatpush3.msra.mxu1 %v12825_v28 }
 0x8ac   :  { %14028 = vmatprep.subr.mxu1 %v16886_v5 }
 0x8ad   :  { %14029 = vmatpush3.msra.mxu1 %v12824_v20  ;;  %v12833_v20 = vld [vmem:[%s16849_s12] sm:$0x1] }
 0x8ae   :  { %14030 = vmatprep.subr.mxu1 %v16886_v5 }
 0x8af   :  { %14031 = vmatpush3.msra.mxu1 %v12823_v1 }
 0x8b0   :  { %14032 = vmatprep.subr.mxu1 %v16886_v5 }
 0x8b1   :  { %14033 = vmatpush3.msra.mxu1 %v12822_v44 }
 0x8b2   :  { %14034 = vmatprep.subr.mxu1 %v16886_v5 }
 0x8b3   :  { %14035 = vmatpush3.msra.mxu1 %v12821_v59 }
 0x8b4   :  { %14036 = vmatprep.subr.mxu1 %v16886_v5 }
 0x8b5   :  { %14037 = vmatpush3.msra.mxu1 %v12820_v51 }
 0x8b6   :  { %14038 = vmatprep.subr.mxu1 %v16886_v5 }
 0x8b7   :  { %14039 = vmatpush3.msra.mxu1 %v12819_v22 }
 0x8b8   :  { %14040 = vmatprep.subr.mxu1 %v16886_v5 }
 0x8b9   :  { %14041 = vmatpush3.msra.mxu1 %v12818_v36 }
 0x8ba   :  { %14042 = vmatprep.subr.mxu1 %v16886_v5 }
 0x8bb   :  { %14043 = vmatpush3.msra.mxu1 %v12817_v27 }
 0x8f8   :  { %v11530_v57 = vpop.f32.mrf.mxu1  ;;  %v11841_v48 = vpop.f32.mrf.mxu0 }
 0x8fa   :  { %v13781_v30 = vpop.f32.mrf.mxu1  ;;  %v13833_v43 = vpop.f32.mrf.mxu0 }
 0x903   :  { %v11602_v3 = vpop.f32.mrf.mxu1 }
 0x904   :  { %v12001_v14 = vpop.f32.mrf.mxu0  ;;  %v11603_v54 = vadd.f32 %v11602_v3, %v11530_v57 }
 0x905   :  { %v13794_v25 = vpop.f32.mrf.mxu1 }
 0x906   :  { %v13859_v49 = vpop.f32.mrf.mxu0 }
 0x90f   :  { %v11681_v17 = vpop.f32.mrf.mxu1 }
 0x910   :  { %v12161_v8 = vpop.f32.mrf.mxu0  ;;  %v11685_v16 = vadd.f32 %v11681_v17, %v11603_v54 }
 0x911   :  { %v13807_v55 = vpop.f32.mrf.mxu1 }
 0x912   :  { %v13885_v7 = vpop.f32.mrf.mxu0 }
 0x91b   :  { %v11761_v21 = vpop.f32.mrf.mxu1 }
 0x91c   :  { %v11765_v46 = vadd.f32 %v11761_v21, %v11685_v16  ;;  %v12321_v47 = vpop.f32.mrf.mxu0 }
 0x91d   :  { %v13820_v32 = vpop.f32.mrf.mxu1 }
 0x91e   :  { %v13911_v45 = vpop.f32.mrf.mxu0  ;;  %v11845_v40 = vadd.f32 %v11841_v48, %v11765_v46 }
 0x927   :  { %v11921_v13 = vpop.f32.mrf.mxu1 }
 0x928   :  { %v11925_v63 = vadd.f32 %v11921_v13, %v11845_v40  ;;  %v12481_v50 = vpop.f32.mrf.mxu0 }
 0x929   :  { %v13846_v12 = vpop.f32.mrf.mxu1 }
 0x92a   :  { %v13937_v39 = vpop.f32.mrf.mxu0  ;;  %v12005_v11 = vadd.f32 %v12001_v14, %v11925_v63 }
 0x933   :  { %v12081_v6 = vpop.f32.mrf.mxu1 }
 0x934   :  { %v12641_v18 = vpop.f32.mrf.mxu0  ;;  %v12085_v0 = vadd.f32 %v12081_v6, %v12005_v11 }
 0x935   :  { %v13872_v2 = vpop.f32.mrf.mxu1 }
 0x936   :  { %v13963_v52 = vpop.f32.mrf.mxu0  ;;  %v12165_v60 = vadd.f32 %v12161_v8, %v12085_v0 }
 0x93d   :  { %v12241_v31 = vpop.f32.mrf.mxu1 }
 0x93e   :  { %v12245_v53 = vadd.f32 %v12241_v31, %v12165_v60 }
 0x93f   :  { %v13898_v42 = vpop.f32.mrf.mxu1 }
 0x940   :  { %v12325_v37 = vadd.f32 %v12321_v47, %v12245_v53 }
 0x947   :  { %v12401_v34 = vpop.f32.mrf.mxu1 }
 0x948   :  { %v12405_v58 = vadd.f32 %v12401_v34, %v12325_v37 }
 0x949   :  { %v13924_v26 = vpop.f32.mrf.mxu1 }
 0x94a   :  { %v12485_v10 = vadd.f32 %v12481_v50, %v12405_v58 }
 0x951   :  { %v12561_v62 = vpop.f32.mrf.mxu1 }
 0x952   :  { %v12565_v33 = vadd.f32 %v12561_v62, %v12485_v10 }
 0x953   :  { %v13950_v4 = vpop.f32.mrf.mxu1 }
 0x954   :  { %v12645_v24 = vadd.f32 %v12641_v18, %v12565_v33 }
 0x95b   :  { %v12721_v19 = vpop.f32.mrf.mxu1 }
 0x95c   :  { %v12725_v38 = vadd.f32 %v12721_v19, %v12645_v24 }
 0x95d   :  { %v13976_v61 = vpop.f32.mrf.mxu1 }
 0x95e   :  { %v12727_v15 = vadd.f32 %v12726_v41, %v12725_v38 }
 0x960   :  { %v12728_v23 = vmax.f32 %v12727_v15, 0.0 }
 0x962   :  { %14010 = vmatmul.mubr.f32.vlgmr.msra.gmra.mxu0 %v12728_v23 }
 0xa22   :  { %v12812_v56 = vpop.f32.mrf.mxu0 }
 0xa23   :  { %v12813_v29 = vadd.f32 %v12812_v56, %v12745_v9 }
 0xa24   :  { %v14011_v35 = vpop.f32.mrf.mxu0 }
 0xa25   :  { %v12816_v28 = vmax.f32 %v12813_v29, 0.0 }
 0xa27   :  { %14045 = vmatmul.mubr.f32.vlgmr.msra.gmra.mxu1 %v12816_v28 }
 0xae7   :  { %v12900_v1 = vpop.f32.mrf.mxu1 }
 0xae8   :  { %v12901_v44 = vadd.f32 %v12900_v1, %v12833_v20 }
 0xae9   :  { %v14046_v5 = vpop.f32.mrf.mxu1 }
 0xaea   :  { %12904 = vst [vmem:[#allocation5] sm:$0x1] %v12901_v44 }
 0xaeb   :  { %14149 = shalt.err (!%p14146_p9)
}
 0xaec   :  { %12914 = dma.vmem_to_hbm [thread:$0]  %s12912_s4, 16, %s16850_s13, [#allocation4]  }
 0xaed   :  { %14160 = dma.done.wait [#allocation4], 16  }
 0xaee   :  { %14161 = vsyncadd [#allocation4], 4294967280 }
 0xaef   :  { %12918 = vsyncpa [#allocation3], 1 }
 0xaf0   :  { %12919 = vsyncpa [#allocation4], 1 }

</bundles_post_ra>
